<compile_context>
chip_gen: v5e
topology: v5e:2x2
jax: 0.10.0
libtpu: 0.0.40
codegen_flags: <defaults>
</compile_context>

<pallas_src>
import math
import numpy as np
import jax
import jax.numpy as jnp
from jax.experimental import pallas as pl
from jax.experimental.pallas import tpu as pltpu

# ----------------------------- configuration --------------------------------
DIM = 32                      # C
H = W = 8                     # input_resolution
WINDOW = 4                    # window_size
SHIFT = 2                     # shift_size (SW-MSA path, exercises attn_mask)
NUM_HEADS = 4
HEAD_DIM = DIM // NUM_HEADS
MLP_HIDDEN = int(DIM * 4.0)   # mlp_ratio = 4.0
TIME_EMBED_DIM = 16
# NOTE: the PyTorch code broadcasts emb_out (B, out_channels, 1, 1) against
# x (B, H, W, C), i.e. emb_out is added along the H axis -> out_channels == H.
OUT_CHANNELS = H
N = WINDOW * WINDOW                      # tokens per window = 16
NWIN = (H // WINDOW) * (W // WINDOW)     # windows per image  = 4
TOK = NWIN * N                           # tokens per image   = 64
SCALE = HEAD_DIM ** -0.5                 # qk_scale = None -> head_dim ** -0.5
LN_EPS = 1e-5
NEG_INF = -1e9                           # blocks cross-window attention
B = 2
L = H * W
DTYPE = jnp.float32


# ------------------------------ helpers (glue) -------------------------------
def window_partition(x, ws):
    b, hh, ww, c = x.shape
    x = x.reshape(b, hh // ws, ws, ww // ws, ws, c)
    return x.transpose(0, 1, 3, 2, 4, 5).reshape(-1, ws, ws, c)


def window_reverse(windows, ws, hh, ww):
    b = windows.shape[0] // ((hh // ws) * (ww // ws))
    x = windows.reshape(b, hh // ws, ww // ws, ws, ws, -1)
    return x.transpose(0, 1, 3, 2, 4, 5).reshape(b, hh, ww, -1)


def _window_partition_np(x, ws):
    b, hh, ww, c = x.shape
    x = x.reshape(b, hh // ws, ws, ww // ws, ws, c)
    return x.transpose(0, 1, 3, 2, 4, 5).reshape(-1, ws, ws, c)


def build_attn_mask_np():
    """Exactly mirrors the SW-MSA mask construction in __init__."""
    if SHIFT == 0:
        return None
    img_mask = np.zeros((1, H, W, 1), np.float32)
    slices = (slice(0, -WINDOW), slice(-WINDOW, -SHIFT), slice(-SHIFT, None))
    cnt = 0
    for hs in slices:
        for ws_ in slices:
            img_mask[:, hs, ws_, :] = cnt
            cnt += 1
    mw = _window_partition_np(img_mask, WINDOW).reshape(-1, N)      # (nW, N)
    am = mw[:, None, :] - mw[:, :, None]                            # (nW, N, N)
    am = np.where(am != 0, -100.0, 0.0).astype(np.float32)
    return am


def relative_position_index_np():
    coords = np.stack(np.meshgrid(np.arange(WINDOW), np.arange(WINDOW), indexing="ij"))
    flat = coords.reshape(2, -1)
    rel = flat[:, :, None] - flat[:, None, :]            # (2, N, N)
    rel = rel.transpose(1, 2, 0).astype(np.int64)
    rel[:, :, 0] += WINDOW - 1
    rel[:, :, 1] += WINDOW - 1
    rel[:, :, 0] *= 2 * WINDOW - 1
    return rel.sum(-1)                                   # (N, N)


def build_maskbias_np(rel_bias_np):
    """Fold rel-pos bias + shift mask into one block-diagonal (nH, TOK, TOK)
    tensor (off-diagonal = NEG_INF kills cross-window attention exactly)."""
    am = build_attn_mask_np()                            # (nW, N, N) or None
    mb = np.full((NUM_HEADS, TOK, TOK), NEG_INF, np.float32)
    for w in range(NWIN):
        blk = rel_bias_np.copy()                         # (nH, N, N)
        if am is not None:
            blk = blk + am[w][None, :, :]
        mb[:, w * N:(w + 1) * N, w * N:(w + 1) * N] = blk
    return mb


def _erf(x):
    # Abramowitz & Stegun 7.1.26 polynomial (|err| < 1.5e-7): exact-GELU erf to
    # float32 precision, avoiding reliance on an in-kernel erf lowering.
    p = 0.3275911
    a1, a2, a3, a4, a5 = 0.254829592, -0.284496736, 1.421413741, -1.453152027, 1.061405429
    ax = jnp.abs(x)
    t = 1.0 / (1.0 + p * ax)
    poly = ((((a5 * t + a4) * t + a3) * t + a2) * t + a1) * t
    y = 1.0 - poly * jnp.exp(-ax * ax)
    return jnp.where(x >= 0.0, y, -y)


# ------------------------------ Pallas kernels --------------------------------
def attn_kernel(xw_ref, mb_ref, g1_ref, b1_ref, qkvw_ref, qkvb_ref,
                projw_ref, projb_ref, o_ref, acc_ref):
    """All windows of one batch image: norm1 -> QKV -> W-MSA -> proj."""
    x = xw_ref[...].astype(jnp.float32)                        # (TOK, C)
    # LayerNorm (norm1) — per token over channels; commutes with roll/partition.
    mu = jnp.mean(x, axis=-1, keepdims=True)
    var = jnp.mean((x - mu) ** 2, axis=-1, keepdims=True)
    xn = (x - mu) * jax.lax.rsqrt(var + LN_EPS)
    xn = xn * g1_ref[...] + b1_ref[...]
    # QKV projection for all 64 tokens at once (weights pre-transposed).
    qkv = jnp.dot(xn, qkvw_ref[...], preferred_element_type=jnp.float32) + qkvb_ref[...]
    for h in range(NUM_HEADS):
        q = qkv[:, h * HEAD_DIM:(h + 1) * HEAD_DIM] * SCALE
        k = qkv[:, DIM + h * HEAD_DIM: DIM + (h + 1) * HEAD_DIM]
        v = qkv[:, 2 * DIM + h * HEAD_DIM: 2 * DIM + (h + 1) * HEAD_DIM]
        # Block-diagonal scores over all windows at once: (TOK, TOK).
        s = jax.lax.dot_general(q, k, (((1,), (1,)), ((), ())),
                                preferred_element_type=jnp.float32)
        s = s + mb_ref[h]                                   # rel bias + shift mask + NEG_INF
        s = s - jnp.max(s, axis=-1, keepdims=True)
        e = jnp.exp(s)                                      # cross-window entries -> exactly 0
        inv = pl.reciprocal(jnp.sum(e, axis=-1, keepdims=True), approx=True)
        p = e * inv
        acc_ref[:, h * HEAD_DIM:(h + 1) * HEAD_DIM] = jnp.dot(
            p, v, preferred_element_type=jnp.float32)       # (TOK, HEAD_DIM)
    o = jnp.dot(acc_ref[...], projw_ref[...],
                preferred_element_type=jnp.float32) + projb_ref[...]
    o_ref[...] = o.astype(o_ref.dtype)


def mlp_kernel(short_ref, attn_ref, emb_ref, g2_ref, b2_ref,
               w1_ref, fb1_ref, w2_ref, fb2_ref, o_ref):
    """x = shortcut + attn + emb ; out = x + fc2(gelu(fc1(layernorm(x))))."""
    x = (short_ref[...].astype(jnp.float32)
         + attn_ref[...].astype(jnp.float32)
         + emb_ref[...].astype(jnp.float32))                # (TOK, C) + (TOK, 1)
    mu = jnp.mean(x, axis=-1, keepdims=True)
    var = jnp.mean((x - mu) ** 2, axis=-1, keepdims=True)
    xn = (x - mu) * jax.lax.rsqrt(var + LN_EPS)
    xn = xn * g2_ref[...] + b2_ref[...]
    hdn = jnp.dot(xn, w1_ref[...], preferred_element_type=jnp.float32) + fb1_ref[...]
    g = 0.5 * hdn * (1.0 + _erf(hdn * (1.0 / math.sqrt(2.0))))      # exact GELU
    y = jnp.dot(g, w2_ref[...], preferred_element_type=jnp.float32) + fb2_ref[...]
    o_ref[...] = (x + y).astype(o_ref.dtype)


# ------------------------------ kernel wrappers --------------------------------
def window_attention_pallas(xw_b, maskbias, params):
    """xw_b: (B, TOK, C) — all windows of one image handled per grid step."""
    b = xw_b.shape[0]
    full2 = lambda i: (0, 0)
    return pl.pallas_call(
        attn_kernel,
        out_shape=jax.ShapeDtypeStruct(xw_b.shape, xw_b.dtype),
        grid=(b,),
        in_specs=[
            pl.BlockSpec((None, TOK, DIM), lambda i: (i, 0, 0)),
            pl.BlockSpec((NUM_HEADS, TOK, TOK), lambda i: (0, 0, 0)),
            pl.BlockSpec((1, DIM), full2),
            pl.BlockSpec((1, DIM), full2),
            pl.BlockSpec((DIM, 3 * DIM), full2),
            pl.BlockSpec((1, 3 * DIM), full2),
            pl.BlockSpec((DIM, DIM), full2),
            pl.BlockSpec((1, DIM), full2),
        ],
        out_specs=pl.BlockSpec((None, TOK, DIM), lambda i: (i, 0, 0)),
        scratch_shapes=[pltpu.VMEM((TOK, DIM), jnp.float32)],
        compiler_params=pltpu.CompilerParams(dimension_semantics=("parallel",)),
    )(xw_b, maskbias,
      params["g1"], params["b1"], params["qkv_w"], params["qkv_b"],
      params["proj_w"], params["proj_b"])


def mlp_pallas(shortcut, attn_tok, emb_tok, params):
    b, l, c = shortcut.shape
    full2 = lambda i: (0, 0)
    return pl.pallas_call(
        mlp_kernel,
        out_shape=jax.ShapeDtypeStruct((b, l, c), shortcut.dtype),
        grid=(b,),
        in_specs=[
            pl.BlockSpec((None, l, c), lambda i: (i, 0, 0)),
            pl.BlockSpec((None, l, c), lambda i: (i, 0, 0)),
            pl.BlockSpec((None, l, 1), lambda i: (i, 0, 0)),
            pl.BlockSpec((1, DIM), full2),
            pl.BlockSpec((1, DIM), full2),
            pl.BlockSpec((DIM, MLP_HIDDEN), full2),
            pl.BlockSpec((1, MLP_HIDDEN), full2),
            pl.BlockSpec((MLP_HIDDEN, DIM), full2),
            pl.BlockSpec((1, DIM), full2),
        ],
        out_specs=pl.BlockSpec((None, l, c), lambda i: (i, 0, 0)),
        compiler_params=pltpu.CompilerParams(dimension_semantics=("parallel",)),
    )(shortcut, attn_tok, emb_tok,
      params["g2"], params["b2"], params["w1"], params["fb1"],
      params["w2"], params["fb2"])


# ------------------------------ full forward -----------------------------------
def swin_block_forward(x, emb, params, maskbias):
    b, l, c = x.shape
    assert l == H * W and c == DIM
    shortcut = x
    # norm1 is fused into the attention kernel (per-token LN commutes with
    # roll / window partition).
    x4 = x.reshape(b, H, W, c)
    if SHIFT > 0:
        x4 = jnp.roll(x4, shift=(-SHIFT, -SHIFT), axis=(1, 2))
    xw = window_partition(x4, WINDOW)                      # (b*nW, ws, ws, C)
    xw = xw.reshape(b, TOK, c)                             # (b, nW*N, C)

    aw = window_attention_pallas(xw, maskbias, params)     # (b, nW*N, C)
    aw = aw.reshape(b * NWIN, WINDOW, WINDOW, c)
    x4 = window_reverse(aw, WINDOW, H, W)
    if SHIFT > 0:
        x4 = jnp.roll(x4, shift=(SHIFT, SHIFT), axis=(1, 2))
    attn_tok = x4.reshape(b, l, c)

    # emb_layers = SiLU -> Linear ; PyTorch broadcast adds emb_out along the H
    # axis of (B, H, W, C) (out_channels == H).  Token l = h*W + w -> emb_out[:, h].
    emb_out = jnp.dot(jax.nn.silu(emb), params["emb_w"]) + params["emb_b"]   # (b, H)
    emb_tok = jnp.repeat(emb_out, W, axis=1)[..., None]                      # (b, L, 1)

    # shortcut + attn + emb, norm2, MLP and final residual all fused in Pallas.
    return mlp_pallas(shortcut, attn_tok, emb_tok, params)


# ------------------------------ parameters --------------------------------------
def make_params():
    key = jax.random.PRNGKey(0)
    ks = jax.random.split(key, 12)

    def init(k, shape, scale=0.02):
        return (jax.random.normal(k, shape, jnp.float32) * scale).astype(DTYPE)

    params = {
        "g1": jnp.ones((1, DIM), DTYPE), "b1": jnp.zeros((1, DIM), DTYPE),
        "qkv_w": init(ks[0], (DIM, 3 * DIM)),        # stored pre-transposed
        "qkv_b": init(ks[1], (1, 3 * DIM)),
        "proj_w": init(ks[2], (DIM, DIM)),
        "proj_b": init(ks[3], (1, DIM)),
        "g2": jnp.ones((1, DIM), DTYPE), "b2": jnp.zeros((1, DIM), DTYPE),
        "w1": init(ks[4], (DIM, MLP_HIDDEN)), "fb1": init(ks[5], (1, MLP_HIDDEN)),
        "w2": init(ks[6], (MLP_HIDDEN, DIM)), "fb2": init(ks[7], (1, DIM)),
        "emb_w": init(ks[8], (TIME_EMBED_DIM, OUT_CHANNELS)),
        "emb_b": init(ks[9], (1, OUT_CHANNELS)),
    }
    # relative position bias: table ((2w-1)^2, nH) gathered by precomputed index.
    table = jax.random.normal(ks[10], ((2 * WINDOW - 1) ** 2, NUM_HEADS), jnp.float32) * 0.02
    idx = relative_position_index_np().reshape(-1)                 # (N*N,)
    rel_bias_np = np.asarray(table)[idx].reshape(N, N, NUM_HEADS)
    rel_bias_np = rel_bias_np.transpose(2, 0, 1).astype(np.float32)   # (nH, N, N)
    # combined (rel bias + shift mask + cross-window block) tensor, built once.
    maskbias = jnp.asarray(build_maskbias_np(rel_bias_np), DTYPE)     # (nH, TOK, TOK)
    return params, maskbias


# ------------------------------ main ---------------------------------------------
if __name__ == "__main__":
    params, maskbias = make_params()

    dkey = jax.random.PRNGKey(0)
    kx, ke = jax.random.split(dkey)
    x = jax.random.normal(kx, (B, L, DIM), DTYPE)          # (B, H*W, C)
    emb = jax.random.normal(ke, (B, TIME_EMBED_DIM), DTYPE)

    fwd = jax.jit(lambda xx, ee: swin_block_forward(xx, ee, params, maskbias))
    out = fwd(x, emb)
    jax.block_until_ready(out)
    assert out.shape == (B, L, DIM) and out.dtype == DTYPE
    assert bool(jnp.all(jnp.isfinite(out)))
    # TODO(synk): torch.utils.checkpoint (use_checkpoint=False) has no runtime effect; omitted.
    print("KERNEL_OK")
</pallas_src>

<mosaic_0001>
module attributes {stable_mosaic.version = 11 : i64} {
  func.func @attn_kernel(%arg0: i32, %arg1: memref<1x64x32xf32, #tpu.memory_space<vmem>>, %arg2: memref<4x64x64xf32, #tpu.memory_space<vmem>>, %arg3: memref<1x32xf32, #tpu.memory_space<vmem>>, %arg4: memref<1x32xf32, #tpu.memory_space<vmem>>, %arg5: memref<32x96xf32, #tpu.memory_space<vmem>>, %arg6: memref<1x96xf32, #tpu.memory_space<vmem>>, %arg7: memref<32x32xf32, #tpu.memory_space<vmem>>, %arg8: memref<1x32xf32, #tpu.memory_space<vmem>>, %arg9: memref<1x64x32xf32, #tpu.memory_space<vmem>>, %arg10: memref<64x32xf32, #tpu.memory_space<vmem>>) attributes {dimension_semantics = [#tpu.dimension_semantics<parallel>], iteration_bounds = array<i64: 2>, scalar_prefetch = 0 : i64, scratch_operands = 1 : i64, tpu.core_type = #tpu.core_type<tc>, window_params = [{transform_indices = @transform_0, window_bounds = array<i64: 1, 64, 32>}, {pipeline_mode = #tpu.pipeline_mode<synchronous>, transform_indices = @transform_1, window_bounds = array<i64: 4, 64, 64>}, {pipeline_mode = #tpu.pipeline_mode<synchronous>, transform_indices = @transform_2, window_bounds = array<i64: 1, 32>}, {pipeline_mode = #tpu.pipeline_mode<synchronous>, transform_indices = @transform_3, window_bounds = array<i64: 1, 32>}, {pipeline_mode = #tpu.pipeline_mode<synchronous>, transform_indices = @transform_4, window_bounds = array<i64: 32, 96>}, {pipeline_mode = #tpu.pipeline_mode<synchronous>, transform_indices = @transform_5, window_bounds = array<i64: 1, 96>}, {pipeline_mode = #tpu.pipeline_mode<synchronous>, transform_indices = @transform_6, window_bounds = array<i64: 32, 32>}, {pipeline_mode = #tpu.pipeline_mode<synchronous>, transform_indices = @transform_7, window_bounds = array<i64: 1, 32>}, {transform_indices = @transform_8, window_bounds = array<i64: 1, 64, 32>}]} {
    %c0 = arith.constant 0 : index
    %c0_0 = arith.constant 0 : index
    %c0_1 = arith.constant 0 : index
    %0 = vector.load %arg1[%c0, %c0_0, %c0_1] : memref<1x64x32xf32, #tpu.memory_space<vmem>>, vector<1x64x32xf32>
    %1 = vector.shape_cast %0 : vector<1x64x32xf32> to vector<64x32xf32>
    %cst = arith.constant dense<0.000000e+00> : vector<64xf32>
    %2 = vector.multi_reduction <add>, %1, %cst [1] : vector<64x32xf32> to vector<64xf32>
    %3 = vector.shape_cast %2 : vector<64xf32> to vector<64x1xf32>
    %cst_2 = arith.constant 3.200000e+01 : f32
    %4 = vector.broadcast %cst_2 : f32 to vector<64x1xf32>
    %5 = arith.divf %3, %4 : vector<64x1xf32>
    %6 = vector.broadcast %5 : vector<64x1xf32> to vector<64x32xf32>
    %7 = arith.subf %1, %6 : vector<64x32xf32>
    %8 = arith.mulf %7, %7 : vector<64x32xf32>
    %cst_3 = arith.constant dense<0.000000e+00> : vector<64xf32>
    %9 = vector.multi_reduction <add>, %8, %cst_3 [1] : vector<64x32xf32> to vector<64xf32>
    %10 = vector.shape_cast %9 : vector<64xf32> to vector<64x1xf32>
    %cst_4 = arith.constant 3.200000e+01 : f32
    %11 = vector.broadcast %cst_4 : f32 to vector<64x1xf32>
    %12 = arith.divf %10, %11 : vector<64x1xf32>
    %13 = vector.broadcast %5 : vector<64x1xf32> to vector<64x32xf32>
    %14 = arith.subf %1, %13 : vector<64x32xf32>
    %cst_5 = arith.constant 9.99999974E-6 : f32
    %15 = vector.broadcast %cst_5 : f32 to vector<64x1xf32>
    %16 = arith.addf %12, %15 : vector<64x1xf32>
    %17 = math.rsqrt %16 : vector<64x1xf32>
    %18 = vector.broadcast %17 : vector<64x1xf32> to vector<64x32xf32>
    %19 = arith.mulf %14, %18 : vector<64x32xf32>
    %c0_6 = arith.constant 0 : index
    %c0_7 = arith.constant 0 : index
    %20 = vector.load %arg3[%c0_6, %c0_7] : memref<1x32xf32, #tpu.memory_space<vmem>>, vector<1x32xf32>
    %21 = vector.broadcast %20 : vector<1x32xf32> to vector<64x32xf32>
    %22 = arith.mulf %19, %21 : vector<64x32xf32>
    %c0_8 = arith.constant 0 : index
    %c0_9 = arith.constant 0 : index
    %23 = vector.load %arg4[%c0_8, %c0_9] : memref<1x32xf32, #tpu.memory_space<vmem>>, vector<1x32xf32>
    %24 = vector.broadcast %23 : vector<1x32xf32> to vector<64x32xf32>
    %25 = arith.addf %22, %24 : vector<64x32xf32>
    %c0_10 = arith.constant 0 : index
    %c0_11 = arith.constant 0 : index
    %26 = vector.load %arg5[%c0_10, %c0_11] : memref<32x96xf32, #tpu.memory_space<vmem>>, vector<32x96xf32>
    %cst_12 = arith.constant dense<0.000000e+00> : vector<64x96xf32>
    %27 = tpu.matmul %25, %26, %cst_12 {dimension_numbers = #tpu.dot_dimension_numbers<[1], [0], [0], [1], [0, 0, 1, 1], [], []>} : vector<64x32xf32>, vector<32x96xf32>, vector<64x96xf32> -> vector<64x96xf32>
    %c0_13 = arith.constant 0 : index
    %c0_14 = arith.constant 0 : index
    %28 = vector.load %arg6[%c0_13, %c0_14] : memref<1x96xf32, #tpu.memory_space<vmem>>, vector<1x96xf32>
    %29 = vector.broadcast %28 : vector<1x96xf32> to vector<64x96xf32>
    %30 = arith.addf %27, %29 : vector<64x96xf32>
    %31 = vector.extract_strided_slice %30 {offsets = [0, 0], sizes = [64, 8], strides = [1, 1]} : vector<64x96xf32> to vector<64x8xf32>
    %cst_15 = arith.constant 0.353553385 : f32
    %32 = vector.broadcast %cst_15 : f32 to vector<64x8xf32>
    %33 = arith.mulf %31, %32 : vector<64x8xf32>
    %34 = vector.extract_strided_slice %30 {offsets = [0, 32], sizes = [64, 8], strides = [1, 1]} : vector<64x96xf32> to vector<64x8xf32>
    %35 = vector.extract_strided_slice %30 {offsets = [0, 64], sizes = [64, 8], strides = [1, 1]} : vector<64x96xf32> to vector<64x8xf32>
    %cst_16 = arith.constant dense<0.000000e+00> : vector<64x64xf32>
    %36 = tpu.matmul %33, %34, %cst_16 {dimension_numbers = #tpu.dot_dimension_numbers<[1], [1], [0], [0], [0, 0, 1, 0], [], []>} : vector<64x8xf32>, vector<64x8xf32>, vector<64x64xf32> -> vector<64x64xf32>
    %c0_17 = arith.constant 0 : index
    %c0_18 = arith.constant 0 : index
    %c0_19 = arith.constant 0 : index
    %37 = vector.load %arg2[%c0_17, %c0_18, %c0_19] : memref<4x64x64xf32, #tpu.memory_space<vmem>>, vector<1x64x64xf32>
    %38 = vector.shape_cast %37 : vector<1x64x64xf32> to vector<64x64xf32>
    %39 = arith.addf %36, %38 : vector<64x64xf32>
    %cst_20 = arith.constant dense<0xFF800000> : vector<64xf32>
    %40 = vector.multi_reduction <maximumf>, %39, %cst_20 [1] : vector<64x64xf32> to vector<64xf32>
    %41 = vector.shape_cast %40 : vector<64xf32> to vector<64x1xf32>
    %42 = vector.broadcast %41 : vector<64x1xf32> to vector<64x64xf32>
    %43 = arith.subf %39, %42 : vector<64x64xf32>
    %44 = math.exp %43 : vector<64x64xf32>
    %cst_21 = arith.constant dense<0.000000e+00> : vector<64xf32>
    %45 = vector.multi_reduction <add>, %44, %cst_21 [1] : vector<64x64xf32> to vector<64xf32>
    %46 = vector.shape_cast %45 : vector<64xf32> to vector<64x1xf32>
    %47 = tpu.reciprocal %46 {approx = true} : vector<64x1xf32> -> vector<64x1xf32>
    %48 = vector.broadcast %47 : vector<64x1xf32> to vector<64x64xf32>
    %49 = arith.mulf %44, %48 : vector<64x64xf32>
    %cst_22 = arith.constant dense<0.000000e+00> : vector<64x8xf32>
    %50 = tpu.matmul %49, %35, %cst_22 {dimension_numbers = #tpu.dot_dimension_numbers<[1], [0], [0], [1], [0, 0, 1, 1], [], []>} : vector<64x64xf32>, vector<64x8xf32>, vector<64x8xf32> -> vector<64x8xf32>
    %c0_23 = arith.constant 0 : index
    %c0_24 = arith.constant 0 : index
    %51 = vector.load %arg10[%c0_23, %c0_24] : memref<64x32xf32, #tpu.memory_space<vmem>>, vector<64x8xf32>
    tpu.vector_store %arg10[%c0_23, %c0_24], %50 {strides = array<i32>} : memref<64x32xf32, #tpu.memory_space<vmem>>, vector<64x8xf32>,
    %52 = vector.extract_strided_slice %30 {offsets = [0, 8], sizes = [64, 8], strides = [1, 1]} : vector<64x96xf32> to vector<64x8xf32>
    %cst_25 = arith.constant 0.353553385 : f32
    %53 = vector.broadcast %cst_25 : f32 to vector<64x8xf32>
    %54 = arith.mulf %52, %53 : vector<64x8xf32>
    %55 = vector.extract_strided_slice %30 {offsets = [0, 40], sizes = [64, 8], strides = [1, 1]} : vector<64x96xf32> to vector<64x8xf32>
    %56 = vector.extract_strided_slice %30 {offsets = [0, 72], sizes = [64, 8], strides = [1, 1]} : vector<64x96xf32> to vector<64x8xf32>
    %cst_26 = arith.constant dense<0.000000e+00> : vector<64x64xf32>
    %57 = tpu.matmul %54, %55, %cst_26 {dimension_numbers = #tpu.dot_dimension_numbers<[1], [1], [0], [0], [0, 0, 1, 0], [], []>} : vector<64x8xf32>, vector<64x8xf32>, vector<64x64xf32> -> vector<64x64xf32>
    %c1 = arith.constant 1 : index
    %c0_27 = arith.constant 0 : index
    %c0_28 = arith.constant 0 : index
    %58 = vector.load %arg2[%c1, %c0_27, %c0_28] : memref<4x64x64xf32, #tpu.memory_space<vmem>>, vector<1x64x64xf32>
    %59 = vector.shape_cast %58 : vector<1x64x64xf32> to vector<64x64xf32>
    %60 = arith.addf %57, %59 : vector<64x64xf32>
    %cst_29 = arith.constant dense<0xFF800000> : vector<64xf32>
    %61 = vector.multi_reduction <maximumf>, %60, %cst_29 [1] : vector<64x64xf32> to vector<64xf32>
    %62 = vector.shape_cast %61 : vector<64xf32> to vector<64x1xf32>
    %63 = vector.broadcast %62 : vector<64x1xf32> to vector<64x64xf32>
    %64 = arith.subf %60, %63 : vector<64x64xf32>
    %65 = math.exp %64 : vector<64x64xf32>
    %cst_30 = arith.constant dense<0.000000e+00> : vector<64xf32>
    %66 = vector.multi_reduction <add>, %65, %cst_30 [1] : vector<64x64xf32> to vector<64xf32>
    %67 = vector.shape_cast %66 : vector<64xf32> to vector<64x1xf32>
    %68 = tpu.reciprocal %67 {approx = true} : vector<64x1xf32> -> vector<64x1xf32>
    %69 = vector.broadcast %68 : vector<64x1xf32> to vector<64x64xf32>
    %70 = arith.mulf %65, %69 : vector<64x64xf32>
    %cst_31 = arith.constant dense<0.000000e+00> : vector<64x8xf32>
    %71 = tpu.matmul %70, %56, %cst_31 {dimension_numbers = #tpu.dot_dimension_numbers<[1], [0], [0], [1], [0, 0, 1, 1], [], []>} : vector<64x64xf32>, vector<64x8xf32>, vector<64x8xf32> -> vector<64x8xf32>
    %c0_32 = arith.constant 0 : index
    %c8 = arith.constant 8 : index
    %72 = vector.load %arg10[%c0_32, %c8] : memref<64x32xf32, #tpu.memory_space<vmem>>, vector<64x8xf32>
    tpu.vector_store %arg10[%c0_32, %c8], %71 {strides = array<i32>} : memref<64x32xf32, #tpu.memory_space<vmem>>, vector<64x8xf32>,
    %73 = vector.extract_strided_slice %30 {offsets = [0, 16], sizes = [64, 8], strides = [1, 1]} : vector<64x96xf32> to vector<64x8xf32>
    %cst_33 = arith.constant 0.353553385 : f32
    %74 = vector.broadcast %cst_33 : f32 to vector<64x8xf32>
    %75 = arith.mulf %73, %74 : vector<64x8xf32>
    %76 = vector.extract_strided_slice %30 {offsets = [0, 48], sizes = [64, 8], strides = [1, 1]} : vector<64x96xf32> to vector<64x8xf32>
    %77 = vector.extract_strided_slice %30 {offsets = [0, 80], sizes = [64, 8], strides = [1, 1]} : vector<64x96xf32> to vector<64x8xf32>
    %cst_34 = arith.constant dense<0.000000e+00> : vector<64x64xf32>
    %78 = tpu.matmul %75, %76, %cst_34 {dimension_numbers = #tpu.dot_dimension_numbers<[1], [1], [0], [0], [0, 0, 1, 0], [], []>} : vector<64x8xf32>, vector<64x8xf32>, vector<64x64xf32> -> vector<64x64xf32>
    %c2 = arith.constant 2 : index
    %c0_35 = arith.constant 0 : index
    %c0_36 = arith.constant 0 : index
    %79 = vector.load %arg2[%c2, %c0_35, %c0_36] : memref<4x64x64xf32, #tpu.memory_space<vmem>>, vector<1x64x64xf32>
    %80 = vector.shape_cast %79 : vector<1x64x64xf32> to vector<64x64xf32>
    %81 = arith.addf %78, %80 : vector<64x64xf32>
    %cst_37 = arith.constant dense<0xFF800000> : vector<64xf32>
    %82 = vector.multi_reduction <maximumf>, %81, %cst_37 [1] : vector<64x64xf32> to vector<64xf32>
    %83 = vector.shape_cast %82 : vector<64xf32> to vector<64x1xf32>
    %84 = vector.broadcast %83 : vector<64x1xf32> to vector<64x64xf32>
    %85 = arith.subf %81, %84 : vector<64x64xf32>
    %86 = math.exp %85 : vector<64x64xf32>
    %cst_38 = arith.constant dense<0.000000e+00> : vector<64xf32>
    %87 = vector.multi_reduction <add>, %86, %cst_38 [1] : vector<64x64xf32> to vector<64xf32>
    %88 = vector.shape_cast %87 : vector<64xf32> to vector<64x1xf32>
    %89 = tpu.reciprocal %88 {approx = true} : vector<64x1xf32> -> vector<64x1xf32>
    %90 = vector.broadcast %89 : vector<64x1xf32> to vector<64x64xf32>
    %91 = arith.mulf %86, %90 : vector<64x64xf32>
    %cst_39 = arith.constant dense<0.000000e+00> : vector<64x8xf32>
    %92 = tpu.matmul %91, %77, %cst_39 {dimension_numbers = #tpu.dot_dimension_numbers<[1], [0], [0], [1], [0, 0, 1, 1], [], []>} : vector<64x64xf32>, vector<64x8xf32>, vector<64x8xf32> -> vector<64x8xf32>
    %c0_40 = arith.constant 0 : index
    %c16 = arith.constant 16 : index
    %93 = vector.load %arg10[%c0_40, %c16] : memref<64x32xf32, #tpu.memory_space<vmem>>, vector<64x8xf32>
    tpu.vector_store %arg10[%c0_40, %c16], %92 {strides = array<i32>} : memref<64x32xf32, #tpu.memory_space<vmem>>, vector<64x8xf32>,
    %94 = vector.extract_strided_slice %30 {offsets = [0, 24], sizes = [64, 8], strides = [1, 1]} : vector<64x96xf32> to vector<64x8xf32>
    %cst_41 = arith.constant 0.353553385 : f32
    %95 = vector.broadcast %cst_41 : f32 to vector<64x8xf32>
    %96 = arith.mulf %94, %95 : vector<64x8xf32>
    %97 = vector.extract_strided_slice %30 {offsets = [0, 56], sizes = [64, 8], strides = [1, 1]} : vector<64x96xf32> to vector<64x8xf32>
    %98 = vector.extract_strided_slice %30 {offsets = [0, 88], sizes = [64, 8], strides = [1, 1]} : vector<64x96xf32> to vector<64x8xf32>
    %cst_42 = arith.constant dense<0.000000e+00> : vector<64x64xf32>
    %99 = tpu.matmul %96, %97, %cst_42 {dimension_numbers = #tpu.dot_dimension_numbers<[1], [1], [0], [0], [0, 0, 1, 0], [], []>} : vector<64x8xf32>, vector<64x8xf32>, vector<64x64xf32> -> vector<64x64xf32>
    %c3 = arith.constant 3 : index
    %c0_43 = arith.constant 0 : index
    %c0_44 = arith.constant 0 : index
    %100 = vector.load %arg2[%c3, %c0_43, %c0_44] : memref<4x64x64xf32, #tpu.memory_space<vmem>>, vector<1x64x64xf32>
    %101 = vector.shape_cast %100 : vector<1x64x64xf32> to vector<64x64xf32>
    %102 = arith.addf %99, %101 : vector<64x64xf32>
    %cst_45 = arith.constant dense<0xFF800000> : vector<64xf32>
    %103 = vector.multi_reduction <maximumf>, %102, %cst_45 [1] : vector<64x64xf32> to vector<64xf32>
    %104 = vector.shape_cast %103 : vector<64xf32> to vector<64x1xf32>
    %105 = vector.broadcast %104 : vector<64x1xf32> to vector<64x64xf32>
    %106 = arith.subf %102, %105 : vector<64x64xf32>
    %107 = math.exp %106 : vector<64x64xf32>
    %cst_46 = arith.constant dense<0.000000e+00> : vector<64xf32>
    %108 = vector.multi_reduction <add>, %107, %cst_46 [1] : vector<64x64xf32> to vector<64xf32>
    %109 = vector.shape_cast %108 : vector<64xf32> to vector<64x1xf32>
    %110 = tpu.reciprocal %109 {approx = true} : vector<64x1xf32> -> vector<64x1xf32>
    %111 = vector.broadcast %110 : vector<64x1xf32> to vector<64x64xf32>
    %112 = arith.mulf %107, %111 : vector<64x64xf32>
    %cst_47 = arith.constant dense<0.000000e+00> : vector<64x8xf32>
    %113 = tpu.matmul %112, %98, %cst_47 {dimension_numbers = #tpu.dot_dimension_numbers<[1], [0], [0], [1], [0, 0, 1, 1], [], []>} : vector<64x64xf32>, vector<64x8xf32>, vector<64x8xf32> -> vector<64x8xf32>
    %c0_48 = arith.constant 0 : index
    %c24 = arith.constant 24 : index
    %114 = vector.load %arg10[%c0_48, %c24] : memref<64x32xf32, #tpu.memory_space<vmem>>, vector<64x8xf32>
    tpu.vector_store %arg10[%c0_48, %c24], %113 {strides = array<i32>} : memref<64x32xf32, #tpu.memory_space<vmem>>, vector<64x8xf32>,
    %c0_49 = arith.constant 0 : index
    %c0_50 = arith.constant 0 : index
    %115 = vector.load %arg10[%c0_49, %c0_50] : memref<64x32xf32, #tpu.memory_space<vmem>>, vector<64x32xf32>
    %c0_51 = arith.constant 0 : index
    %c0_52 = arith.constant 0 : index
    %116 = vector.load %arg7[%c0_51, %c0_52] : memref<32x32xf32, #tpu.memory_space<vmem>>, vector<32x32xf32>
    %cst_53 = arith.constant dense<0.000000e+00> : vector<64x32xf32>
    %117 = tpu.matmul %115, %116, %cst_53 {dimension_numbers = #tpu.dot_dimension_numbers<[1], [0], [0], [1], [0, 0, 1, 1], [], []>} : vector<64x32xf32>, vector<32x32xf32>, vector<64x32xf32> -> vector<64x32xf32>
    %c0_54 = arith.constant 0 : index
    %c0_55 = arith.constant 0 : index
    %118 = vector.load %arg8[%c0_54, %c0_55] : memref<1x32xf32, #tpu.memory_space<vmem>>, vector<1x32xf32>
    %119 = vector.broadcast %118 : vector<1x32xf32> to vector<64x32xf32>
    %120 = arith.addf %117, %119 : vector<64x32xf32>
    %c0_56 = arith.constant 0 : index
    %c0_57 = arith.constant 0 : index
    %c0_58 = arith.constant 0 : index
    %121 = vector.load %arg9[%c0_56, %c0_57, %c0_58] : memref<1x64x32xf32, #tpu.memory_space<vmem>>, vector<1x64x32xf32>
    %122 = vector.shape_cast %121 : vector<1x64x32xf32> to vector<64x32xf32>
    %123 = vector.shape_cast %120 : vector<64x32xf32> to vector<1x64x32xf32>
    tpu.vector_store %arg9[%c0_56, %c0_57, %c0_58], %123 {strides = array<i32>} : memref<1x64x32xf32, #tpu.memory_space<vmem>>, vector<1x64x32xf32>,
    return
  }
  func.func @transform_0(%arg0: i32) -> (i32, i32, i32) {
    %c0_i32 = arith.constant 0 : i32
    %c0_i32_0 = arith.constant 0 : i32
    %c0_i32_1 = arith.constant 0 : i32
    return %arg0, %c0_i32, %c0_i32_0 : i32, i32, i32
  }
  func.func @transform_1(%arg0: i32) -> (i32, i32, i32) {
    %c0_i32 = arith.constant 0 : i32
    %c0_i32_0 = arith.constant 0 : i32
    %c0_i32_1 = arith.constant 0 : i32
    %c0_i32_2 = arith.constant 0 : i32
    return %c0_i32, %c0_i32_0, %c0_i32_1 : i32, i32, i32
  }
  func.func @transform_2(%arg0: i32) -> (i32, i32) {
    %c0_i32 = arith.constant 0 : i32
    %c0_i32_0 = arith.constant 0 : i32
    %c0_i32_1 = arith.constant 0 : i32
    return %c0_i32, %c0_i32_0 : i32, i32
  }
  func.func @transform_3(%arg0: i32) -> (i32, i32) {
    %c0_i32 = arith.constant 0 : i32
    %c0_i32_0 = arith.constant 0 : i32
    %c0_i32_1 = arith.constant 0 : i32
    return %c0_i32, %c0_i32_0 : i32, i32
  }
  func.func @transform_4(%arg0: i32) -> (i32, i32) {
    %c0_i32 = arith.constant 0 : i32
    %c0_i32_0 = arith.constant 0 : i32
    %c0_i32_1 = arith.constant 0 : i32
    return %c0_i32, %c0_i32_0 : i32, i32
  }
  func.func @transform_5(%arg0: i32) -> (i32, i32) {
    %c0_i32 = arith.constant 0 : i32
    %c0_i32_0 = arith.constant 0 : i32
    %c0_i32_1 = arith.constant 0 : i32
    return %c0_i32, %c0_i32_0 : i32, i32
  }
  func.func @transform_6(%arg0: i32) -> (i32, i32) {
    %c0_i32 = arith.constant 0 : i32
    %c0_i32_0 = arith.constant 0 : i32
    %c0_i32_1 = arith.constant 0 : i32
    return %c0_i32, %c0_i32_0 : i32, i32
  }
  func.func @transform_7(%arg0: i32) -> (i32, i32) {
    %c0_i32 = arith.constant 0 : i32
    %c0_i32_0 = arith.constant 0 : i32
    %c0_i32_1 = arith.constant 0 : i32
    return %c0_i32, %c0_i32_0 : i32, i32
  }
  func.func @transform_8(%arg0: i32) -> (i32, i32, i32) {
    %c0_i32 = arith.constant 0 : i32
    %c0_i32_0 = arith.constant 0 : i32
    %c0_i32_1 = arith.constant 0 : i32
    return %arg0, %c0_i32, %c0_i32_0 : i32, i32, i32
  }
}

module attributes {stable_mosaic.version = 11 : i64} {
  func.func @mlp_kernel(%arg0: i32, %arg1: memref<1x64x32xf32, #tpu.memory_space<vmem>>, %arg2: memref<1x64x32xf32, #tpu.memory_space<vmem>>, %arg3: memref<1x64x1xf32, #tpu.memory_space<vmem>>, %arg4: memref<1x32xf32, #tpu.memory_space<vmem>>, %arg5: memref<1x32xf32, #tpu.memory_space<vmem>>, %arg6: memref<32x128xf32, #tpu.memory_space<vmem>>, %arg7: memref<1x128xf32, #tpu.memory_space<vmem>>, %arg8: memref<128x32xf32, #tpu.memory_space<vmem>>, %arg9: memref<1x32xf32, #tpu.memory_space<vmem>>, %arg10: memref<1x64x32xf32, #tpu.memory_space<vmem>>) attributes {dimension_semantics = [#tpu.dimension_semantics<parallel>], iteration_bounds = array<i64: 2>, scalar_prefetch = 0 : i64, scratch_operands = 0 : i64, tpu.core_type = #tpu.core_type<tc>, window_params = [{transform_indices = @transform_0, window_bounds = array<i64: 1, 64, 32>}, {transform_indices = @transform_1, window_bounds = array<i64: 1, 64, 32>}, {transform_indices = @transform_2, window_bounds = array<i64: 1, 64, 1>}, {pipeline_mode = #tpu.pipeline_mode<synchronous>, transform_indices = @transform_3, window_bounds = array<i64: 1, 32>}, {pipeline_mode = #tpu.pipeline_mode<synchronous>, transform_indices = @transform_4, window_bounds = array<i64: 1, 32>}, {pipeline_mode = #tpu.pipeline_mode<synchronous>, transform_indices = @transform_5, window_bounds = array<i64: 32, 128>}, {pipeline_mode = #tpu.pipeline_mode<synchronous>, transform_indices = @transform_6, window_bounds = array<i64: 1, 128>}, {pipeline_mode = #tpu.pipeline_mode<synchronous>, transform_indices = @transform_7, window_bounds = array<i64: 128, 32>}, {pipeline_mode = #tpu.pipeline_mode<synchronous>, transform_indices = @transform_8, window_bounds = array<i64: 1, 32>}, {transform_indices = @transform_9, window_bounds = array<i64: 1, 64, 32>}]} {
    %c0 = arith.constant 0 : index
    %c0_0 = arith.constant 0 : index
    %c0_1 = arith.constant 0 : index
    %0 = vector.load %arg1[%c0, %c0_0, %c0_1] : memref<1x64x32xf32, #tpu.memory_space<vmem>>, vector<1x64x32xf32>
    %1 = vector.shape_cast %0 : vector<1x64x32xf32> to vector<64x32xf32>
    %c0_2 = arith.constant 0 : index
    %c0_3 = arith.constant 0 : index
    %c0_4 = arith.constant 0 : index
    %2 = vector.load %arg2[%c0_2, %c0_3, %c0_4] : memref<1x64x32xf32, #tpu.memory_space<vmem>>, vector<1x64x32xf32>
    %3 = vector.shape_cast %2 : vector<1x64x32xf32> to vector<64x32xf32>
    %4 = arith.addf %1, %3 : vector<64x32xf32>
    %c0_5 = arith.constant 0 : index
    %c0_6 = arith.constant 0 : index
    %c0_7 = arith.constant 0 : index
    %5 = vector.load %arg3[%c0_5, %c0_6, %c0_7] : memref<1x64x1xf32, #tpu.memory_space<vmem>>, vector<1x64x1xf32>
    %6 = vector.shape_cast %5 : vector<1x64x1xf32> to vector<64x1xf32>
    %7 = vector.broadcast %6 : vector<64x1xf32> to vector<64x32xf32>
    %8 = arith.addf %4, %7 : vector<64x32xf32>
    %cst = arith.constant dense<0.000000e+00> : vector<64xf32>
    %9 = vector.multi_reduction <add>, %8, %cst [1] : vector<64x32xf32> to vector<64xf32>
    %10 = vector.shape_cast %9 : vector<64xf32> to vector<64x1xf32>
    %cst_8 = arith.constant 3.200000e+01 : f32
    %11 = vector.broadcast %cst_8 : f32 to vector<64x1xf32>
    %12 = arith.divf %10, %11 : vector<64x1xf32>
    %13 = vector.broadcast %12 : vector<64x1xf32> to vector<64x32xf32>
    %14 = arith.subf %8, %13 : vector<64x32xf32>
    %15 = arith.mulf %14, %14 : vector<64x32xf32>
    %cst_9 = arith.constant dense<0.000000e+00> : vector<64xf32>
    %16 = vector.multi_reduction <add>, %15, %cst_9 [1] : vector<64x32xf32> to vector<64xf32>
    %17 = vector.shape_cast %16 : vector<64xf32> to vector<64x1xf32>
    %cst_10 = arith.constant 3.200000e+01 : f32
    %18 = vector.broadcast %cst_10 : f32 to vector<64x1xf32>
    %19 = arith.divf %17, %18 : vector<64x1xf32>
    %20 = vector.broadcast %12 : vector<64x1xf32> to vector<64x32xf32>
    %21 = arith.subf %8, %20 : vector<64x32xf32>
    %cst_11 = arith.constant 9.99999974E-6 : f32
    %22 = vector.broadcast %cst_11 : f32 to vector<64x1xf32>
    %23 = arith.addf %19, %22 : vector<64x1xf32>
    %24 = math.rsqrt %23 : vector<64x1xf32>
    %25 = vector.broadcast %24 : vector<64x1xf32> to vector<64x32xf32>
    %26 = arith.mulf %21, %25 : vector<64x32xf32>
    %c0_12 = arith.constant 0 : index
    %c0_13 = arith.constant 0 : index
    %27 = vector.load %arg4[%c0_12, %c0_13] : memref<1x32xf32, #tpu.memory_space<vmem>>, vector<1x32xf32>
    %28 = vector.broadcast %27 : vector<1x32xf32> to vector<64x32xf32>
    %29 = arith.mulf %26, %28 : vector<64x32xf32>
    %c0_14 = arith.constant 0 : index
    %c0_15 = arith.constant 0 : index
    %30 = vector.load %arg5[%c0_14, %c0_15] : memref<1x32xf32, #tpu.memory_space<vmem>>, vector<1x32xf32>
    %31 = vector.broadcast %30 : vector<1x32xf32> to vector<64x32xf32>
    %32 = arith.addf %29, %31 : vector<64x32xf32>
    %c0_16 = arith.constant 0 : index
    %c0_17 = arith.constant 0 : index
    %33 = vector.load %arg6[%c0_16, %c0_17] : memref<32x128xf32, #tpu.memory_space<vmem>>, vector<32x128xf32>
    %cst_18 = arith.constant dense<0.000000e+00> : vector<64x128xf32>
    %34 = tpu.matmul %32, %33, %cst_18 {dimension_numbers = #tpu.dot_dimension_numbers<[1], [0], [0], [1], [0, 0, 1, 1], [], []>} : vector<64x32xf32>, vector<32x128xf32>, vector<64x128xf32> -> vector<64x128xf32>
    %c0_19 = arith.constant 0 : index
    %c0_20 = arith.constant 0 : index
    %35 = vector.load %arg7[%c0_19, %c0_20] : memref<1x128xf32, #tpu.memory_space<vmem>>, vector<1x128xf32>
    %36 = vector.broadcast %35 : vector<1x128xf32> to vector<64x128xf32>
    %37 = arith.addf %34, %36 : vector<64x128xf32>
    %cst_21 = arith.constant 5.000000e-01 : f32
    %38 = vector.broadcast %cst_21 : f32 to vector<64x128xf32>
    %39 = arith.mulf %38, %37 : vector<64x128xf32>
    %cst_22 = arith.constant 0.707106769 : f32
    %40 = vector.broadcast %cst_22 : f32 to vector<64x128xf32>
    %41 = arith.mulf %37, %40 : vector<64x128xf32>
    %42 = math.absf %41 : vector<64x128xf32>
    %cst_23 = arith.constant 0.327591091 : f32
    %43 = vector.broadcast %cst_23 : f32 to vector<64x128xf32>
    %44 = arith.mulf %43, %42 : vector<64x128xf32>
    %cst_24 = arith.constant 1.000000e+00 : f32
    %45 = vector.broadcast %cst_24 : f32 to vector<64x128xf32>
    %46 = arith.addf %45, %44 : vector<64x128xf32>
    %cst_25 = arith.constant 1.000000e+00 : f32
    %47 = vector.broadcast %cst_25 : f32 to vector<64x128xf32>
    %48 = arith.divf %47, %46 : vector<64x128xf32>
    %cst_26 = arith.constant 1.06140542 : f32
    %49 = vector.broadcast %cst_26 : f32 to vector<64x128xf32>
    %50 = arith.mulf %49, %48 : vector<64x128xf32>
    %cst_27 = arith.constant -1.45315206 : f32
    %51 = vector.broadcast %cst_27 : f32 to vector<64x128xf32>
    %52 = arith.addf %50, %51 : vector<64x128xf32>
    %53 = arith.mulf %52, %48 : vector<64x128xf32>
    %cst_28 = arith.constant 1.42141378 : f32
    %54 = vector.broadcast %cst_28 : f32 to vector<64x128xf32>
    %55 = arith.addf %53, %54 : vector<64x128xf32>
    %56 = arith.mulf %55, %48 : vector<64x128xf32>
    %cst_29 = arith.constant -0.284496725 : f32
    %57 = vector.broadcast %cst_29 : f32 to vector<64x128xf32>
    %58 = arith.addf %56, %57 : vector<64x128xf32>
    %59 = arith.mulf %58, %48 : vector<64x128xf32>
    %cst_30 = arith.constant 0.254829586 : f32
    %60 = vector.broadcast %cst_30 : f32 to vector<64x128xf32>
    %61 = arith.addf %59, %60 : vector<64x128xf32>
    %62 = arith.mulf %61, %48 : vector<64x128xf32>
    %cst_31 = arith.constant 0.000000e+00 : f32
    %63 = vector.broadcast %cst_31 : f32 to vector<64x128xf32>
    %64 = arith.subf %63, %42 : vector<64x128xf32>
    %65 = arith.mulf %64, %42 : vector<64x128xf32>
    %66 = math.exp %65 : vector<64x128xf32>
    %67 = arith.mulf %62, %66 : vector<64x128xf32>
    %cst_32 = arith.constant 1.000000e+00 : f32
    %68 = vector.broadcast %cst_32 : f32 to vector<64x128xf32>
    %69 = arith.subf %68, %67 : vector<64x128xf32>
    %cst_33 = arith.constant 0.000000e+00 : f32
    %70 = vector.broadcast %cst_33 : f32 to vector<64x128xf32>
    %71 = arith.cmpf oge, %41, %70 : vector<64x128xf32>
    %cst_34 = arith.constant 0.000000e+00 : f32
    %72 = vector.broadcast %cst_34 : f32 to vector<64x128xf32>
    %73 = arith.subf %72, %69 : vector<64x128xf32>
    %74 = arith.select %71, %69, %73 : vector<64x128xi1>, vector<64x128xf32>
    %cst_35 = arith.constant 1.000000e+00 : f32
    %75 = vector.broadcast %cst_35 : f32 to vector<64x128xf32>
    %76 = arith.addf %75, %74 : vector<64x128xf32>
    %77 = arith.mulf %39, %76 : vector<64x128xf32>
    %c0_36 = arith.constant 0 : index
    %c0_37 = arith.constant 0 : index
    %78 = vector.load %arg8[%c0_36, %c0_37] : memref<128x32xf32, #tpu.memory_space<vmem>>, vector<128x32xf32>
    %cst_38 = arith.constant dense<0.000000e+00> : vector<64x32xf32>
    %79 = tpu.matmul %77, %78, %cst_38 {dimension_numbers = #tpu.dot_dimension_numbers<[1], [0], [0], [1], [0, 0, 1, 1], [], []>} : vector<64x128xf32>, vector<128x32xf32>, vector<64x32xf32> -> vector<64x32xf32>
    %c0_39 = arith.constant 0 : index
    %c0_40 = arith.constant 0 : index
    %80 = vector.load %arg9[%c0_39, %c0_40] : memref<1x32xf32, #tpu.memory_space<vmem>>, vector<1x32xf32>
    %81 = vector.broadcast %80 : vector<1x32xf32> to vector<64x32xf32>
    %82 = arith.addf %79, %81 : vector<64x32xf32>
    %83 = arith.addf %8, %82 : vector<64x32xf32>
    %c0_41 = arith.constant 0 : index
    %c0_42 = arith.constant 0 : index
    %c0_43 = arith.constant 0 : index
    %84 = vector.load %arg10[%c0_41, %c0_42, %c0_43] : memref<1x64x32xf32, #tpu.memory_space<vmem>>, vector<1x64x32xf32>
    %85 = vector.shape_cast %84 : vector<1x64x32xf32> to vector<64x32xf32>
    %86 = vector.shape_cast %83 : vector<64x32xf32> to vector<1x64x32xf32>
    tpu.vector_store %arg10[%c0_41, %c0_42, %c0_43], %86 {strides = array<i32>} : memref<1x64x32xf32, #tpu.memory_space<vmem>>, vector<1x64x32xf32>,
    return
  }
  func.func @transform_0(%arg0: i32) -> (i32, i32, i32) {
    %c0_i32 = arith.constant 0 : i32
    %c0_i32_0 = arith.constant 0 : i32
    %c0_i32_1 = arith.constant 0 : i32
    return %arg0, %c0_i32, %c0_i32_0 : i32, i32, i32
  }
  func.func @transform_1(%arg0: i32) -> (i32, i32, i32) {
    %c0_i32 = arith.constant 0 : i32
    %c0_i32_0 = arith.constant 0 : i32
    %c0_i32_1 = arith.constant 0 : i32
    return %arg0, %c0_i32, %c0_i32_0 : i32, i32, i32
  }
  func.func @transform_2(%arg0: i32) -> (i32, i32, i32) {
    %c0_i32 = arith.constant 0 : i32
    %c0_i32_0 = arith.constant 0 : i32
    %c0_i32_1 = arith.constant 0 : i32
    return %arg0, %c0_i32, %c0_i32_0 : i32, i32, i32
  }
  func.func @transform_3(%arg0: i32) -> (i32, i32) {
    %c0_i32 = arith.constant 0 : i32
    %c0_i32_0 = arith.constant 0 : i32
    %c0_i32_1 = arith.constant 0 : i32
    return %c0_i32, %c0_i32_0 : i32, i32
  }
  func.func @transform_4(%arg0: i32) -> (i32, i32) {
    %c0_i32 = arith.constant 0 : i32
    %c0_i32_0 = arith.constant 0 : i32
    %c0_i32_1 = arith.constant 0 : i32
    return %c0_i32, %c0_i32_0 : i32, i32
  }
  func.func @transform_5(%arg0: i32) -> (i32, i32) {
    %c0_i32 = arith.constant 0 : i32
    %c0_i32_0 = arith.constant 0 : i32
    %c0_i32_1 = arith.constant 0 : i32
    return %c0_i32, %c0_i32_0 : i32, i32
  }
  func.func @transform_6(%arg0: i32) -> (i32, i32) {
    %c0_i32 = arith.constant 0 : i32
    %c0_i32_0 = arith.constant 0 : i32
    %c0_i32_1 = arith.constant 0 : i32
    return %c0_i32, %c0_i32_0 : i32, i32
  }
  func.func @transform_7(%arg0: i32) -> (i32, i32) {
    %c0_i32 = arith.constant 0 : i32
    %c0_i32_0 = arith.constant 0 : i32
    %c0_i32_1 = arith.constant 0 : i32
    return %c0_i32, %c0_i32_0 : i32, i32
  }
  func.func @transform_8(%arg0: i32) -> (i32, i32) {
    %c0_i32 = arith.constant 0 : i32
    %c0_i32_0 = arith.constant 0 : i32
    %c0_i32_1 = arith.constant 0 : i32
    return %c0_i32, %c0_i32_0 : i32, i32
  }
  func.func @transform_9(%arg0: i32) -> (i32, i32, i32) {
    %c0_i32 = arith.constant 0 : i32
    %c0_i32_0 = arith.constant 0 : i32
    %c0_i32_1 = arith.constant 0 : i32
    return %arg0, %c0_i32, %c0_i32_0 : i32, i32, i32
  }
}

</mosaic_0001>

<bundles_post_ra>
// kernel: _lambda_.3
= control target key start
LH: loop header
LB: loop body
LE: loop exit
PB: predicated region body
PF: predicated region fallthrough
CT: control target
= control target key end

     0   :  { %s1400_s30 = smov 0   ;;  %s2080_s0 = inlined_call_operand.vmem [shape: f32[2,64,32], index: 0, kind: input, shape index: {}]   ;;  %s2081_s1 = inlined_call_operand.vmem [shape: f32[2,64,32], index: 1, kind: input, shape index: {}]   ;;  %s2082_s2 = inlined_call_operand.vmem [shape: f32[2,64,1], index: 2, kind: input, shape index: {}]   ;;  %s2083_s3 = inlined_call_operand.vmem [shape: f32[1,32], index: 3, kind: input, shape index: {}]   ;;  %s2084_s4 = inlined_call_operand.vmem [shape: f32[1,32], index: 4, kind: input, shape index: {}]   ;;  %s2085_s5 = inlined_call_operand.vmem [shape: f32[32,128], index: 5, kind: input, shape index: {}]   ;;  %s2086_s6 = inlined_call_operand.vmem [shape: f32[1,128], index: 6, kind: input, shape index: {}]   ;;  %s2087_s7 = inlined_call_operand.vmem [shape: f32[128,32], index: 7, kind: input, shape index: {}]   ;;  %s2088_s8 = inlined_call_operand.vmem [shape: f32[1,32], index: 8, kind: input, shape index: {}]   ;;  %s2089_s9 = inlined_call_operand.vmem [shape: f32[2,64,32], index: 9, kind: output, shape index: {}]  }
   0x1 LB: > { %s1210_s10 = sadd.s32 4294967295, %s1346_s30   ;;  %p1214_p0 = scmp.ge.s32.totalorder %s1346_s30, 1  ;;  %s1346_s30 = sphi %s1400_s30, %s19_s30  }
   0x2   : > { %p307_p1 = scmp.lt.s32.totalorder %s1346_s30, 3 }
   0x4   : > { %p308_p2 = pnand %p1214_p0, %p307_p1 }
   0x5   : > { %p353_p3 = scmp.lt.s32.totalorder (!%p308_p2), %s1210_s10, 1 }
   0x6   : > { %311 = sbr.rel (%p308_p2) target bundleno = 772 (0x304), region = 56 }
   0xb   : > { %v1348_v0 = vmov 0   ;;  %s2109_s10 = smov (!%p353_p3, %s1210_s10), 1  ;;  %vm453_vm0 = vcmask 261120   ;;  %v1349_v57 = vmov 32.0  }
   0xc   : > { %1284 = vset.pattern.permute.xlu1 %v1348_v0  ;;  %1283 = vset.pattern.permute.xlu0 %v1348_v0  ;;  %s1408_s11 = sshll.u32 %s2109_s10, 6  ;;  %1290 = vrcp.f32 %v1349_v57 }
   0xd   : > { %1285 = vset.pattern.permute.xlu2 %v1348_v0  ;;  %s367_s14 = scalar_lea.vmem %s2082_s2, %s1408_s11  ;;  %s1418_s17 = scalar_lea.vmem %s2080_s0, %s1408_s11 }
   0xe   : > { %v399_v1 = vld [vmem:[%s367_s14 + $0x10] sm:$0xff]  ;;  %v397_v2 = vld [vmem:[%s367_s14] sm:$0xff]  ;;  %v400_v4 = vld [vmem:[%s367_s14 + $0x18] sm:$0xff]  ;;  %s1424_s20 = scalar_lea.vmem %s2081_s1, %s1408_s11 }
   0xf   : > { %417 = vperm.xlu1 %1284, %v399_v1   ;;  %407 = vperm.xlu0 %1283, %v397_v2   ;;  %v403_v3 = vld [vmem:[%s367_s14 + $0x30] sm:$0xff]  ;;  %v398_v5 = vld [vmem:[%s367_s14 + $0x8] sm:$0xff]  ;;  %v401_v6 = vld [vmem:[%s367_s14 + $0x20] sm:$0xff] }
  0x10   : > { %437 = vperm.xlu2 %1285, %v403_v3   ;;  %v402_v7 = vld [vmem:[%s367_s14 + $0x28] sm:$0xff]  ;;  %v404_v8 = vld [vmem:[%s367_s14 + $0x38] sm:$0xff]  ;;  %v375_v9 = vld [vmem:[%s1418_s17 + $0x10] sm:$0xff]  ;;  %s372_s14 = scalar_lea.vmem %s2089_s9, %s1408_s11 }
  0x11   : > { %v383_v10 = vld [vmem:[%s1424_s20 + $0x10] sm:$0xff]  ;;  %v373_v11 = vld [vmem:[%s1418_s17] sm:$0xff]  ;;  %v376_v20 = vld [vmem:[%s1418_s17 + $0x18] sm:$0xff] }
  0x12   : > { %v381_v12 = vld [vmem:[%s1424_s20] sm:$0xff]  ;;  %v391_v13 = vadd.f32 %v383_v10, %v375_v9  ;;  %v384_v21 = vld [vmem:[%s1424_s20 + $0x18] sm:$0xff]  ;;  %v374_v22 = vld [vmem:[%s1418_s17 + $0x8] sm:$0xff]  ;;  %v1291_v58 = vpop.eup %1290 }
  0x13   : > { %v389_v14 = vadd.f32 %v381_v12, %v373_v11  ;;  %v382_v23 = vld [vmem:[%s1424_s20 + $0x8] sm:$0xff]  ;;  %v392_v26 = vadd.f32 %v384_v21, %v376_v20  ;;  %v377_v28 = vld [vmem:[%s1418_s17 + $0x20] sm:$0xff]  ;;  %v379_v30 = vld [vmem:[%s1418_s17 + $0x30] sm:$0xff]  ;;  %v479_v59 = vmul.f32 32.0, %v1291_v58  ;;  %vm483_vm1 = vweird.f32 %v1291_v58 }
  0x14   : > { %v390_v27 = vadd.f32 %v382_v23, %v374_v22  ;;  %v385_v29 = vld [vmem:[%s1424_s20 + $0x20] sm:$0xff]  ;;  %v387_v31 = vld [vmem:[%s1424_s20 + $0x30] sm:$0xff]  ;;  %v380_v39 = vld [vmem:[%s1418_s17 + $0x38] sm:$0xff] }
  0x15   : > { %v393_v36 = vadd.f32 %v385_v29, %v377_v28  ;;  %v395_v37 = vadd.f32 %v387_v31, %v379_v30  ;;  %v388_v40 = vld [vmem:[%s1424_s20 + $0x38] sm:$0xff]  ;;  %v378_v47 = vld [vmem:[%s1418_s17 + $0x28] sm:$0xff]  ;;  %v480_v60 = vsub.f32 1.0, %v479_v59 }
  0x16   : > { %v396_v44 = vadd.f32 %v388_v40, %v380_v39  ;;  %v386_v48 = vld [vmem:[%s1424_s20 + $0x28] sm:$0xff] }
  0x17   : > { %422 = vperm.xlu1 %1284, %v400_v4   ;;  %412 = vperm.xlu0 %1283, %v398_v5   ;;  %v394_v53 = vadd.f32 %v386_v48, %v378_v47  ;;  %v481_v61 = vmul.f32 %v1291_v58, %v480_v60  ;;  %v663_v47 = vld [vmem:[%s2085_s5 + $0x10] sm:$0xff]  ;;  %v662_v48 = vld [vmem:[%s2085_s5 + $0x8] sm:$0xff] }
  0x18   : > { %427 = vperm.xlu2 %1285, %v401_v6  }
  0x19   : > { %v482_v62 = vadd.f32 %v1291_v58, %v481_v61 }
  0x1b   : > { %v1474_v63 = vsel %vm483_vm1, %v1291_v58, %v482_v62 }
  0x1f   : > { %432 = vperm.xlu1 %1284, %v402_v7   ;;  %442 = vperm.xlu0 %1283, %v404_v8  }
  0x6a   : > { %v438_v15 = vpop.permute.xlu2 %437 }
  0x6b   : > { %v1458_v45 = vadd.f32 %v438_v15, %v395_v37 }
  0x6d   : > { %v472_v51 = vsel %vm453_vm0, %v1458_v45, 0.0 }
  0x72   : > { %v428_v38 = vpop.permute.xlu2 %427 }
  0x73   : > { %v1456_v43 = vadd.f32 %v428_v38, %v393_v36 }
  0x75   : > { %v466_v50 = vsel %vm453_vm0, %v1456_v43, 0.0 }
  0x81   : > { %v418_v16 = vpop.permute.xlu1 %417  ;;  %v408_v17 = vpop.permute.xlu0 %407 }
  0x82   : > { %v1430_v18 = vadd.f32 %v418_v16, %v391_v13  ;;  %v1432_v19 = vadd.f32 %v408_v17, %v389_v14 }
  0x84   : > { %v460_v24 = vsel %vm453_vm0, %v1430_v18, 0.0  ;;  %v454_v25 = vsel %vm453_vm0, %v1432_v19, 0.0 }
  0x85   : > { %461 = vadd.xlane.f32.xlu1 %v460_v24  ;;  %455 = vadd.xlane.f32.xlu2 %v454_v25 }
  0x89   : > { %v423_v32 = vpop.permute.xlu1 %422  ;;  %v413_v33 = vpop.permute.xlu0 %412 }
  0x8a   : > { %v1446_v34 = vadd.f32 %v423_v32, %v392_v26  ;;  %v1448_v35 = vadd.f32 %v413_v33, %v390_v27 }
  0x8c   : > { %v457_v41 = vsel %vm453_vm0, %v1448_v35, 0.0  ;;  %v463_v42 = vsel %vm453_vm0, %v1446_v34, 0.0 }
  0x8d   : > { %458 = vadd.xlane.f32.xlu0 %v457_v41  ;;  %464 = vadd.xlane.f32.xlu2 %v463_v42 }
  0x91   : > { %v443_v46 = vpop.permute.xlu0 %442  ;;  %v433_v54 = vpop.permute.xlu1 %432 }
  0x92   : > { %v1462_v49 = vadd.f32 %v443_v46, %v396_v44  ;;  %v1470_v55 = vadd.f32 %v433_v54, %v394_v53  ;;  %v664_v46 = vld [vmem:[%s2085_s5 + $0x18] sm:$0xff] }
  0x93   : > { %705 = vmatpush.msra.mxu0 %v664_v46  ;;  %1237 = vmatpush.msra.mxu3 %v664_v46 }
  0x94   : > { %v475_v52 = vsel %vm453_vm0, %v1462_v49, 0.0  ;;  %v469_v56 = vsel %vm453_vm0, %v1470_v55, 0.0 }
  0x95   : > { %476 = vadd.xlane.f32.xlu1 %v475_v52  ;;  %467 = vadd.xlane.f32.xlu0 %v466_v50  ;;  %v661_v50 = vld [vmem:[%s2085_s5] sm:$0xff] }
  0x96   : > { %473 = vadd.xlane.f32.xlu2 %v472_v51  ;;  %706 = vmatpush.msra.mxu0 %v663_v47 }
  0x97   : > { %1238 = vmatpush.msra.mxu3 %v663_v47 }
  0x98   : > { %707 = vmatpush.msra.mxu0 %v662_v48 }
  0x99   : > { %1239 = vmatpush.msra.mxu3 %v662_v48 }
  0x9a   : > { %708 = vmatpush.msra.mxu0 %v661_v50 }
  0x9b   : > { %1240 = vmatpush.msra.mxu3 %v661_v50 }
  0x9e   : > { %470 = vadd.xlane.f32.xlu2 %v469_v56 }
  0xf8   : > { %v462_v0 = vpop.xlane.xlu1 %461  ;;  %v456_v1 = vpop.xlane.xlu2 %455 }
  0xf9   : > { %v487_v2 = vmul.f32 %v1474_v63, %v462_v0  ;;  %v485_v3 = vmul.f32 %v1474_v63, %v456_v1 }
  0xfb   : > { %v1479_v4 = vsub.f32 %v1430_v18, %v487_v2  ;;  %v1482_v5 = vsub.f32 %v1432_v19, %v485_v3 }
  0xfd   : > { %v503_v6 = vmul.f32 %v1479_v4, %v1479_v4  ;;  %v501_v7 = vmul.f32 %v1482_v5, %v1482_v5 }
  0xff   : > { %v515_v8 = vsel %vm453_vm0, %v503_v6, 0.0  ;;  %v509_v9 = vsel %vm453_vm0, %v501_v7, 0.0 }
 0x100   : > { %v459_v10 = vpop.xlane.xlu0 %458  ;;  %516 = vadd.xlane.f32.xlu2 %v515_v8  ;;  %510 = vadd.xlane.f32.xlu0 %v509_v9  ;;  %v465_v11 = vpop.xlane.xlu2 %464 }
 0x101   : > { %v486_v12 = vmul.f32 %v1474_v63, %v459_v10  ;;  %v488_v13 = vmul.f32 %v1474_v63, %v465_v11 }
 0x103   : > { %v1493_v14 = vsub.f32 %v1448_v35, %v486_v12  ;;  %v1496_v15 = vsub.f32 %v1446_v34, %v488_v13 }
 0x105   : > { %v502_v16 = vmul.f32 %v1493_v14, %v1493_v14  ;;  %v504_v17 = vmul.f32 %v1496_v15, %v1496_v15 }
 0x107   : > { %v512_v20 = vsel %vm453_vm0, %v502_v16, 0.0  ;;  %v518_v21 = vsel %vm453_vm0, %v504_v17, 0.0 }
 0x108   : > { %v477_v22 = vpop.xlane.xlu1 %476  ;;  %513 = vadd.xlane.f32.xlu1 %v512_v20  ;;  %v468_v23 = vpop.xlane.xlu0 %467  ;;  %519 = vadd.xlane.f32.xlu0 %v518_v21 }
 0x109   : > { %v492_v24 = vmul.f32 %v1474_v63, %v477_v22  ;;  %v489_v25 = vmul.f32 %v1474_v63, %v468_v23  ;;  %v474_v26 = vpop.xlane.xlu2 %473 }
 0x10a   : > { %v491_v27 = vmul.f32 %v1474_v63, %v474_v26 }
 0x10b   : > { %v1508_v28 = vsub.f32 %v1462_v49, %v492_v24  ;;  %v1511_v29 = vsub.f32 %v1456_v43, %v489_v25 }
 0x10c   : > { %v1514_v30 = vsub.f32 %v1458_v45, %v491_v27 }
 0x10d   : > { %v505_v31 = vmul.f32 %v1511_v29, %v1511_v29  ;;  %v508_v32 = vmul.f32 %v1508_v28, %v1508_v28 }
 0x10e   : > { %v507_v33 = vmul.f32 %v1514_v30, %v1514_v30 }
 0x10f   : > { %v521_v36 = vsel %vm453_vm0, %v505_v31, 0.0  ;;  %v530_v37 = vsel %vm453_vm0, %v508_v32, 0.0 }
 0x110   : > { %522 = vadd.xlane.f32.xlu2 %v521_v36  ;;  %531 = vadd.xlane.f32.xlu0 %v530_v37  ;;  %v527_v38 = vsel %vm453_vm0, %v507_v33, 0.0  ;;  %v1574_v37 = vld [vmem:[%s2083_s3] ss:$0 sm:$0xff] }
 0x111   : > { %528 = vadd.xlane.f32.xlu1 %v527_v38  ;;  %v471_v39 = vpop.xlane.xlu2 %470 }
 0x112   : > { %v490_v40 = vmul.f32 %v1474_v63, %v471_v39 }
 0x114   : > { %v1527_v41 = vsub.f32 %v1470_v55, %v490_v40 }
 0x116   : > { %v506_v42 = vmul.f32 %v1527_v41, %v1527_v41 }
 0x118   : > { %v524_v44 = vsel %vm453_vm0, %v506_v42, 0.0 }
 0x119   : > { %525 = vadd.xlane.f32.xlu1 %v524_v44  ;;  %v1581_v44 = vld [vmem:[%s2084_s4] ss:$0 sm:$0xff] }
 0x173   : > { %v511_v51 = vpop.xlane.xlu0 %510  ;;  %v517_v52 = vpop.xlane.xlu2 %516 }
 0x174   : > { %v533_v53 = vmul.f32 %v511_v51, %v1474_v63  ;;  %v535_v54 = vmul.f32 %v517_v52, %v1474_v63 }
 0x176   : > { %v541_v56 = vadd.f32 1e-05, %v533_v53  ;;  %v1546_v57 = vadd.f32 1e-05, %v535_v54 }
 0x178   : > { %1292 = vrsqrt.f32 %v541_v56  ;;  %vm555_vm3 = vweird.f32 %v541_v56  ;;  %vm575_vm9 = vweird.f32 %v1546_v57 }
 0x179   : > { %1294 = vrsqrt.f32 %v1546_v57 }
 0x17b   : > { %v514_v58 = vpop.xlane.xlu1 %513  ;;  %v520_v59 = vpop.xlane.xlu0 %519 }
 0x17c   : > { %v534_v60 = vmul.f32 %v514_v58, %v1474_v63  ;;  %v536_v61 = vmul.f32 %v520_v59, %v1474_v63 }
 0x17e   : > { %v1293_v62 = vpop.eup %1292  ;;  %v542_v0 = vadd.f32 1e-05, %v534_v60  ;;  %v1551_v1 = vadd.f32 1e-05, %v536_v61 }
 0x17f   : > { %v1553_v2 = vpop.eup %1294  ;;  %v550_v3 = vmul.f32 %v1293_v62, %v541_v56  ;;  %vm556_vm2 = vweird.f32 %v1293_v62 }
 0x180   : > { %v570_v6 = vmul.f32 %v1553_v2, %v1546_v57  ;;  %1296 = vrsqrt.f32 %v542_v0  ;;  %vm557_vm4 = vmor %vm555_vm3, %vm556_vm2  ;;  %vm565_vm6 = vweird.f32 %v542_v0  ;;  %vm576_vm7 = vweird.f32 %v1553_v2 }
 0x181   : > { %v551_v7 = vmul.f32 %v1293_v62, %v550_v3  ;;  %1298 = vrsqrt.f32 %v1551_v1  ;;  %vm1600_vm10 = vmor %vm575_vm9, %vm576_vm7  ;;  %vm585_vm2 = vweird.f32 %v1551_v1 }
 0x182   : > { %v571_v11 = vmul.f32 %v1553_v2, %v570_v6  ;;  %v1064_v6 = vld [vmem:[%s2087_s7 + $0x50] sm:$0xff] }
 0x183   : > { %v552_v8 = vmul.f32 0.5, %v551_v7  ;;  %v532_v9 = vpop.xlane.xlu0 %531  ;;  %v523_v10 = vpop.xlane.xlu2 %522 }
 0x184   : > { %v540_v12 = vmul.f32 %v532_v9, %v1474_v63  ;;  %v529_v13 = vpop.xlane.xlu1 %528  ;;  %v537_v16 = vmul.f32 %v523_v10, %v1474_v63  ;;  %v572_v31 = vmul.f32 0.5, %v571_v11 }
 0x185   : > { %v553_v17 = vsub.f32 1.5, %v552_v8  ;;  %v539_v20 = vmul.f32 %v529_v13, %v1474_v63 }
 0x186   : > { %v1297_v21 = vpop.eup %1296  ;;  %v1562_v22 = vadd.f32 1e-05, %v540_v12  ;;  %v1564_v23 = vadd.f32 1e-05, %v537_v16  ;;  %v573_v40 = vsub.f32 1.5, %v572_v31 }
 0x187   : > { %v1566_v24 = vpop.eup %1298  ;;  %v554_v25 = vmul.f32 %v1293_v62, %v553_v17  ;;  %v560_v26 = vmul.f32 %v1297_v21, %v542_v0  ;;  %v547_v27 = vadd.f32 1e-05, %v539_v20  ;;  %vm566_vm5 = vweird.f32 %v1297_v21 }
 0x188   : > { %1300 = vrsqrt.f32 %v1562_v22  ;;  %v580_v36 = vmul.f32 %v1566_v24, %v1551_v1  ;;  %v574_v58 = vmul.f32 %v1553_v2, %v573_v40  ;;  %vm567_vm8 = vmor %vm565_vm6, %vm566_vm5  ;;  %vm586_vm14 = vweird.f32 %v1566_v24 }
 0x189   : > { %v558_v32 = vsel %vm557_vm4, %v1293_v62, %v554_v25  ;;  %v561_v33 = vmul.f32 %v1297_v21, %v560_v26  ;;  %1302 = vrsqrt.f32 %v547_v27  ;;  %vm615_vm12 = vweird.f32 %v547_v27  ;;  %vm587_vm4 = vmor %vm585_vm2, %vm586_vm14 }
 0x18a   : > { %1304 = vrsqrt.f32 %v1564_v23  ;;  %v629_v39 = vmul.f32 %v558_v32, %v1482_v5  ;;  %v581_v47 = vmul.f32 %v1566_v24, %v580_v36  ;;  %v578_v9 = vsel %vm1600_vm10, %v1553_v2, %v574_v58 }
 0x18b   : > { %v562_v38 = vmul.f32 0.5, %v561_v33  ;;  %v631_v25 = vmul.f32 %v578_v9, %v1479_v4  ;;  %vm625_vm1 = vweird.f32 %v1562_v22  ;;  %vm595_vm6 = vweird.f32 %v1564_v23  ;;  %v1063_v9 = vld [vmem:[%s2087_s7 + $0x48] sm:$0xff] }
 0x18c   : > { %v526_v42 = vpop.xlane.xlu1 %525  ;;  %v641_v50 = vmul.f32 %v1574_v37, %v629_v39  ;;  %v582_v61 = vmul.f32 0.5, %v581_v47 }
 0x18d   : > { %v563_v46 = vsub.f32 1.5, %v562_v38  ;;  %v538_v48 = vmul.f32 %v526_v42, %v1474_v63  ;;  %v643_v33 = vmul.f32 %v1574_v37, %v631_v25 }
 0x18e   : > { %v1301_v51 = vpop.eup %1300  ;;  %v653_v63 = vadd.f32 %v1581_v44, %v641_v50  ;;  %v583_v11 = vsub.f32 1.5, %v582_v61  ;;  %v1066_v61 = vld [vmem:[%s2087_s7 + $0x60] sm:$0xff] }
 0x18f   : > { %v1303_v52 = vpop.eup %1302  ;;  %v564_v53 = vmul.f32 %v1297_v21, %v563_v46  ;;  %v620_v5 = vmul.f32 %v1301_v51, %v1562_v22  ;;  %v1587_v54 = vadd.f32 1e-05, %v538_v48  ;;  %vm626_vm13 = vweird.f32 %v1301_v51 }
 0x190   : > { %v1589_v56 = vpop.eup %1304  ;;  %v610_v59 = vmul.f32 %v1303_v52, %v547_v27  ;;  %1223 = vmatmul.msk.f32.vlgmr.msra.gmra.mxu0 %vm453_vm0, %v653_v63  ;;  %vm616_vm11 = vweird.f32 %v1303_v52  ;;  %v584_v2 = vmul.f32 %v1566_v24, %v583_v11  ;;  %vm627_vm3 = vmor %vm625_vm1, %vm626_vm13  ;;  %v655_v46 = vadd.f32 %v1581_v44, %v643_v33  ;;  %v1653_v63 = vld [vmem:[%s2086_s6] ss:$0 sm:$0xff]  ;;  %v1057_v33 = vld [vmem:[%s2087_s7 + $0x18] sm:$0xff] }
 0x191   : > { %v568_v60 = vsel %vm567_vm8, %v1297_v21, %v564_v53  ;;  %v621_v62 = vmul.f32 %v1301_v51, %v620_v5  ;;  %v590_v0 = vmul.f32 %v1589_v56, %v1564_v23  ;;  %1306 = vrsqrt.f32 %v1587_v54  ;;  %vm617_vm15 = vmor %vm615_vm12, %vm616_vm11 }
 0x192   : > { %v611_v3 = vmul.f32 %v1303_v52, %v610_v59  ;;  %v630_v8 = vmul.f32 %v568_v60, %v1493_v14  ;;  %v588_v36 = vsel %vm587_vm4, %v1566_v24, %v584_v2  ;;  %vm596_vm5 = vweird.f32 %v1589_v56 }
 0x193   : > { %v622_v7 = vmul.f32 0.5, %v621_v62  ;;  %v591_v57 = vmul.f32 %v1589_v56, %v590_v0  ;;  %v632_v1 = vmul.f32 %v588_v36, %v1496_v15  ;;  %vm597_vm7 = vmor %vm595_vm6, %vm596_vm5  ;;  %vm605_vm9 = vweird.f32 %v1587_v54  ;;  %v1065_v0 = vld [vmem:[%s2087_s7 + $0x58] sm:$0xff] }
 0x194   : > { %v612_v10 = vmul.f32 0.5, %v611_v3  ;;  %v642_v13 = vmul.f32 %v1574_v37, %v630_v8 }
 0x195   : > { %v623_v12 = vsub.f32 1.5, %v622_v7  ;;  %v592_v26 = vmul.f32 0.5, %v591_v57 }
 0x196   : > { %v613_v16 = vsub.f32 1.5, %v612_v10  ;;  %v654_v17 = vadd.f32 %v1581_v44, %v642_v13  ;;  %v1061_v13 = vld [vmem:[%s2087_s7 + $0x38] sm:$0xff] }
 0x197   : > { %v1307_v20 = vpop.eup %1306  ;;  %v624_v21 = vmul.f32 %v1301_v51, %v623_v12  ;;  %v593_v38 = vsub.f32 1.5, %v592_v26  ;;  %v1062_v12 = vld [vmem:[%s2087_s7 + $0x40] sm:$0xff] }
 0x198   : > { %v614_v14 = vmul.f32 %v1303_v52, %v613_v16  ;;  %v600_v31 = vmul.f32 %v1307_v20, %v1587_v54  ;;  %1224 = vmatmul.msk.f32.gmra.mxu0 %vm453_vm0, %v654_v17  ;;  %vm606_vm8 = vweird.f32 %v1307_v20  ;;  %v1069_v54 = vld [vmem:[%s2087_s7 + $0x78] sm:$0xff]  ;;  %v1060_v17 = vld [vmem:[%s2087_s7 + $0x30] sm:$0xff] }
 0x199   : > { %v628_v4 = vsel %vm627_vm3, %v1301_v51, %v624_v21  ;;  %vm607_vm10 = vmor %vm605_vm9, %vm606_vm8  ;;  %1074 = vmatpush.msra.mxu1 %v1069_v54  ;;  %1242 = vmatpush.msrb.mxu3 %v1069_v54 }
 0x19a   : > { %v618_v32 = vsel %vm617_vm15, %v1303_v52, %v614_v14  ;;  %v601_v39 = vmul.f32 %v1307_v20, %v600_v31  ;;  %v636_v42 = vmul.f32 %v628_v4, %v1508_v28  ;;  %v644_v28 = vmul.f32 %v1574_v37, %v632_v1  ;;  %1241 = vmatpush.msra.mxu2 %v1069_v54  ;;  %v1059_v14 = vld [vmem:[%s2087_s7 + $0x28] sm:$0xff]  ;;  %v1058_v31 = vld [vmem:[%s2087_s7 + $0x20] sm:$0xff] }
 0x19b   : > { %v635_v27 = vmul.f32 %v618_v32, %v1514_v30  ;;  %v594_v30 = vmul.f32 %v1589_v56, %v593_v38 }
 0x19c   : > { %v602_v47 = vmul.f32 0.5, %v601_v39  ;;  %v648_v24 = vmul.f32 %v1574_v37, %v636_v42  ;;  %v656_v51 = vadd.f32 %v1581_v44, %v644_v28  ;;  %v1056_v42 = vld [vmem:[%s2087_s7 + $0x10] sm:$0xff] }
 0x19d   : > { %v647_v40 = vmul.f32 %v1574_v37, %v635_v27  ;;  %v598_v48 = vsel %vm597_vm7, %v1589_v56, %v594_v30 }
 0x19e   : > { %v603_v50 = vsub.f32 1.5, %v602_v47  ;;  %v660_v15 = vadd.f32 %v1581_v44, %v648_v24  ;;  %v633_v52 = vmul.f32 %v598_v48, %v1511_v29  ;;  %v1055_v48 = vld [vmem:[%s2087_s7 + $0x8] sm:$0xff] }
 0x19f   : > { %v659_v22 = vadd.f32 %v1581_v44, %v647_v40 }
 0x1a0   : > { %1225 = vmatmul.msk.f32.gmra.mxu0 %vm453_vm0, %v655_v46  ;;  %v604_v53 = vmul.f32 %v1307_v20, %v603_v50  ;;  %v645_v23 = vmul.f32 %v1574_v37, %v633_v52 }
 0x1a1   : > { %1229 = vmatmul.msk.f32.vlgmr.msra.gmra.mxu3 %vm453_vm0, %v659_v22 }
 0x1a2   : > { %v608_v5 = vsel %vm607_vm10, %v1307_v20, %v604_v53  ;;  %v657_v56 = vadd.f32 %v1581_v44, %v645_v23 }
 0x1a3   : > { %v634_v58 = vmul.f32 %v608_v5, %v1527_v41  ;;  %v1068_v41 = vld [vmem:[%s2087_s7 + $0x70] sm:$0xff] }
 0x1a4   : > { %1075 = vmatpush.msra.mxu1 %v1068_v41  ;;  %1244 = vmatpush.msrb.mxu3 %v1068_v41 }
 0x1a5   : > { %v646_v29 = vmul.f32 %v1574_v37, %v634_v58  ;;  %1243 = vmatpush.msra.mxu2 %v1068_v41 }
 0x1a7   : > { %v658_v59 = vadd.f32 %v1581_v44, %v646_v29  ;;  %v1067_v44 = vld [vmem:[%s2087_s7 + $0x68] sm:$0xff] }
 0x1a8   : > { %1226 = vmatmul.msk.f32.gmra.mxu0 %vm453_vm0, %v656_v51  ;;  %1076 = vmatpush.msra.mxu1 %v1067_v44 }
 0x1a9   : > { %1230 = vmatmul.msk.f32.gmra.mxu3 %vm453_vm0, %v660_v15  ;;  %1245 = vmatpush.msra.mxu2 %v1067_v44 }
 0x1aa   : > { %1246 = vmatpush.msrb.mxu3 %v1067_v44  ;;  %1077 = vmatpush.msra.mxu1 %v1066_v61 }
 0x1ab   : > { %1247 = vmatpush.msra.mxu2 %v1066_v61 }
 0x1ac   : > { %1248 = vmatpush.msrb.mxu3 %v1066_v61  ;;  %1078 = vmatpush.msra.mxu1 %v1065_v0 }
 0x1ad   : > { %1249 = vmatpush.msra.mxu2 %v1065_v0 }
 0x1ae   : > { %1250 = vmatpush.msrb.mxu3 %v1065_v0  ;;  %1079 = vmatpush.msra.mxu1 %v1064_v6 }
 0x1af   : > { %1251 = vmatpush.msra.mxu2 %v1064_v6 }
 0x1b0   : > { %1227 = vmatmul.msk.f32.gmra.mxu0 %vm453_vm0, %v657_v56  ;;  %1252 = vmatpush.msrb.mxu3 %v1064_v6  ;;  %v1054_v56 = vld [vmem:[%s2087_s7] sm:$0xff] }
 0x1b1   : > { %1080 = vmatpush.msra.mxu1 %v1063_v9  ;;  %1253 = vmatpush.msra.mxu2 %v1063_v9 }
 0x1b2   : > { %1254 = vmatpush.msrb.mxu3 %v1063_v9 }
 0x1b3   : > { %1081 = vmatpush.msra.mxu1 %v1062_v12  ;;  %1255 = vmatpush.msra.mxu2 %v1062_v12 }
 0x1b4   : > { %1256 = vmatpush.msrb.mxu3 %v1062_v12 }
 0x1b5   : > { %1082 = vmatpush.msra.mxu1 %v1061_v13  ;;  %1257 = vmatpush.msra.mxu2 %v1061_v13 }
 0x1b6   : > { %1258 = vmatpush.msrb.mxu3 %v1061_v13 }
 0x1b7   : > { %1083 = vmatpush.msra.mxu1 %v1060_v17  ;;  %1259 = vmatpush.msra.mxu2 %v1060_v17 }
 0x1b8   : > { %1228 = vmatmul.msk.f32.gmra.mxu0 %vm453_vm0, %v658_v59  ;;  %1260 = vmatpush.msrb.mxu3 %v1060_v17 }
 0x1b9   : > { %1084 = vmatpush.msra.mxu1 %v1059_v14  ;;  %1261 = vmatpush.msra.mxu2 %v1059_v14 }
 0x1ba   : > { %1262 = vmatpush.msrb.mxu3 %v1059_v14 }
 0x1bb   : > { %1085 = vmatpush.msra.mxu1 %v1058_v31  ;;  %1263 = vmatpush.msra.mxu2 %v1058_v31 }
 0x1bc   : > { %1264 = vmatpush.msrb.mxu3 %v1058_v31 }
 0x1bd   : > { %1086 = vmatpush.msra.mxu1 %v1057_v33  ;;  %1265 = vmatpush.msra.mxu2 %v1057_v33 }
 0x1be   : > { %1266 = vmatpush.msrb.mxu3 %v1057_v33 }
 0x1bf   : > { %1087 = vmatpush.msra.mxu1 %v1056_v42  ;;  %1267 = vmatpush.msra.mxu2 %v1056_v42 }
 0x1c0   : > { %1268 = vmatpush.msrb.mxu3 %v1056_v42 }
 0x1c1   : > { %1088 = vmatpush.msra.mxu1 %v1055_v48  ;;  %1269 = vmatpush.msra.mxu2 %v1055_v48 }
 0x1c2   : > { %1270 = vmatpush.msrb.mxu3 %v1055_v48 }
 0x1c3   : > { %1089 = vmatpush.msra.mxu1 %v1054_v56  ;;  %1271 = vmatpush.msra.mxu2 %v1054_v56 }
 0x1c4   : > { %1272 = vmatpush.msrb.mxu3 %v1054_v56 }
 0x20d   : > { %v710_v37 = vpop.f32.mrf.mxu0 }
 0x20e   : > { %v1662_v60 = vadd.f32 %v1653_v63, %v710_v37 }
 0x210   : > { %v1668_v62 = vmul.f32 0.70710677, %v1662_v60 }
 0x212   : > { %v1674_v3 = vand.u32 2147483647, %v1668_v62  ;;  %vm1014_vm9 = vcmp.ge.f32.partialorder %v1668_v62, 0.0 }
 0x214   : > { %v758_v7 = vmul.f32 0.3275911, %v1674_v3  ;;  %v966_v36 = vsub.f32 0.0, %v1674_v3 }
 0x215   : > { %v713_v8 = vpop.f32.mrf.mxu0 }
 0x216   : > { %v1683_v10 = vadd.f32 1.0, %v758_v7  ;;  %v1686_v11 = vadd.f32 %v1653_v63, %v713_v8  ;;  %v974_v51 = vmul.f32 %v966_v36, %v1674_v3 }
 0x218   : > { %1308 = vrcp.f32 %v1683_v10  ;;  %v1693_v57 = vmul.f32 0.70710677, %v1686_v11  ;;  %vm779_vm11 = vweird.f32 %v1683_v10  ;;  %v785_v30 = vand.u32 2147483648, %v1683_v10 }
 0x219   : > { %v783_v15 = vand.u32 2147483647, %v1683_v10  ;;  %v982_v61 = vmul.f32 1.442695, %v974_v51  ;;  %v1790_v14 = vmul.f32 0.5, %v1686_v11 }
 0x21a   : > { %v751_v16 = vand.u32 2147483647, %v1693_v57  ;;  %v786_v59 = vor.u32 1.1754944e-38, %v785_v30 }
 0x21b   : > { %vm784_vm14 = vcmp.eq.f32.partialorder %v783_v15, 8.507059e+37 }
 0x21c   : > { %v759_v20 = vmul.f32 0.3275911, %v751_v16  ;;  %v967_v46 = vsub.f32 0.0, %v751_v16 }
 0x21d   : > { %v716_v21 = vpop.f32.mrf.mxu0 }
 0x21e   : > { %v1705_v25 = vpop.eup %1308  ;;  %v1708_v2 = vadd.f32 %v1653_v63, %v716_v21  ;;  %v1715_v32 = vadd.f32 1.0, %v759_v20  ;;  %v975_v29 = vmul.f32 %v967_v46, %v751_v16  ;;  %v1787_v21 = vmul.f32 0.5, %v1662_v60 }
 0x21f   : > { %v775_v26 = vmul.f32 %v1705_v25, %v1683_v10  ;;  %vm780_vm12 = vweird.f32 %v1705_v25 }
 0x220   : > { %v1718_v27 = vmul.f32 0.70710677, %v1708_v2  ;;  %1310 = vrcp.f32 %v1715_v32  ;;  %vm1754_vm13 = vmor %vm779_vm11, %vm780_vm12  ;;  %v984_v8 = vmul.f32 1.442695, %v975_v29  ;;  %v800_v12 = vand.u32 2147483648, %v1715_v32 }
 0x221   : > { %v776_v4 = vsub.f32 1.0, %v775_v26  ;;  %v798_v33 = vand.u32 2147483647, %v1715_v32  ;;  %vm794_vm15 = vweird.f32 %v1715_v32 }
 0x222   : > { %v752_v38 = vand.u32 2147483647, %v1718_v27  ;;  %v1801_v60 = vor.u32 1.1754944e-38, %v800_v12 }
 0x223   : > { %v777_v40 = vmul.f32 %v1705_v25, %v776_v4  ;;  %vm1827_vm2 = vcmp.eq.f32.partialorder %v798_v33, 8.507059e+37 }
 0x224   : > { %v728_v39 = vpop.f32.mrf.mxu3  ;;  %v760_v1 = vmul.f32 0.3275911, %v752_v38  ;;  %v968_v47 = vsub.f32 0.0, %v752_v38 }
 0x225   : > { %v1728_v22 = vadd.f32 %v1653_v63, %v728_v39  ;;  %v719_v28 = vpop.f32.mrf.mxu0  ;;  %v778_v50 = vadd.f32 %v1705_v25, %v777_v40 }
 0x226   : > { %v1745_v52 = vadd.f32 1.0, %v760_v1  ;;  %v1748_v53 = vadd.f32 %v1653_v63, %v719_v28  ;;  %v976_v54 = vmul.f32 %v968_v47, %v752_v38  ;;  %v1769_v44 = vpop.eup %1310 }
 0x227   : > { %v1737_v24 = vmul.f32 0.70710677, %v1728_v22  ;;  %v782_v58 = vsel %vm1754_vm13, %v1705_v25, %v778_v50  ;;  %v790_v13 = vmul.f32 %v1769_v44, %v1715_v32  ;;  %v1808_v42 = vmul.f32 0.5, %v1728_v22 }
 0x228   : > { %1312 = vrcp.f32 %v1745_v52  ;;  %v1767_v37 = vmul.f32 0.70710677, %v1748_v53  ;;  %v1771_v3 = vsel %vm784_vm14, %v786_v59, %v782_v58  ;;  %v986_v16 = vmul.f32 1.442695, %v976_v54 }
 0x229   : > { %v756_v5 = vand.u32 2147483647, %v1737_v24  ;;  %v894_v10 = vmul.f32 1.0614054, %v1771_v3  ;;  %v791_v39 = vsub.f32 1.0, %v790_v13  ;;  %vm795_vm1 = vweird.f32 %v1769_v44 }
 0x22a   : > { %v753_v7 = vand.u32 2147483647, %v1767_v37  ;;  %vm809_vm3 = vweird.f32 %v1745_v52  ;;  %vm796_vm5 = vmor %vm794_vm15, %vm795_vm1 }
 0x22b   : > { %v764_v41 = vmul.f32 0.3275911, %v756_v5  ;;  %v972_v26 = vsub.f32 0.0, %v756_v5  ;;  %v902_v38 = vadd.f32 -1.4531521, %v894_v10  ;;  %v792_v56 = vmul.f32 %v1769_v44, %v791_v39 }
 0x22c   : > { %v731_v0 = vpop.f32.mrf.mxu3  ;;  %v761_v25 = vmul.f32 0.3275911, %v753_v7  ;;  %v969_v46 = vsub.f32 0.0, %v753_v7  ;;  %v813_v10 = vand.u32 2147483647, %v1745_v52 }
 0x22d   : > { %v1773_v6 = vadd.f32 1.0, %v764_v41  ;;  %v1777_v9 = vadd.f32 %v1653_v63, %v731_v0  ;;  %v722_v17 = vpop.f32.mrf.mxu0  ;;  %v980_v47 = vmul.f32 %v972_v26, %v756_v5  ;;  %v910_v48 = vmul.f32 %v902_v38, %v1771_v3 }
 0x22e   : > { %v1784_v20 = vpop.eup %1312  ;;  %v1796_v4 = vadd.f32 %v1653_v63, %v722_v17  ;;  %v1799_v36 = vadd.f32 1.0, %v761_v25  ;;  %vm814_vm11 = vcmp.eq.f32.partialorder %v813_v10, 8.507059e+37 }
 0x22f   : > { %1314 = vrcp.f32 %v1773_v6  ;;  %v1793_v31 = vmul.f32 0.70710677, %v1777_v9  ;;  %v805_v11 = vmul.f32 %v1784_v20, %v1745_v52  ;;  %v875_v15 = vand.u32 2147483648, %v1773_v6 }
 0x230   : > { %1316 = vpow2.f32 %v982_v61  ;;  %v1812_v1 = vmul.f32 0.70710677, %v1796_v4  ;;  %v918_v59 = vadd.f32 1.4214138, %v910_v48  ;;  %v977_v61 = vmul.f32 %v969_v46, %v753_v7 }
 0x231   : > { %1318 = vpow2.f32 %v984_v8  ;;  %v757_v40 = vand.u32 2147483647, %v1793_v31  ;;  %v806_v58 = vsub.f32 1.0, %v805_v11  ;;  %v873_v13 = vand.u32 2147483647, %v1773_v6 }
 0x232   : > { %1320 = vpow2.f32 %v986_v16  ;;  %v754_v23 = vand.u32 2147483647, %v1812_v1  ;;  %v994_v16 = vmul.f32 1.442695, %v980_v47  ;;  %v926_v17 = vmul.f32 %v918_v59, %v1771_v3 }
 0x233   : > { %1322 = vrcp.f32 %v1799_v36  ;;  %v765_v28 = vmul.f32 0.3275911, %v757_v40  ;;  %v973_v51 = vsub.f32 0.0, %v757_v40  ;;  %v876_v26 = vor.u32 1.1754944e-38, %v875_v15 }
 0x234   : > { %v762_v0 = vmul.f32 0.3275911, %v754_v23  ;;  %v807_v38 = vmul.f32 %v1784_v20, %v806_v58  ;;  %vm869_vm4 = vweird.f32 %v1773_v6  ;;  %v934_v46 = vadd.f32 -0.28449672, %v926_v17 }
 0x235   : > { %v1814_v30 = vpop.eup %1314  ;;  %v1825_v29 = vadd.f32 1.0, %v765_v28  ;;  %v725_v5 = vpop.f32.mrf.mxu0  ;;  %v981_v33 = vmul.f32 %v973_v51, %v757_v40  ;;  %v988_v47 = vmul.f32 1.442695, %v977_v61  ;;  %v970_v28 = vsub.f32 0.0, %v754_v23 }
 0x236   : > { %v1818_v50 = vpop.eup %1316  ;;  %v865_v22 = vmul.f32 %v1814_v30, %v1773_v6  ;;  %v1834_v8 = vadd.f32 %v1653_v63, %v725_v5  ;;  %v1845_v63 = vadd.f32 1.0, %v762_v0  ;;  %v793_v48 = vadd.f32 %v1769_v44, %v792_v56 }
 0x237   : > { %v1831_v41 = vpop.eup %1318  ;;  %1324 = vrcp.f32 %v1825_v29  ;;  %v942_v15 = vmul.f32 %v934_v46, %v1771_v3  ;;  %vm870_vm6 = vweird.f32 %v1814_v30  ;;  %v996_v58 = vmul.f32 1.442695, %v981_v33 }
 0x238   : > { %v1837_v12 = vpop.eup %1320  ;;  %v866_v7 = vsub.f32 1.0, %v865_v22  ;;  %v1852_v11 = vmul.f32 0.70710677, %v1834_v8  ;;  %1326 = vrcp.f32 %v1845_v63  ;;  %v797_v5 = vsel %vm796_vm5, %v1769_v44, %v793_v48  ;;  %vm871_vm12 = vmor %vm869_vm4, %vm870_vm6 }
 0x239   : > { %v1843_v25 = vpop.eup %1322  ;;  %1328 = vpow2.f32 %v994_v16  ;;  %vm824_vm7 = vweird.f32 %v1799_v36  ;;  %v950_v61 = vadd.f32 0.2548296, %v942_v15  ;;  %v808_v0 = vadd.f32 %v1784_v20, %v807_v38 }
 0x23a   : > { %v820_v39 = vmul.f32 %v1843_v25, %v1799_v36  ;;  %v1857_v22 = vand.u32 2147483647, %v1852_v11  ;;  %v867_v51 = vmul.f32 %v1814_v30, %v866_v7  ;;  %vm810_vm8 = vweird.f32 %v1784_v20 }
 0x23b   : > { %1330 = vpow2.f32 %v988_v47  ;;  %v1875_v16 = vmul.f32 %v970_v28, %v754_v23  ;;  %v1880_v44 = vsel %vm1827_vm2, %v1801_v60, %v797_v5  ;;  %v958_v33 = vmul.f32 %v950_v61, %v1771_v3  ;;  %vm1892_vm10 = vmor %vm809_vm3, %vm810_vm8 }
 0x23c   : > { %v821_v40 = vsub.f32 1.0, %v820_v39  ;;  %v763_v59 = vmul.f32 0.3275911, %v1857_v22  ;;  %v895_v38 = vmul.f32 1.0614054, %v1880_v44  ;;  %1332 = vpow2.f32 %v996_v58 }
 0x23d   : > { %v1867_v56 = vpop.eup %1324  ;;  %v815_v60 = vand.u32 2147483648, %v1745_v52  ;;  %v868_v54 = vadd.f32 %v1814_v30, %v867_v51  ;;  %v812_v28 = vsel %vm1892_vm10, %v1784_v20, %v808_v0  ;;  %vm884_vm13 = vweird.f32 %v1825_v29 }
 0x23e   : > { %v880_v32 = vmul.f32 %v1867_v56, %v1825_v29  ;;  %v822_v17 = vmul.f32 %v1843_v25, %v821_v40  ;;  %v1884_v7 = vadd.f32 1.0, %v763_v59  ;;  %v1888_v39 = vpop.eup %1326  ;;  %v998_v52 = vmul.f32 %v1818_v50, %v958_v33 }
 0x23f   : > { %v1898_v47 = vpop.eup %1328  ;;  %v835_v3 = vmul.f32 %v1888_v39, %v1845_v63  ;;  %v903_v48 = vadd.f32 -1.4531521, %v895_v38  ;;  %v816_v40 = vor.u32 1.1754944e-38, %v815_v60  ;;  %vm874_vm14 = vcmp.eq.f32.partialorder %v873_v13, 8.507059e+37 }
 0x240   : > { %v881_v46 = vsub.f32 1.0, %v880_v32  ;;  %1334 = vrcp.f32 %v1884_v7  ;;  %v872_v58 = vsel %vm871_vm12, %v1814_v30, %v868_v54  ;;  %v823_v20 = vadd.f32 %v1843_v25, %v822_v17 }
 0x241   : > { %v836_v51 = vsub.f32 1.0, %v835_v3  ;;  %v1915_v10 = vpop.eup %1330  ;;  %v1006_v5 = vsub.f32 1.0, %v998_v52  ;;  %v911_v6 = vmul.f32 %v903_v48, %v1880_v44  ;;  %v1918_v59 = vsel %vm814_vm11, %v816_v40, %v812_v28 }
 0x242   : > { %v882_v15 = vmul.f32 %v1867_v56, %v881_v46  ;;  %v1920_v61 = vsel %vm874_vm14, %v876_v26, %v872_v58  ;;  %v896_v13 = vmul.f32 1.0614054, %v1918_v59  ;;  %vm825_vm15 = vweird.f32 %v1843_v25  ;;  %v1926_v30 = vpop.eup %1332 }
 0x243   : > { %v837_v50 = vmul.f32 %v1888_v39, %v836_v51  ;;  %v900_v0 = vmul.f32 1.0614054, %v1920_v61  ;;  %vm839_vm1 = vweird.f32 %v1845_v63  ;;  %v1022_v32 = vsub.f32 0.0, %v1006_v5  ;;  %vm1931_vm2 = vmor %vm824_vm7, %vm825_vm15 }
 0x244   : > { %v919_v17 = vadd.f32 1.4214138, %v911_v6  ;;  %v828_v26 = vand.u32 2147483647, %v1799_v36  ;;  %v830_v38 = vand.u32 2147483648, %v1799_v36  ;;  %v827_v54 = vsel %vm1931_vm2, %v1843_v25, %v823_v20 }
 0x245   : > { %v904_v23 = vadd.f32 -1.4531521, %v896_v13  ;;  %v908_v60 = vadd.f32 -1.4531521, %v900_v0  ;;  %v883_v3 = vadd.f32 %v1867_v56, %v882_v15  ;;  %v1030_v52 = vsel %vm1014_vm9, %v1006_v5, %v1022_v32 }
 0x246   : > { %v1937_v46 = vpop.eup %1334  ;;  %v927_v48 = vmul.f32 %v919_v17, %v1880_v44  ;;  %vm829_vm3 = vcmp.eq.f32.partialorder %v828_v26, 8.507059e+37  ;;  %v1038_v36 = vadd.f32 1.0, %v1030_v52  ;;  %v831_v58 = vor.u32 1.1754944e-38, %v830_v38 }
 0x247   : > { %v850_v28 = vmul.f32 %v1937_v46, %v1884_v7  ;;  %v912_v40 = vmul.f32 %v904_v23, %v1918_v59  ;;  %v916_v51 = vmul.f32 %v908_v60, %v1920_v61  ;;  %vm885_vm4 = vweird.f32 %v1867_v56 }
 0x248   : > { %v935_v13 = vadd.f32 -0.28449672, %v927_v48  ;;  %v888_v25 = vand.u32 2147483647, %v1825_v29  ;;  %v1046_v15 = vmul.f32 %v1038_v36, %v1787_v21  ;;  %v1953_v5 = vsel %vm829_vm3, %v831_v58, %v827_v54  ;;  %vm1957_vm5 = vmor %vm884_vm13, %vm885_vm4 }
 0x249   : > { %v851_v6 = vsub.f32 1.0, %v850_v28  ;;  %v920_v20 = vadd.f32 1.4214138, %v912_v40  ;;  %v924_v62 = vadd.f32 1.4214138, %v916_v51  ;;  %v887_v21 = vsel %vm1957_vm5, %v1867_v56, %v883_v3 }
 0x24a   : > { %v943_v17 = vmul.f32 %v935_v13, %v1880_v44  ;;  %v897_v33 = vmul.f32 1.0614054, %v1953_v5  ;;  %1090 = vmatmul.f32.vlgmr.msra.gmra.mxu1 %v1046_v15  ;;  %vm1969_vm6 = vcmp.eq.f32.partialorder %v888_v25, 8.507059e+37  ;;  %v890_v60 = vand.u32 2147483648, %v1825_v29 }
 0x24b   : > { %v852_v32 = vmul.f32 %v1937_v46, %v851_v6  ;;  %v928_v26 = vmul.f32 %v920_v20, %v1918_v59  ;;  %v932_v38 = vmul.f32 %v924_v62, %v1920_v61  ;;  %v838_v52 = vadd.f32 %v1888_v39, %v837_v50 }
 0x24c   : > { %v951_v54 = vadd.f32 0.2548296, %v943_v17  ;;  %v905_v28 = vadd.f32 -1.4531521, %v897_v33  ;;  %vm840_vm7 = vweird.f32 %v1888_v39  ;;  %vm1015_vm8 = vcmp.ge.f32.partialorder %v1693_v57, 0.0 }
 0x24d   : > { %v936_v56 = vadd.f32 -0.28449672, %v928_v26  ;;  %v940_v3 = vadd.f32 -0.28449672, %v932_v38  ;;  %v891_v48 = vor.u32 1.1754944e-38, %v890_v60  ;;  %vm1979_vm9 = vmor %vm839_vm1, %vm840_vm7  ;;  %v845_v40 = vand.u32 2147483648, %v1845_v63 }
 0x24e   : > { %v959_v29 = vmul.f32 %v951_v54, %v1880_v44  ;;  %v913_v51 = vmul.f32 %v905_v28, %v1953_v5  ;;  %v842_v50 = vsel %vm1979_vm9, %v1888_v39, %v838_v52  ;;  %v843_v58 = vand.u32 2147483647, %v1845_v63 }
 0x24f   : > { %v944_v6 = vmul.f32 %v936_v56, %v1918_v59  ;;  %v948_v13 = vmul.f32 %v940_v3, %v1920_v61  ;;  %v1994_v25 = vsel %vm1969_vm6, %v891_v48, %v887_v21  ;;  %v846_v15 = vor.u32 1.1754944e-38, %v845_v40 }
 0x250   : > { %v999_v20 = vmul.f32 %v1831_v41, %v959_v29  ;;  %v921_v44 = vadd.f32 1.4214138, %v913_v51  ;;  %v901_v62 = vmul.f32 1.0614054, %v1994_v25  ;;  %vm844_vm10 = vcmp.eq.f32.partialorder %v843_v58, 8.507059e+37 }
 0x251   : > { %v990_v0 = vmul.f32 1.442695, %v1875_v16  ;;  %v952_v39 = vadd.f32 0.2548296, %v944_v6  ;;  %v956_v17 = vadd.f32 0.2548296, %v948_v13  ;;  %v1999_v63 = vsel %vm844_vm10, %v846_v15, %v842_v50 }
 0x252   : > { %vm1016_vm11 = vcmp.ge.f32.partialorder %v1718_v27, 0.0  ;;  %vm1020_vm12 = vcmp.ge.f32.partialorder %v1737_v24, 0.0  ;;  %v1007_v33 = vsub.f32 1.0, %v999_v20  ;;  %v929_v21 = vmul.f32 %v921_v44, %v1953_v5 }
 0x253   : > { %v909_v26 = vadd.f32 -1.4531521, %v901_v62  ;;  %v898_v41 = vmul.f32 1.0614054, %v1999_v63  ;;  %v960_v38 = vmul.f32 %v952_v39, %v1918_v59  ;;  %v964_v23 = vmul.f32 %v956_v17, %v1920_v61 }
 0x254   : > { %v853_v16 = vadd.f32 %v1937_v46, %v852_v32  ;;  %vm855_vm13 = vweird.f32 %v1937_v46  ;;  %v1023_v60 = vsub.f32 0.0, %v1007_v33  ;;  %v937_v54 = vadd.f32 -0.28449672, %v929_v21 }
 0x255   : > { %v917_v28 = vmul.f32 %v909_v26, %v1994_v25  ;;  %v906_v52 = vadd.f32 -1.4531521, %v898_v41  ;;  %vm854_vm14 = vweird.f32 %v1884_v7  ;;  %v1000_v56 = vmul.f32 %v1837_v12, %v960_v38 }
 0x256   : > { %v1004_v3 = vmul.f32 %v1898_v47, %v964_v23  ;;  %v858_v48 = vand.u32 2147483647, %v1884_v7  ;;  %v1031_v59 = vsel %vm1015_vm8, %v1007_v33, %v1023_v60  ;;  %v945_v61 = vmul.f32 %v937_v54, %v1953_v5  ;;  %vm2020_vm15 = vmor %vm854_vm14, %vm855_vm13 }
 0x257   : > { %v925_v32 = vadd.f32 1.4214138, %v917_v28  ;;  %v914_v36 = vmul.f32 %v906_v52, %v1999_v63  ;;  %v1039_v40 = vadd.f32 1.0, %v1031_v59  ;;  %v1008_v29 = vsub.f32 1.0, %v1000_v56 }
 0x258   : > { %v1012_v51 = vsub.f32 1.0, %v1004_v3  ;;  %v860_v12 = vand.u32 2147483648, %v1884_v7  ;;  %v953_v47 = vadd.f32 0.2548296, %v945_v61  ;;  %v857_v6 = vsel %vm2020_vm15, %v1937_v46, %v853_v16 }
 0x259   : > { %v933_v57 = vmul.f32 %v925_v32, %v1994_v25  ;;  %v922_v58 = vadd.f32 1.4214138, %v914_v36  ;;  %v1047_v13 = vmul.f32 %v1039_v40, %v1790_v14  ;;  %v1024_v15 = vsub.f32 0.0, %v1008_v29 }
 0x25a   : > { %v1028_v20 = vsub.f32 0.0, %v1012_v51  ;;  %v861_v44 = vor.u32 1.1754944e-38, %v860_v12  ;;  %v961_v62 = vmul.f32 %v953_v47, %v1953_v5  ;;  %vm859_vm1 = vcmp.eq.f32.partialorder %v858_v48, 8.507059e+37 }
 0x25b   : > { %v941_v39 = vadd.f32 -0.28449672, %v933_v57  ;;  %v930_v17 = vmul.f32 %v922_v58, %v1999_v63  ;;  %v971_v7 = vsub.f32 0.0, %v1857_v22  ;;  %1093 = vmatmul.f32.gmra.mxu1 %v1047_v13  ;;  %v1032_v33 = vsel %vm1016_vm11, %v1008_v29, %v1024_v15 }
 0x25c   : > { %v1036_v46 = vsel %vm1020_vm12, %v1012_v51, %v1028_v20  ;;  %v862_v21 = vsel %vm859_vm1, %v861_v44, %v857_v6  ;;  %v1040_v14 = vadd.f32 1.0, %v1032_v33  ;;  %v1001_v41 = vmul.f32 %v1915_v10, %v961_v62 }
 0x25d   : > { %v1044_v26 = vadd.f32 1.0, %v1036_v46  ;;  %v949_v5 = vmul.f32 %v941_v39, %v1994_v25  ;;  %v736_v38 = vmul.f32 0.5, %v1708_v2  ;;  %v938_v23 = vadd.f32 -0.28449672, %v930_v17 }
 0x25e   : > { %v899_v16 = vmul.f32 1.0614054, %v862_v21  ;;  %1336 = vpow2.f32 %v990_v0  ;;  %v1009_v54 = vsub.f32 1.0, %v1001_v41  ;;  %v979_v56 = vmul.f32 %v971_v7, %v1857_v22 }
 0x25f   : > { %v1052_v60 = vmul.f32 %v1044_v26, %v1808_v42  ;;  %v957_v27 = vadd.f32 0.2548296, %v949_v5  ;;  %v1048_v28 = vmul.f32 %v1040_v14, %v736_v38  ;;  %v946_v24 = vmul.f32 %v938_v23, %v1999_v63 }
 0x260   : > { %v907_v52 = vadd.f32 -1.4531521, %v899_v16  ;;  %v1025_v3 = vsub.f32 0.0, %v1009_v54  ;;  %vm1017_vm2 = vcmp.ge.f32.partialorder %v1767_v37, 0.0  ;;  %v737_v42 = vmul.f32 0.5, %v1748_v53 }
 0x261   : > { %1108 = vmatmul.f32.vlgmr.msrb.gmra.mxu3 %v1052_v60  ;;  %v965_v10 = vmul.f32 %v957_v27, %v1994_v25  ;;  %v954_v2 = vadd.f32 0.2548296, %v946_v24  ;;  %v992_v22 = vmul.f32 1.442695, %v979_v56  ;;  %vm1021_vm3 = vcmp.ge.f32.partialorder %v1793_v31, 0.0 }
 0x262   : > { %v915_v48 = vmul.f32 %v907_v52, %v862_v21  ;;  %v1033_v59 = vsel %vm1017_vm2, %v1009_v54, %v1025_v3  ;;  %v741_v53 = vmul.f32 0.5, %v1777_v9  ;;  %vm1018_vm4 = vcmp.ge.f32.partialorder %v1812_v1, 0.0 }
 0x263   : > { %v1005_v0 = vmul.f32 %v1926_v30, %v965_v10  ;;  %1096 = vmatmul.f32.gmra.mxu1 %v1048_v28  ;;  %v1041_v61 = vadd.f32 1.0, %v1033_v59  ;;  %v962_v32 = vmul.f32 %v954_v2, %v1999_v63  ;;  %1338 = vpow2.f32 %v992_v22 }
 0x264   : > { %v923_v36 = vadd.f32 1.4214138, %v915_v48  ;;  %v1337_v40 = vpop.eup %1336  ;;  %v738_v20 = vmul.f32 0.5, %v1796_v4  ;;  %vm1019_vm5 = vcmp.ge.f32.partialorder %v1852_v11, 0.0  ;;  %v739_v1 = vmul.f32 0.5, %v1834_v8 }
 0x265   : > { %v1013_v29 = vsub.f32 1.0, %v1005_v0  ;;  %v1049_v51 = vmul.f32 %v1041_v61, %v737_v42  ;;  %v1002_v50 = vmul.f32 %v1337_v40, %v962_v32  ;;  %v1289_v4 = vld [vmem:[%s2088_s8] ss:$0 sm:$0xff] }
 0x266   : > { %v931_v25 = vmul.f32 %v923_v36, %v862_v21 }
 0x267   : > { %v1029_v12 = vsub.f32 0.0, %v1013_v29  ;;  %1099 = vmatmul.f32.vlgmr.msra.gmra.mxu2 %v1049_v51  ;;  %v1010_v37 = vsub.f32 1.0, %v1002_v50 }
 0x268   : > { %v939_v47 = vadd.f32 -0.28449672, %v931_v25 }
 0x269   : > { %v1037_v30 = vsel %vm1021_vm3, %v1013_v29, %v1029_v12  ;;  %v1026_v58 = vsub.f32 0.0, %v1010_v37  ;;  %v1339_v62 = vpop.eup %1338 }
 0x26a   : > { %v1045_v57 = vadd.f32 1.0, %v1037_v30  ;;  %v947_v63 = vmul.f32 %v939_v47, %v862_v21 }
 0x26b   : > { %v1034_v13 = vsel %vm1018_vm4, %v1010_v37, %v1026_v58 }
 0x26c   : > { %v1053_v6 = vmul.f32 %v1045_v57, %v741_v53  ;;  %v955_v15 = vadd.f32 0.2548296, %v947_v63  ;;  %v1042_v44 = vadd.f32 1.0, %v1034_v13 }
 0x26e   : > { %1111 = vmatmul.f32.gmra.mxu3 %v1053_v6  ;;  %v963_v31 = vmul.f32 %v955_v15, %v862_v21  ;;  %v1050_v39 = vmul.f32 %v1042_v44, %v738_v20 }
 0x270   : > { %v1003_v17 = vmul.f32 %v1339_v62, %v963_v31  ;;  %1102 = vmatmul.f32.gmra.mxu2 %v1050_v39 }
 0x272   : > { %v1011_v7 = vsub.f32 1.0, %v1003_v17 }
 0x274   : > { %v1027_v9 = vsub.f32 0.0, %v1011_v7 }
 0x276   : > { %v1035_v33 = vsel %vm1019_vm5, %v1011_v7, %v1027_v9 }
 0x277   : > { %v1043_v46 = vadd.f32 1.0, %v1035_v33 }
 0x279   : > { %v1051_v14 = vmul.f32 %v1043_v46, %v739_v1 }
 0x27b   : > { %1105 = vmatmul.f32.gmra.mxu2 %v1051_v14 }
 0x2c7   : > { %v1091_v21 = vpop.f32.mrf.mxu1 }
 0x2c8   : > { %v1092_v26 = vadd.f32 %v1289_v4, %v1091_v21 }
 0x2ca   : > { %v1115_v41 = vadd.f32 %v1092_v26, %v1432_v19 }
 0x2cc   : > { %1123 = vst.msk [vmem:[%s372_s14] sm:$0xff] %vm453_vm0, %v1115_v41 }
 0x2d8   : > { %v1094_v11 = vpop.f32.mrf.mxu1 }
 0x2d9   : > { %v1095_v5 = vadd.f32 %v1289_v4, %v1094_v11 }
 0x2db   : > { %v1116_v8 = vadd.f32 %v1095_v5, %v1448_v35 }
 0x2dd   : > { %1124 = vst.msk [vmem:[%s372_s14 + $0x8] sm:$0xff] %vm453_vm0, %v1116_v8 }
 0x2e0   : > { %v1097_v38 = vpop.f32.mrf.mxu1 }
 0x2e1   : > { %v1098_v23 = vadd.f32 %v1289_v4, %v1097_v38 }
 0x2e3   : > { %v1117_v16 = vadd.f32 %v1098_v23, %v1430_v18 }
 0x2e4   : > { %v1109_v60 = vpop.f32.mrf.mxu3 }
 0x2e5   : > { %v1110_v54 = vadd.f32 %v1289_v4, %v1109_v60  ;;  %1125 = vst.msk [vmem:[%s372_s14 + $0x10] sm:$0xff] %vm453_vm0, %v1117_v16 }
 0x2e7   : > { %v1121_v27 = vadd.f32 %v1110_v54, %v1458_v45 }
 0x2e9   : > { %1129 = vst.msk [vmem:[%s372_s14 + $0x30] sm:$0xff] %vm453_vm0, %v1121_v27 }
 0x2ea   : > { %v1100_v19 = vpop.f32.mrf.mxu2 }
 0x2eb   : > { %v1101_v28 = vadd.f32 %v1289_v4, %v1100_v19 }
 0x2ed   : > { %v1118_v24 = vadd.f32 %v1101_v28, %v1446_v34 }
 0x2ef   : > { %1126 = vst.msk [vmem:[%s372_s14 + $0x18] sm:$0xff] %vm453_vm0, %v1118_v24 }
 0x2f1   : > { %v1112_v35 = vpop.f32.mrf.mxu3 }
 0x2f2   : > { %v1113_v52 = vadd.f32 %v1289_v4, %v1112_v35 }
 0x2f3   : > { %v1103_v3 = vpop.f32.mrf.mxu2 }
 0x2f4   : > { %v1122_v56 = vadd.f32 %v1113_v52, %v1462_v49  ;;  %v1104_v18 = vadd.f32 %v1289_v4, %v1103_v3 }
 0x2f6   : > { %1130 = vst.msk [vmem:[%s372_s14 + $0x38] sm:$0xff] %vm453_vm0, %v1122_v56  ;;  %v1119_v10 = vadd.f32 %v1104_v18, %v1456_v43 }
 0x2f8   : > { %1127 = vst.msk [vmem:[%s372_s14 + $0x20] sm:$0xff] %vm453_vm0, %v1119_v10 }
 0x2fe   : > { %v1106_v45 = vpop.f32.mrf.mxu2 }
 0x2ff   : > { %v1107_v2 = vadd.f32 %v1289_v4, %v1106_v45 }
 0x301   : > { %v1120_v48 = vadd.f32 %v1107_v2, %v1470_v55 }
 0x303   : > { %1128 = vst.msk [vmem:[%s372_s14 + $0x28] sm:$0xff] %vm453_vm0, %v1120_v48 }
 0x304 PF: > { %s19_s30 = sadd.s32 1, %s1346_s30  }
 0x305   : > { %p16_p4 = scmp.ge.s32.totalorder %s19_s30, 4  }
 0x307   :  { %18 = sbr.rel (!%p16_p4) target bundleno = 1 (0x1), region = 92 }

// kernel: _lambda_.2
= control target key start
LH: loop header
LB: loop body
LE: loop exit
PB: predicated region body
PF: predicated region fallthrough
CT: control target
= control target key end

     0   :  { %s2533_s27 = smov 0   ;;  %s3605_s0 = inlined_call_operand.vmem [shape: f32[2,64,32], index: 0, kind: input, shape index: {}]   ;;  %s3606_s1 = inlined_call_operand.vmem [shape: f32[4,64,64], index: 1, kind: input, shape index: {}]   ;;  %s3607_s2 = inlined_call_operand.vmem [shape: f32[1,32], index: 2, kind: input, shape index: {}]   ;;  %s3608_s3 = inlined_call_operand.vmem [shape: f32[1,32], index: 3, kind: input, shape index: {}]   ;;  %s3609_s4 = inlined_call_operand.vmem [shape: f32[32,96], index: 4, kind: input, shape index: {}]   ;;  %s3610_s5 = inlined_call_operand.vmem [shape: f32[1,96], index: 5, kind: input, shape index: {}]   ;;  %s3611_s6 = inlined_call_operand.vmem [shape: f32[32,32], index: 6, kind: input, shape index: {}]   ;;  %s3612_s7 = inlined_call_operand.vmem [shape: f32[1,32], index: 7, kind: input, shape index: {}]   ;;  %s3613_s8 = inlined_call_operand.vmem [shape: f32[2,64,32], index: 8, kind: output, shape index: {}]  }
   0x1 LB: > { %s2043_s28 = sadd.s32 4294967295, %s2471_s27   ;;  %p2047_p0 = scmp.ge.s32.totalorder %s2471_s27, 1  ;;  %s2471_s27 = sphi %s2533_s27, %s18_s27  }
   0x2   : > { %p262_p1 = scmp.lt.s32.totalorder %s2471_s27, 3 }
   0x4   : > { %p263_p2 = pnand %p2047_p0, %p262_p1 }
   0x5   : > { %p296_p3 = scmp.lt.s32.totalorder (!%p263_p2), %s2043_s28, 1  ;;  %s2474_s25 = smov (!%p263_p2), 96  }
   0x6   : > { %266 = sbr.rel (%p263_p2) target bundleno = 2056 (0x808), region = 52  ;;  %s2475_s26 = smov (!%p263_p2), 88  }
   0x7   : > { %s2476_s30 = smov (!%p263_p2), 64   ;;  %s2477_s9 = smov (!%p263_p2), 120  }
   0x8   : > { %s2479_s11 = smov (!%p263_p2), 72   ;;  %s2480_s12 = smov (!%p263_p2), 104  }
   0x9   : > { %s2481_s13 = smov (!%p263_p2), 112   ;;  %s2482_s23 = smov (!%p263_p2), 56  }
   0xa   : > { %s2483_s19 = smov (!%p263_p2), 40   ;;  %s2484_s22 = smov (!%p263_p2), 48  }
   0xb   : > { %s3617_s28 = smov (!%p296_p3, %s2043_s28), 1  ;;  %vm314_vm0 = vcmask 261120   ;;  %v2473_v14 = vmov 32.0   ;;  %v525_v58 = vld [vmem:[%s3609_s4 + $0x18] sm:$0xff]  ;;  %v524_v59 = vld [vmem:[%s3609_s4 + $0x10] sm:$0xff]  ;;  %v523_v60 = vld [vmem:[%s3609_s4 + $0x8] sm:$0xff] }
   0xc   : > { %s2190_s29 = sshll.u32 %s3617_s28, 6  ;;  %2319 = vrcp.f32 %v2473_v14  ;;  %2192 = vmatpush.msra.mxu3 %v525_v58  ;;  %566 = vmatpush.msra.mxu0 %v525_v58  ;;  %v522_v61 = vld [vmem:[%s3609_s4] sm:$0xff] }
   0xd   : > { %s2549_s10 = scalar_lea.vmem %s3605_s0, %s2190_s29  ;;  %s305_s21 = scalar_lea.vmem %s3613_s8, %s2190_s29 }
   0xe   : > { %v312_v0 = vld [vmem:[%s2549_s10 + $0x30] sm:$0xff]  ;;  %v310_v1 = vld [vmem:[%s2549_s10 + $0x20] sm:$0xff]  ;;  %v313_v6 = vld [vmem:[%s2549_s10 + $0x38] sm:$0xff]  ;;  %2193 = vmatpush.msra.mxu3 %v524_v59  ;;  %567 = vmatpush.msra.mxu0 %v524_v59 }
   0xf   : > { %v308_v2 = vld [vmem:[%s2549_s10 + $0x10] sm:$0xff]  ;;  %v333_v3 = vsel %vm314_vm0, %v312_v0, 0.0  ;;  %v327_v4 = vsel %vm314_vm0, %v310_v1, 0.0  ;;  %v311_v7 = vld [vmem:[%s2549_s10 + $0x28] sm:$0xff]  ;;  %v309_v8 = vld [vmem:[%s2549_s10 + $0x18] sm:$0xff]  ;;  %v336_v9 = vsel %vm314_vm0, %v313_v6, 0.0 }
  0x10   : > { %v321_v5 = vsel %vm314_vm0, %v308_v2, 0.0  ;;  %334 = vadd.xlane.f32.xlu2 %v333_v3  ;;  %328 = vadd.xlane.f32.xlu1 %v327_v4  ;;  %v330_v10 = vsel %vm314_vm0, %v311_v7, 0.0  ;;  %v324_v11 = vsel %vm314_vm0, %v309_v8, 0.0  ;;  %v306_v12 = vld [vmem:[%s2549_s10] sm:$0xff]  ;;  %v307_v50 = vld [vmem:[%s2549_s10 + $0x8] sm:$0xff]  ;;  %s2478_s10 = smov 80  }
  0x11   : > { %322 = vadd.xlane.f32.xlu0 %v321_v5  ;;  %v315_v13 = vsel %vm314_vm0, %v306_v12, 0.0  ;;  %v318_v54 = vsel %vm314_vm0, %v307_v50, 0.0  ;;  %2194 = vmatpush.msra.mxu3 %v523_v60 }
  0x12   : > { %v2320_v15 = vpop.eup %2319  ;;  %568 = vmatpush.msra.mxu0 %v523_v60 }
  0x13   : > { %v340_v16 = vmul.f32 32.0, %v2320_v15  ;;  %vm344_vm1 = vweird.f32 %v2320_v15  ;;  %2195 = vmatpush.msra.mxu3 %v522_v61 }
  0x14   : > { %569 = vmatpush.msra.mxu0 %v522_v61 }
  0x15   : > { %v341_v17 = vsub.f32 1.0, %v340_v16 }
  0x17   : > { %v342_v18 = vmul.f32 %v2320_v15, %v341_v17 }
  0x18   : > { %337 = vadd.xlane.f32.xlu2 %v336_v9  ;;  %331 = vadd.xlane.f32.xlu1 %v330_v10 }
  0x19   : > { %325 = vadd.xlane.f32.xlu0 %v324_v11  ;;  %v343_v19 = vadd.f32 %v2320_v15, %v342_v18 }
  0x1b   : > { %v2565_v20 = vsel %vm344_vm1, %v2320_v15, %v343_v19 }
  0x20   : > { %316 = vadd.xlane.f32.xlu2 %v315_v13 }
  0x83   : > { %v335_v21 = vpop.xlane.xlu2 %334  ;;  %v329_v22 = vpop.xlane.xlu1 %328 }
  0x84   : > { %v323_v23 = vpop.xlane.xlu0 %322  ;;  %v350_v24 = vmul.f32 %v2565_v20, %v329_v22  ;;  %v352_v34 = vmul.f32 %v2565_v20, %v335_v21 }
  0x85   : > { %v348_v25 = vmul.f32 %v2565_v20, %v323_v23 }
  0x86   : > { %v2571_v27 = vsub.f32 %v310_v1, %v350_v24  ;;  %v2587_v40 = vsub.f32 %v312_v0, %v352_v34 }
  0x87   : > { %v2569_v26 = vsub.f32 %v308_v2, %v348_v25 }
  0x88   : > { %v366_v36 = vmul.f32 %v2571_v27, %v2571_v27  ;;  %v368_v48 = vmul.f32 %v2587_v40, %v2587_v40 }
  0x89   : > { %v364_v28 = vmul.f32 %v2569_v26, %v2569_v26 }
  0x8a   : > { %v382_v41 = vsel %vm314_vm0, %v366_v36, 0.0  ;;  %v388_v53 = vsel %vm314_vm0, %v368_v48, 0.0  ;;  %v2651_v36 = vld [vmem:[%s3607_s2] ss:$0 sm:$0xff] }
  0x8b   : > { %v338_v29 = vpop.xlane.xlu2 %337  ;;  %v332_v30 = vpop.xlane.xlu1 %331  ;;  %v376_v31 = vsel %vm314_vm0, %v364_v28, 0.0 }
  0x8c   : > { %v351_v32 = vmul.f32 %v2565_v20, %v332_v30  ;;  %377 = vadd.xlane.f32.xlu0 %v376_v31  ;;  %v326_v33 = vpop.xlane.xlu0 %325  ;;  %v353_v47 = vmul.f32 %v2565_v20, %v338_v29 }
  0x8d   : > { %v349_v35 = vmul.f32 %v2565_v20, %v326_v33 }
  0x8e   : > { %v2581_v37 = vsub.f32 %v311_v7, %v351_v32  ;;  %v2603_v52 = vsub.f32 %v313_v6, %v353_v47 }
  0x8f   : > { %v2583_v38 = vsub.f32 %v309_v8, %v349_v35 }
  0x90   : > { %v367_v39 = vmul.f32 %v2581_v37, %v2581_v37  ;;  %v369_v56 = vmul.f32 %v2603_v52, %v2603_v52 }
  0x91   : > { %v365_v42 = vmul.f32 %v2583_v38, %v2583_v38 }
  0x92   : > { %v385_v43 = vsel %vm314_vm0, %v367_v39, 0.0  ;;  %v391_v57 = vsel %vm314_vm0, %v369_v56, 0.0 }
  0x93   : > { %v379_v44 = vsel %vm314_vm0, %v365_v42, 0.0  ;;  %386 = vadd.xlane.f32.xlu2 %v385_v43  ;;  %v317_v45 = vpop.xlane.xlu2 %316 }
  0x94   : > { %383 = vadd.xlane.f32.xlu0 %v382_v41  ;;  %380 = vadd.xlane.f32.xlu1 %v379_v44  ;;  %v346_v46 = vmul.f32 %v2565_v20, %v317_v45 }
  0x96   : > { %v2598_v49 = vsub.f32 %v306_v12, %v346_v46 }
  0x98   : > { %v362_v51 = vmul.f32 %v2598_v49, %v2598_v49 }
  0x9a   : > { %v370_v55 = vsel %vm314_vm0, %v362_v51, 0.0 }
  0x9b   : > { %371 = vadd.xlane.f32.xlu2 %v370_v55 }
  0x9c   : > { %389 = vadd.xlane.f32.xlu0 %v388_v53  ;;  %319 = vadd.xlane.f32.xlu1 %v318_v54 }
  0xa4   : > { %392 = vadd.xlane.f32.xlu1 %v391_v57 }
  0xff   : > { %v378_v62 = vpop.xlane.xlu0 %377 }
 0x100   : > { %v396_v63 = vmul.f32 %v378_v62, %v2565_v20 }
 0x102   : > { %v404_v0 = vadd.f32 1e-05, %v396_v63 }
 0x104   : > { %2321 = vrsqrt.f32 %v404_v0  ;;  %vm436_vm3 = vweird.f32 %v404_v0 }
 0x106   : > { %v387_v1 = vpop.xlane.xlu2 %386 }
 0x107   : > { %v381_v2 = vpop.xlane.xlu1 %380  ;;  %v384_v3 = vpop.xlane.xlu0 %383  ;;  %v399_v4 = vmul.f32 %v387_v1, %v2565_v20 }
 0x108   : > { %v397_v5 = vmul.f32 %v381_v2, %v2565_v20  ;;  %v398_v6 = vmul.f32 %v384_v3, %v2565_v20 }
 0x109   : > { %v2627_v7 = vadd.f32 1e-05, %v399_v4 }
 0x10a   : > { %v2322_v8 = vpop.eup %2321  ;;  %v405_v9 = vadd.f32 1e-05, %v397_v5  ;;  %v2629_v10 = vadd.f32 1e-05, %v398_v6 }
 0x10b   : > { %v431_v11 = vmul.f32 %v2322_v8, %v404_v0  ;;  %2323 = vrsqrt.f32 %v2627_v7  ;;  %vm437_vm2 = vweird.f32 %v2322_v8  ;;  %vm466_vm14 = vweird.f32 %v2627_v7 }
 0x10c   : > { %2325 = vrsqrt.f32 %v405_v9  ;;  %vm438_vm4 = vmor %vm436_vm3, %vm437_vm2  ;;  %vm446_vm6 = vweird.f32 %v405_v9  ;;  %vm456_vm7 = vweird.f32 %v2629_v10 }
 0x10d   : > { %v432_v12 = vmul.f32 %v2322_v8, %v431_v11  ;;  %2327 = vrsqrt.f32 %v2629_v10 }
 0x10e   : > { %v372_v13 = vpop.xlane.xlu2 %371 }
 0x10f   : > { %v433_v14 = vmul.f32 0.5, %v432_v12  ;;  %v390_v15 = vpop.xlane.xlu0 %389  ;;  %v320_v16 = vpop.xlane.xlu1 %319  ;;  %v394_v17 = vmul.f32 %v372_v13, %v2565_v20 }
 0x110   : > { %v400_v18 = vmul.f32 %v390_v15, %v2565_v20  ;;  %v347_v19 = vmul.f32 %v2565_v20, %v320_v16 }
 0x111   : > { %v2636_v21 = vpop.eup %2323  ;;  %v434_v22 = vsub.f32 1.5, %v433_v14  ;;  %v402_v23 = vadd.f32 1e-05, %v394_v17 }
 0x112   : > { %v2326_v24 = vpop.eup %2325  ;;  %v2638_v25 = vadd.f32 1e-05, %v400_v18  ;;  %v2640_v28 = vsub.f32 %v307_v50, %v347_v19  ;;  %v461_v33 = vmul.f32 %v2636_v21, %v2627_v7  ;;  %v2660_v50 = vld [vmem:[%s3608_s3] ss:$0 sm:$0xff]  ;;  %vm467_vm15 = vweird.f32 %v2636_v21 }
 0x113   : > { %v2328_v29 = vpop.eup %2327  ;;  %v435_v30 = vmul.f32 %v2322_v8, %v434_v22  ;;  %v441_v31 = vmul.f32 %v2326_v24, %v405_v9  ;;  %2329 = vrsqrt.f32 %v402_v23  ;;  %vm447_vm5 = vweird.f32 %v2326_v24  ;;  %vm468_vm1 = vmor %vm466_vm14, %vm467_vm15 }
 0x114   : > { %v451_v32 = vmul.f32 %v2328_v29, %v2629_v10  ;;  %2331 = vrsqrt.f32 %v2638_v25  ;;  %v363_v35 = vmul.f32 %v2640_v28, %v2640_v28  ;;  %v462_v47 = vmul.f32 %v2636_v21, %v461_v33  ;;  %vm448_vm9 = vmor %vm446_vm6, %vm447_vm5 }
 0x115   : > { %v442_v34 = vmul.f32 %v2326_v24, %v441_v31  ;;  %v439_v41 = vsel %vm438_vm4, %v2322_v8, %v435_v30  ;;  %vm457_vm8 = vweird.f32 %v2328_v29  ;;  %vm416_vm11 = vweird.f32 %v402_v23 }
 0x116   : > { %v452_v39 = vmul.f32 %v2328_v29, %v451_v32  ;;  %v373_v43 = vsel %vm314_vm0, %v363_v35, 0.0  ;;  %v492_v45 = vmul.f32 %v439_v41, %v2569_v26  ;;  %v463_v59 = vmul.f32 0.5, %v462_v47  ;;  %vm2669_vm10 = vmor %vm456_vm7, %vm457_vm8 }
 0x117   : > { %v443_v42 = vmul.f32 0.5, %v442_v34  ;;  %v393_v44 = vpop.xlane.xlu1 %392  ;;  %374 = vadd.xlane.f32.xlu0 %v373_v43  ;;  %vm476_vm2 = vweird.f32 %v2638_v25  ;;  %vm1558_vm14 = vcmask 195712   ;;  %vm1890_vm15 = vcmask 261312  }
 0x118   : > { %v453_v46 = vmul.f32 0.5, %v452_v39  ;;  %v401_v48 = vmul.f32 %v393_v44, %v2565_v20  ;;  %v504_v54 = vmul.f32 %v2651_v36, %v492_v45  ;;  %v464_v6 = vsub.f32 1.5, %v463_v59  ;;  %v2317_v59 = vld [vmem:[%s3610_s5] ss:$0 sm:$0xff] }
 0x119   : > { %v2330_v51 = vpop.eup %2329  ;;  %v444_v53 = vsub.f32 1.5, %v443_v42 }
 0x11a   : > { %v2663_v55 = vpop.eup %2331  ;;  %v454_v26 = vsub.f32 1.5, %v453_v46  ;;  %v411_v56 = vmul.f32 %v2330_v51, %v402_v23  ;;  %v409_v58 = vadd.f32 1e-05, %v401_v48  ;;  %v516_v61 = vadd.f32 %v2660_v50, %v504_v54 }
 0x11b   : > { %v445_v57 = vmul.f32 %v2326_v24, %v444_v53  ;;  %v471_v0 = vmul.f32 %v2663_v55, %v2638_v25  ;;  %vm417_vm12 = vweird.f32 %v2330_v51  ;;  %v465_v14 = vmul.f32 %v2636_v21, %v464_v6 }
 0x11c   : > { %v412_v60 = vmul.f32 %v2330_v51, %v411_v56  ;;  %v455_v63 = vmul.f32 %v2328_v29, %v454_v26  ;;  %2333 = vrsqrt.f32 %v409_v58  ;;  %2054 = vmatmul.msk.f32.vlgmr.msra.gmra.mxu3 %vm314_vm0, %v516_v61  ;;  %vm418_vm13 = vmor %vm416_vm11, %vm417_vm12  ;;  %vm477_vm3 = vweird.f32 %v2663_v55 }
 0x11d   : > { %v449_v62 = vsel %vm448_vm9, %v2326_v24, %v445_v57  ;;  %v472_v8 = vmul.f32 %v2663_v55, %v471_v0  ;;  %v469_v24 = vsel %vm468_vm1, %v2636_v21, %v465_v14  ;;  %vm478_vm4 = vmor %vm476_vm2, %vm477_vm3  ;;  %vm486_vm5 = vweird.f32 %v409_v58 }
 0x11e   : > { %v413_v2 = vmul.f32 0.5, %v412_v60  ;;  %v493_v3 = vmul.f32 %v449_v62, %v2583_v38  ;;  %v459_v9 = vsel %vm2669_vm10, %v2328_v29, %v455_v63  ;;  %vm635_vm11 = vcmask 64512  }
 0x11f   : > { %v494_v38 = vmul.f32 %v459_v9, %v2571_v27  ;;  %v473_v15 = vmul.f32 0.5, %v472_v8  ;;  %vm717_vm12 = vcmask 523264  }
 0x120   : > { %v414_v4 = vsub.f32 1.5, %v413_v2  ;;  %v505_v5 = vmul.f32 %v2651_v36, %v493_v3 }
 0x121   : > { %v506_v19 = vmul.f32 %v2651_v36, %v494_v38  ;;  %v474_v22 = vsub.f32 1.5, %v473_v15 }
 0x122   : > { %v415_v10 = vmul.f32 %v2330_v51, %v414_v4  ;;  %v517_v11 = vadd.f32 %v2660_v50, %v505_v5  ;;  %v2334_v12 = vpop.eup %2333 }
 0x123   : > { %v481_v16 = vmul.f32 %v2334_v12, %v409_v58  ;;  %v518_v27 = vadd.f32 %v2660_v50, %v506_v19  ;;  %v475_v29 = vmul.f32 %v2663_v55, %v474_v22  ;;  %vm487_vm6 = vweird.f32 %v2334_v12 }
 0x124   : > { %v419_v13 = vsel %vm418_vm13, %v2330_v51, %v415_v10  ;;  %2055 = vmatmul.msk.f32.gmra.mxu3 %vm314_vm0, %v517_v11  ;;  %vm488_vm7 = vmor %vm486_vm5, %vm487_vm6  ;;  %vm1226_vm13 = vcmask 130112  }
 0x125   : > { %v490_v17 = vmul.f32 %v419_v13, %v2598_v49  ;;  %v482_v7 = vmul.f32 %v2334_v12, %v481_v16  ;;  %v495_v49 = vmul.f32 %v469_v24, %v2581_v37  ;;  %v479_v21 = vsel %vm478_vm4, %v2663_v55, %v475_v29 }
 0x126   : > { %v496_v33 = vmul.f32 %v479_v21, %v2587_v40 }
 0x127   : > { %v502_v18 = vmul.f32 %v2651_v36, %v490_v17  ;;  %v483_v30 = vmul.f32 0.5, %v482_v7  ;;  %v507_v31 = vmul.f32 %v2651_v36, %v495_v49 }
 0x128   : > { %v508_v37 = vmul.f32 %v2651_v36, %v496_v33 }
 0x129   : > { %v514_v23 = vadd.f32 %v2660_v50, %v502_v18  ;;  %v484_v32 = vsub.f32 1.5, %v483_v30  ;;  %v519_v25 = vadd.f32 %v2660_v50, %v507_v31 }
 0x12a   : > { %v520_v39 = vadd.f32 %v2660_v50, %v508_v37 }
 0x12b   : > { %2052 = vmatmul.msk.f32.vlgmr.msra.gmra.mxu0 %vm314_vm0, %v514_v23  ;;  %v485_v34 = vmul.f32 %v2334_v12, %v484_v32 }
 0x12c   : > { %2056 = vmatmul.msk.f32.gmra.mxu3 %vm314_vm0, %v518_v27 }
 0x12d   : > { %v489_v35 = vsel %vm488_vm7, %v2334_v12, %v485_v34 }
 0x12e   : > { %v497_v41 = vmul.f32 %v489_v35, %v2603_v52 }
 0x130   : > { %v509_v42 = vmul.f32 %v2651_v36, %v497_v41 }
 0x132   : > { %v521_v43 = vadd.f32 %v2660_v50, %v509_v42 }
 0x134   : > { %2057 = vmatmul.msk.f32.gmra.mxu3 %vm314_vm0, %v519_v25 }
 0x13c   : > { %2058 = vmatmul.msk.f32.gmra.mxu3 %vm314_vm0, %v520_v39 }
 0x144   : > { %2059 = vmatmul.msk.f32.gmra.mxu3 %vm314_vm0, %v521_v43 }
 0x18a   : > { %v375_v40 = vpop.xlane.xlu0 %374 }
 0x18b   : > { %v395_v44 = vmul.f32 %v375_v40, %v2565_v20 }
 0x18d   : > { %v403_v45 = vadd.f32 1e-05, %v395_v44 }
 0x18f   : > { %2335 = vrsqrt.f32 %v403_v45  ;;  %vm426_vm9 = vweird.f32 %v403_v45 }
 0x195   : > { %v2336_v46 = vpop.eup %2335 }
 0x196   : > { %v421_v47 = vmul.f32 %v2336_v46, %v403_v45  ;;  %vm427_vm8 = vweird.f32 %v2336_v46 }
 0x197   : > { %vm428_vm10 = vmor %vm426_vm9, %vm427_vm8 }
 0x198   : > { %v422_v48 = vmul.f32 %v2336_v46, %v421_v47 }
 0x19a   : > { %v423_v51 = vmul.f32 0.5, %v422_v48 }
 0x19c   : > { %v424_v53 = vsub.f32 1.5, %v423_v51 }
 0x19e   : > { %v425_v52 = vmul.f32 %v2336_v46, %v424_v53 }
 0x19f   : > { %v577_v54 = vpop.f32.mrf.mxu3 }
 0x1a0   : > { %v429_v55 = vsel %vm428_vm10, %v2336_v46, %v425_v52  ;;  %v2717_v63 = vadd.f32 %v2317_v59, %v577_v54 }
 0x1a1   : > { %v491_v26 = vmul.f32 %v429_v55, %v2640_v28 }
 0x1a2   : > { %v597_v17 = vmul.f32 0.35355338, %v2717_v63 }
 0x1a3   : > { %v503_v56 = vmul.f32 %v2651_v36, %v491_v26 }
 0x1a5   : > { %v515_v57 = vadd.f32 %v2660_v50, %v503_v56 }
 0x1a7   : > { %2053 = vmatmul.msk.f32.gmra.mxu0 %vm314_vm0, %v515_v57  ;;  %v580_v20 = vpop.f32.mrf.mxu3 }
 0x1a8   : > { %v2727_v1 = vadd.f32 %v2317_v59, %v580_v20  ;;  %v571_v3 = vpop.f32.mrf.mxu0 }
 0x1a9   : > { %v2739_v4 = vadd.f32 %v2317_v59, %v571_v3 }
 0x1aa   : > { %v2804_v19 = vpack.i.bf16 %v2717_v63, %v2727_v1  ;;  %v598_v7 = vmul.f32 0.35355338, %v2727_v1 }
 0x1ab   : > { %v2775_v12 = vmul.f32 0.35355338, %v2739_v4 }
 0x1af   : > { %v583_v58 = vpop.f32.mrf.mxu3 }
 0x1b0   : > { %v2723_v50 = vadd.f32 %v2317_v59, %v583_v58 }
 0x1b2   : > { %v2765_v10 = vmul.f32 0.35355338, %v2723_v50 }
 0x1b7   : > { %v586_v60 = vpop.f32.mrf.mxu3 }
 0x1b8   : > { %v587_v61 = vadd.f32 %v2317_v59, %v586_v60 }
 0x1ba   : > { %629 = vrot.lane.b32.xlu0 %v587_v61, %s2474_s25  ;;  %v2734_v2 = vpack.i.bf16 %v2723_v50, %v587_v61  ;;  %v2758_v9 = vmul.f32 0.35355338, %v587_v61 }
 0x1bf   : > { %v589_v62 = vpop.f32.mrf.mxu3 }
 0x1c0   : > { %v2719_v28 = vadd.f32 %v2317_v59, %v589_v62 }
 0x1c2   : > { %631 = vrot.lane.b32.xlu2 %v2719_v28, %s2474_s25  ;;  %623 = vrot.lane.b32.xlu0 %v2717_v63, %s2474_s25  ;;  %v2833_v24 = vmul.f32 0.35355338, %v2719_v28 }
 0x1c7   : > { %v592_v36 = vpop.f32.mrf.mxu3 }
 0x1c8   : > { %v2725_v0 = vadd.f32 %v2317_v59, %v592_v36 }
 0x1ca   : > { %633 = vrot.lane.b32.xlu1 %v2725_v0, %s2474_s25  ;;  %627 = vrot.lane.b32.xlu2 %v2723_v50, %s2474_s25  ;;  %v2814_v22 = vpack.i.bf16 %v2719_v28, %v2725_v0  ;;  %v2844_v49 = vmul.f32 0.35355338, %v2725_v0 }
 0x1cb   : > { %934 = vrot.lane.b32.xlu0 %v2727_v1, %s2475_s26 }
 0x1d2   : > { %625 = vrot.lane.b32.xlu1 %v2727_v1, %s2474_s25 }
 0x1d3   : > { %2236 = vrot.lane.b32.xlu0 %v2734_v2, %s2476_s30 }
 0x1da   : > { %619 = vrot.lane.b32.xlu1 %v2739_v4, %s2474_s25 }
 0x1e2   : > { %940 = vrot.lane.b32.xlu1 %v2719_v28, %s2475_s26 }
 0x1ea   : > { %938 = vrot.lane.b32.xlu1 %v587_v61, %s2475_s26 }
 0x1f2   : > { %936 = vrot.lane.b32.xlu1 %v2723_v50, %s2475_s26 }
 0x21c   : > { %v632_v13 = vpop.permute.xlu2 %631 }
 0x224   : > { %v574_v5 = vpop.f32.mrf.mxu0  ;;  %v628_v15 = vpop.permute.xlu2 %627 }
 0x225   : > { %v2747_v6 = vadd.f32 %v2317_v59, %v574_v5 }
 0x227   : > { %621 = vrot.lane.b32.xlu2 %v2747_v6, %s2474_s25  ;;  %930 = vrot.lane.b32.xlu1 %v2747_v6, %s2475_s26  ;;  %v2754_v8 = vpack.i.bf16 %v2739_v4, %v2747_v6  ;;  %v2785_v14 = vmul.f32 0.35355338, %v2747_v6 }
 0x229   : > { %2246 = vrot.lane.b32.xlu0 %v2754_v8, %s2476_s30 }
 0x22c   : > { %v630_v38 = vpop.permute.xlu0 %629 }
 0x22f   : > { %932 = vrot.lane.b32.xlu2 %v2717_v63, %s2475_s26  ;;  %922 = vrot.lane.b32.xlu1 %v2758_v9, %s2477_s9 }
 0x231   : > { %920 = vrot.lane.b32.xlu0 %v2765_v10, %s2477_s9 }
 0x234   : > { %v624_v18 = vpop.permute.xlu0 %623 }
 0x237   : > { %928 = vrot.lane.b32.xlu2 %v2739_v4, %s2475_s26  ;;  %1270 = vrot.lane.b32.xlu1 %v587_v61, %s2478_s10 }
 0x239   : > { %1272 = vrot.lane.b32.xlu0 %v2719_v28, %s2478_s10 }
 0x23c   : > { %v634_v11 = vpop.permute.xlu1 %633 }
 0x23d   : > { %2060 = vmatpush.xpose.msk.msra.mxu1 %vm635_vm11, %v634_v11  ;;  %v2854_v31 = vpop.permute.xlu0 %934 }
 0x23f   : > { %1602 = vrot.lane.b32.xlu1 %v587_v61, %s2479_s11  ;;  %912 = vrot.lane.b32.xlu2 %v2775_v12, %s2477_s9 }
 0x241   : > { %1600 = vrot.lane.b32.xlu0 %v2723_v50, %s2479_s11  ;;  %2061 = vmatpush.xpose.msk.msra.mxu1 %vm635_vm11, %v632_v13 }
 0x244   : > { %v626_v16 = vpop.permute.xlu1 %625 }
 0x245   : > { %2062 = vmatpush.xpose.msk.msra.mxu1 %vm635_vm11, %v630_v38  ;;  %v2237_v33 = vpop.permute.xlu0 %2236 }
 0x246   : > { %v2238_v62 = vunpack.i.l.bf16 %v2237_v33 }
 0x247   : > { %1260 = vrot.lane.b32.xlu1 %v2739_v4, %s2478_s10  ;;  %914 = vrot.lane.b32.xlu2 %v2785_v14, %s2477_s9 }
 0x249   : > { %1264 = vrot.lane.b32.xlu0 %v2717_v63, %s2478_s10  ;;  %2063 = vmatpush.xpose.msk.msra.mxu1 %vm635_vm11, %v628_v15 }
 0x24c   : > { %v620_v23 = vpop.permute.xlu1 %619 }
 0x24d   : > { %2064 = vmatpush.xpose.msk.msra.mxu1 %vm635_vm11, %v626_v16 }
 0x24f   : > { %1580 = vrot.lane.b32.xlu1 %v597_v17, %s2480_s12  ;;  %916 = vrot.lane.b32.xlu2 %v597_v17, %s2477_s9 }
 0x251   : > { %1594 = vrot.lane.b32.xlu0 %v2747_v6, %s2479_s11  ;;  %2065 = vmatpush.xpose.msk.msra.mxu1 %vm635_vm11, %v624_v18 }
 0x254   : > { %v2839_v27 = vpop.permute.xlu1 %940 }
 0x257   : > { %1252 = vrot.lane.b32.xlu1 %v2765_v10, %s2481_s13  ;;  %2241 = vrot.lane.b32.xlu2 %v2804_v19, %s2476_s30 }
 0x259   : > { %1244 = vrot.lane.b32.xlu0 %v2775_v12, %s2481_s13 }
 0x25c   : > { %v2850_v30 = vpop.permute.xlu1 %938 }
 0x25f   : > { %2251 = vrot.lane.b32.xlu1 %v2814_v22, %s2476_s30  ;;  %918 = vrot.lane.b32.xlu2 %v598_v7, %s2477_s9 }
 0x261   : > { %1246 = vrot.lane.b32.xlu0 %v2785_v14, %s2481_s13 }
 0x264   : > { %v2862_v21 = vpop.permute.xlu1 %936 }
 0x267   : > { %1606 = vrot.lane.b32.xlu1 %v2725_v0, %s2479_s11  ;;  %1604 = vrot.lane.b32.xlu2 %v2719_v28, %s2479_s11 }
 0x269   : > { %1248 = vrot.lane.b32.xlu0 %v597_v17, %s2481_s13 }
 0x26f   : > { %1586 = vrot.lane.b32.xlu1 %v2758_v9, %s2480_s12  ;;  %1268 = vrot.lane.b32.xlu2 %v2723_v50, %s2478_s10 }
 0x271   : > { %1582 = vrot.lane.b32.xlu0 %v598_v7, %s2480_s12 }
 0x277   : > { %924 = vrot.lane.b32.xlu2 %v2833_v24, %s2477_s9 }
 0x279   : > { %1274 = vrot.lane.b32.xlu0 %v2725_v0, %s2478_s10 }
 0x27f   : > { %1266 = vrot.lane.b32.xlu2 %v2727_v1, %s2478_s10 }
 0x281   : > { %926 = vrot.lane.b32.xlu0 %v2844_v49, %s2477_s9  ;;  %v622_v29 = vpop.permute.xlu2 %621 }
 0x282   : > { %2066 = vmatpush.xpose.msk.msra.mxu1 %vm635_vm11, %v622_v29  ;;  %v607_v29 = vld [vmem:[%s3606_s1 + $0x20] sm:$0xff] }
 0x286   : > { %2067 = vmatpush.xpose.msk.msra.mxu1 %vm635_vm11, %v620_v23 }
 0x287   : > { %1598 = vrot.lane.b32.xlu2 %v2727_v1, %s2479_s11 }
 0x289   : > { %2068 = vmatmul.msk.f32.vlgmr.msra.gmra.mxu1 %vm635_vm11, %v2775_v12  ;;  %v2858_v32 = vpop.permute.xlu2 %932 }
 0x28f   : > { %1596 = vrot.lane.b32.xlu2 %v2717_v63, %s2479_s11  ;;  %v2239_v63 = vunpack.i.h.bf16 %v2237_v33 }
 0x291   : > { %2069 = vmatmul.msk.f32.gmra.mxu1 %vm635_vm11, %v2785_v14  ;;  %v2866_v25 = vpop.permute.xlu2 %928 }
 0x297   : > { %1262 = vrot.lane.b32.xlu2 %v2747_v6, %s2478_s10 }
 0x299   : > { %v2870_v34 = vpop.permute.xlu1 %930  ;;  %2070 = vmatmul.msk.f32.gmra.mxu1 %vm635_vm11, %v597_v17  ;;  %v2873_v37 = vpop.permute.xlu2 %912 }
 0x29b   : > { %v2247_v35 = vpop.permute.xlu0 %2246 }
 0x29c   : > { %v2248_v1 = vunpack.i.l.bf16 %v2247_v35  ;;  %v2249_v3 = vunpack.i.h.bf16 %v2247_v35 }
 0x29f   : > { %1592 = vrot.lane.b32.xlu2 %v2739_v4, %s2479_s11 }
 0x2a1   : > { %v2877_v39 = vpop.permute.xlu1 %922  ;;  %2071 = vmatmul.msk.f32.gmra.mxu1 %vm635_vm11, %v598_v7  ;;  %v2880_v41 = vpop.permute.xlu2 %914 }
 0x2a3   : > { %v2882_v42 = vpop.permute.xlu0 %920 }
 0x2a7   : > { %1576 = vrot.lane.b32.xlu2 %v2775_v12, %s2480_s12 }
 0x2a9   : > { %v2886_v43 = vpop.permute.xlu1 %1270  ;;  %2072 = vmatmul.msk.f32.gmra.mxu1 %vm635_vm11, %v2765_v10  ;;  %v2890_v40 = vpop.permute.xlu2 %916 }
 0x2ab   : > { %v2892_v44 = vpop.permute.xlu0 %1272 }
 0x2af   : > { %1578 = vrot.lane.b32.xlu2 %v2785_v14, %s2480_s12 }
 0x2b1   : > { %v2896_v45 = vpop.permute.xlu1 %1602  ;;  %2073 = vmatmul.msk.f32.gmra.mxu1 %vm635_vm11, %v2758_v9  ;;  %v2242_v46 = vpop.permute.xlu2 %2241 }
 0x2b2   : > { %v2243_v36 = vunpack.i.l.bf16 %v2242_v46 }
 0x2b3   : > { %v2900_v47 = vpop.permute.xlu0 %1600 }
 0x2b7   : > { %1250 = vrot.lane.b32.xlu2 %v598_v7, %s2481_s13 }
 0x2b9   : > { %v2903_v48 = vpop.permute.xlu1 %1260  ;;  %2074 = vmatmul.msk.f32.gmra.mxu1 %vm635_vm11, %v2833_v24  ;;  %v2907_v51 = vpop.permute.xlu2 %918 }
 0x2bb   : > { %v1265_v53 = vpop.permute.xlu0 %1264 }
 0x2bf   : > { %1584 = vrot.lane.b32.xlu2 %v2765_v10, %s2480_s12 }
 0x2c1   : > { %v2911_v52 = vpop.permute.xlu1 %1580  ;;  %2075 = vmatmul.msk.f32.gmra.mxu1 %vm635_vm11, %v2844_v49  ;;  %v2915_v54 = vpop.permute.xlu2 %1604 }
 0x2c3   : > { %v2917_v55 = vpop.permute.xlu0 %1594 }
 0x2c7   : > { %942 = vrot.lane.b32.xlu2 %v2725_v0, %s2475_s26  ;;  %v2244_v0 = vunpack.i.h.bf16 %v2242_v46  ;;  %s2487_s26 = smov 24  }
 0x2c9   : > { %v2921_v26 = vpop.permute.xlu1 %1252  ;;  %v1269_v56 = vpop.permute.xlu2 %1268 }
 0x2cb   : > { %v2923_v57 = vpop.permute.xlu0 %1244 }
 0x2cf   : > { %1256 = vrot.lane.b32.xlu2 %v2833_v24, %s2481_s13 }
 0x2d1   : > { %v2252_v20 = vpop.permute.xlu1 %2251  ;;  %v2927_v58 = vpop.permute.xlu2 %924 }
 0x2d2   : > { %v2253_v59 = vunpack.i.l.bf16 %v2252_v20  ;;  %v2254_v61 = vunpack.i.h.bf16 %v2252_v20 }
 0x2d3   : > { %v2929_v60 = vpop.permute.xlu0 %1246 }
 0x2d4   : > { %862 = vmatpush.msrb.mxu0 %v2253_v59  ;;  %2196 = vmatpush.msrb.mxu1 %v2253_v59 }
 0x2d5   : > { %2197 = vmatpush.msra.mxu2 %v2253_v59 }
 0x2d6   : > { %863 = vmatpush.msrb.mxu0 %v2254_v61  ;;  %2198 = vmatpush.msrb.mxu1 %v2254_v61 }
 0x2d7   : > { %2199 = vmatpush.msra.mxu2 %v2254_v61 }
 0x2d8   : > { %864 = vmatpush.msrb.mxu0 %v2238_v62  ;;  %2200 = vmatpush.msrb.mxu1 %v2238_v62 }
 0x2d9   : > { %2201 = vmatpush.msra.mxu2 %v2238_v62  ;;  %v1267_v28 = vpop.permute.xlu2 %1266 }
 0x2da   : > { %865 = vmatpush.msrb.mxu0 %v2239_v63  ;;  %2202 = vmatpush.msrb.mxu1 %v2239_v63 }
 0x2db   : > { %2203 = vmatpush.msra.mxu2 %v2239_v63  ;;  %v2931_v50 = vpop.permute.xlu0 %1248 }
 0x2dc   : > { %866 = vmatpush.msrb.mxu0 %v2243_v36  ;;  %2204 = vmatpush.msrb.mxu1 %v2243_v36 }
 0x2dd   : > { %2205 = vmatpush.msra.mxu2 %v2243_v36 }
 0x2de   : > { %867 = vmatpush.msrb.mxu0 %v2244_v0  ;;  %2206 = vmatpush.msrb.mxu1 %v2244_v0 }
 0x2df   : > { %2207 = vmatpush.msra.mxu2 %v2244_v0 }
 0x2e0   : > { %868 = vmatpush.msrb.mxu0 %v2248_v1  ;;  %2208 = vmatpush.msrb.mxu1 %v2248_v1 }
 0x2e1   : > { %2209 = vmatpush.msra.mxu2 %v2248_v1  ;;  %v1599_v4 = vpop.permute.xlu2 %1598 }
 0x2e2   : > { %869 = vmatpush.msrb.mxu0 %v2249_v3  ;;  %2210 = vmatpush.msrb.mxu1 %v2249_v3 }
 0x2e3   : > { %2211 = vmatpush.msra.mxu2 %v2249_v3  ;;  %v2933_v5 = vpop.permute.xlu0 %1582  ;;  %v604_v3 = vld [vmem:[%s3606_s1 + $0x8] sm:$0xff] }
 0x2e9   : > { %v1597_v6 = vpop.permute.xlu2 %1596 }
 0x2eb   : > { %v1275_v10 = vpop.permute.xlu0 %1274 }
 0x2ec   : > { %2124 = vmatpush.xpose.msk.msrb.mxu2 %vm635_vm11, %v1275_v10 }
 0x2f0   : > { %2125 = vmatpush.xpose.msk.msrb.mxu2 %vm635_vm11, %v2892_v44  ;;  %v608_v44 = vld [vmem:[%s3606_s1 + $0x28] sm:$0xff] }
 0x2f1   : > { %v1263_v11 = vpop.permute.xlu2 %1262 }
 0x2f4   : > { %2126 = vmatpush.xpose.msk.msrb.mxu2 %vm635_vm11, %v2886_v43 }
 0x2f8   : > { %2127 = vmatpush.xpose.msk.msrb.mxu2 %vm635_vm11, %v1269_v56 }
 0x2f9   : > { %v1593_v12 = vpop.permute.xlu2 %1592 }
 0x2fc   : > { %2128 = vmatpush.xpose.msk.msrb.mxu2 %vm635_vm11, %v1267_v28 }
 0x300   : > { %2129 = vmatpush.xpose.msk.msrb.mxu2 %vm635_vm11, %v1265_v53 }
 0x301   : > { %v1577_v13 = vpop.permute.xlu2 %1576 }
 0x304   : > { %2130 = vmatpush.xpose.msk.msrb.mxu2 %vm635_vm11, %v1263_v11  ;;  %v2086_v11 = vld [vmem:[%s3606_s1 + $0x50] sm:$0xff] }
 0x306   : > { %v2944_v38 = vpop.f32.mrf.mxu1 }
 0x308   : > { %2131 = vmatpush.xpose.msk.msrb.mxu2 %vm635_vm11, %v2903_v48 }
 0x309   : > { %v1579_v14 = vpop.permute.xlu2 %1578 }
 0x30e   : > { %v2948_v15 = vpop.f32.mrf.mxu1 }
 0x311   : > { %v2950_v16 = vpop.permute.xlu2 %1250 }
 0x316   : > { %v2952_v17 = vpop.f32.mrf.mxu1 }
 0x319   : > { %v1585_v18 = vpop.permute.xlu2 %1584 }
 0x31e   : > { %v2954_v7 = vpop.f32.mrf.mxu1 }
 0x321   : > { %v943_v23 = vpop.permute.xlu2 %942 }
 0x322   : > { %2092 = vmatpush.xpose.msk.msrb.mxu3 %vm635_vm11, %v943_v23 }
 0x326   : > { %v705_v33 = vpop.f32.mrf.mxu1  ;;  %2093 = vmatpush.xpose.msk.msrb.mxu3 %vm635_vm11, %v2839_v27  ;;  %v609_v27 = vld [vmem:[%s3606_s1 + $0x30] sm:$0xff] }
 0x327   : > { %v706_v35 = vadd.f32 %v705_v33, %v607_v29  ;;  %v2085_v29 = vld [vmem:[%s3606_s1 + $0x48] sm:$0xff] }
 0x329   : > { %v730_v43 = vsel %vm717_vm12, %v706_v35, -inf }
 0x32a   : > { %731 = vmax.xlane.f32.xlu0 %v730_v43  ;;  %2094 = vmatpush.xpose.msk.msrb.mxu3 %vm635_vm11, %v2850_v30 }
 0x32e   : > { %v708_v46 = vpop.f32.mrf.mxu1  ;;  %2095 = vmatpush.xpose.msk.msrb.mxu3 %vm635_vm11, %v2862_v21  ;;  %v1607_v21 = vpop.permute.xlu1 %1606 }
 0x32f   : > { %v709_v48 = vadd.f32 %v708_v46, %v608_v44  ;;  %v2084_v44 = vld [vmem:[%s3606_s1 + $0x40] sm:$0xff] }
 0x331   : > { %v733_v53 = vsel %vm717_vm12, %v709_v48, -inf }
 0x332   : > { %734 = vmax.xlane.f32.xlu2 %v733_v53  ;;  %2096 = vmatpush.xpose.msk.msrb.mxu3 %vm635_vm11, %v2854_v31 }
 0x336   : > { %v711_v30 = vpop.f32.mrf.mxu1  ;;  %2097 = vmatpush.xpose.msk.msrb.mxu3 %vm635_vm11, %v2858_v32 }
 0x337   : > { %v712_v56 = vadd.f32 %v711_v30, %v609_v27  ;;  %v2088_v27 = vld [vmem:[%s3606_s1 + $0x60] sm:$0xff] }
 0x339   : > { %v736_v20 = vsel %vm717_vm12, %v712_v56, -inf }
 0x33a   : > { %737 = vmax.xlane.f32.xlu1 %v736_v20  ;;  %2098 = vmatpush.xpose.msk.msrb.mxu3 %vm635_vm11, %v2870_v34  ;;  %v927_v34 = vpop.permute.xlu0 %926  ;;  %v2087_v20 = vld [vmem:[%s3606_s1 + $0x58] sm:$0xff] }
 0x33e   : > { %1254 = vrot.lane.b32.xlu0 %v2758_v9, %s2481_s13  ;;  %2099 = vmatpush.xpose.msk.msrb.mxu3 %vm635_vm11, %v2866_v25  ;;  %v610_v9 = vld [vmem:[%s3606_s1 + $0x38] sm:$0xff]  ;;  %v714_v31 = vpop.f32.mrf.mxu1 }
 0x33f   : > { %v715_v32 = vadd.f32 %v714_v31, %v610_v9 }
 0x341   : > { %2100 = vmatmul.msk.f32.vlgmr.msrb.gmra.mxu3 %vm635_vm11, %v2873_v37  ;;  %v739_v25 = vsel %vm717_vm12, %v715_v32, -inf  ;;  %v3022_v37 = vpop.permute.xlu2 %1256 }
 0x342   : > { %2156 = vmatpush.xpose.msk.msra.mxu3 %vm635_vm11, %v1607_v21 }
 0x346   : > { %2157 = vmatpush.xpose.msk.msra.mxu3 %vm635_vm11, %v2915_v54 }
 0x349   : > { %2101 = vmatmul.msk.f32.gmra.mxu3 %vm635_vm11, %v2880_v41 }
 0x34a   : > { %2158 = vmatpush.xpose.msk.msra.mxu3 %vm635_vm11, %v2896_v45 }
 0x34e   : > { %2159 = vmatpush.xpose.msk.msra.mxu3 %vm635_vm11, %v2900_v47 }
 0x351   : > { %2102 = vmatmul.msk.f32.gmra.mxu3 %vm635_vm11, %v2890_v40  ;;  %v1587_v40 = vpop.permute.xlu1 %1586 }
 0x352   : > { %2160 = vmatpush.xpose.msk.msra.mxu3 %vm635_vm11, %v1599_v4  ;;  %v3050_v4 = vadd.f32 %v2948_v15, %v604_v3 }
 0x356   : > { %2161 = vmatpush.xpose.msk.msra.mxu3 %vm635_vm11, %v1597_v6 }
 0x359   : > { %2103 = vmatmul.msk.f32.gmra.mxu3 %vm635_vm11, %v2907_v51 }
 0x35a   : > { %2162 = vmatpush.xpose.msk.msra.mxu3 %vm635_vm11, %v2917_v55 }
 0x35e   : > { %2163 = vmatpush.xpose.msk.msra.mxu3 %vm635_vm11, %v1593_v12 }
 0x361   : > { %2104 = vmatmul.msk.f32.gmra.mxu3 %vm635_vm11, %v2882_v42 }
 0x368   : > { %740 = vmax.xlane.f32.xlu0 %v739_v25 }
 0x369   : > { %2105 = vmatmul.msk.f32.gmra.mxu3 %vm635_vm11, %v2877_v39 }
 0x371   : > { %2106 = vmatmul.msk.f32.gmra.mxu3 %vm635_vm11, %v2927_v58 }
 0x379   : > { %2107 = vmatmul.msk.f32.gmra.mxu3 %vm635_vm11, %v927_v34 }
 0x381   : > { %2164 = vmatmul.msk.f32.vlgmr.msra.gmra.mxu3 %vm635_vm11, %v1577_v13 }
 0x389   : > { %2165 = vmatmul.msk.f32.gmra.mxu3 %vm635_vm11, %v1579_v14  ;;  %v603_v14 = vld [vmem:[%s3606_s1] sm:$0xff] }
 0x38a   : > { %v694_v23 = vadd.f32 %v2944_v38, %v603_v14 }
 0x38c   : > { %v718_v43 = vsel %vm717_vm12, %v694_v23, -inf }
 0x391   : > { %2166 = vmatmul.msk.f32.gmra.mxu3 %vm635_vm11, %v2911_v52 }
 0x399   : > { %2167 = vmatmul.msk.f32.gmra.mxu3 %vm635_vm11, %v2933_v5 }
 0x39d   : > { %v732_v41 = vpop.xlane.xlu0 %731 }
 0x39e   : > { %v746_v39 = vsub.f32 %v706_v35, %v732_v41 }
 0x3a0   : > { %v758_v42 = vmul.f32 1.442695, %v746_v39 }
 0x3a1   : > { %2168 = vmatmul.msk.f32.gmra.mxu3 %vm635_vm11, %v1585_v18 }
 0x3a2   : > { %2337 = vpow2.f32 %v758_v42 }
 0x3a5   : > { %v735_v45 = vpop.xlane.xlu2 %734 }
 0x3a6   : > { %v747_v47 = vsub.f32 %v709_v48, %v735_v45 }
 0x3a8   : > { %v3025_v51 = vpop.eup %2337  ;;  %v760_v54 = vmul.f32 1.442695, %v747_v47 }
 0x3a9   : > { %2169 = vmatmul.msk.f32.gmra.mxu3 %vm635_vm11, %v1587_v40  ;;  %v778_v52 = vsel %vm717_vm12, %v3025_v51, 0.0 }
 0x3aa   : > { %2339 = vpow2.f32 %v760_v54  ;;  %779 = vadd.xlane.f32.xlu1 %v778_v52 }
 0x3ad   : > { %v738_v55 = vpop.xlane.xlu1 %737 }
 0x3ae   : > { %v748_v58 = vsub.f32 %v712_v56, %v738_v55 }
 0x3b0   : > { %v3030_v59 = vpop.eup %2339  ;;  %v762_v61 = vmul.f32 1.442695, %v748_v58  ;;  %v3044_v1 = vpop.permute.xlu0 %1254 }
 0x3b1   : > { %v781_v62 = vsel %vm717_vm12, %v3030_v59, 0.0 }
 0x3b2   : > { %2341 = vpow2.f32 %v762_v61  ;;  %782 = vadd.xlane.f32.xlu2 %v781_v62 }
 0x3b8   : > { %v3034_v63 = vpop.eup %2341 }
 0x3b9   : > { %v784_v28 = vsel %vm717_vm12, %v3034_v63, 0.0 }
 0x3ba   : > { %785 = vadd.xlane.f32.xlu0 %v784_v28 }
 0x3c3   : > { %1258 = vrot.lane.b32.xlu1 %v2844_v49, %s2481_s13 }
 0x3c4   : > { %v993_v36 = vpop.f32.mrf.mxu3 }
 0x3c5   : > { %v3083_v48 = vadd.f32 %v2084_v44, %v993_v36  ;;  %v2090_v44 = vld [vmem:[%s3606_s1 + $0x70] sm:$0xff] }
 0x3c7   : > { %v1017_v56 = vsel %vm717_vm12, %v3083_v48, -inf }
 0x3ca   : > { %1590 = vrot.lane.b32.xlu2 %v2844_v49, %s2480_s12  ;;  %v605_v49 = vld [vmem:[%s3606_s1 + $0x10] sm:$0xff] }
 0x3cb   : > { %v700_v12 = vadd.f32 %v2952_v17, %v605_v49 }
 0x3cc   : > { %v996_v0 = vpop.f32.mrf.mxu3 }
 0x3cd   : > { %v724_v18 = vsel %vm717_vm12, %v700_v12, -inf  ;;  %v3073_v35 = vadd.f32 %v2085_v29, %v996_v0 }
 0x3ce   : > { %1588 = vrot.lane.b32.xlu0 %v2833_v24, %s2480_s12  ;;  %v721_v24 = vsel %vm717_vm12, %v3050_v4, -inf }
 0x3cf   : > { %v1020_v46 = vsel %vm717_vm12, %v3073_v35, -inf }
 0x3d4   : > { %v999_v6 = vpop.f32.mrf.mxu3 }
 0x3d5   : > { %v3064_v15 = vadd.f32 %v2086_v11, %v999_v6 }
 0x3d7   : > { %v1023_v17 = vsel %vm717_vm12, %v3064_v15, -inf }
 0x3db   : > { %v741_v5 = vpop.xlane.xlu0 %740 }
 0x3dc   : > { %v749_v10 = vsub.f32 %v715_v32, %v741_v5  ;;  %v1002_v33 = vpop.f32.mrf.mxu3 }
 0x3dd   : > { %v3097_v9 = vadd.f32 %v2087_v20, %v1002_v33 }
 0x3de   : > { %v764_v13 = vmul.f32 1.442695, %v749_v10 }
 0x3df   : > { %v1026_v32 = vsel %vm717_vm12, %v3097_v9, -inf }
 0x3e0   : > { %2343 = vpow2.f32 %v764_v13 }
 0x3e4   : > { %v1005_v30 = vpop.f32.mrf.mxu3 }
 0x3e5   : > { %v3095_v21 = vadd.f32 %v2088_v27, %v1005_v30 }
 0x3e6   : > { %v3079_v38 = vpop.eup %2343 }
 0x3e7   : > { %v787_v53 = vsel %vm717_vm12, %v3079_v38, 0.0  ;;  %v1029_v31 = vsel %vm717_vm12, %v3095_v21, -inf }
 0x3ed   : > { %722 = vmax.xlane.f32.xlu1 %v721_v24 }
 0x3f3   : > { %725 = vmax.xlane.f32.xlu2 %v724_v18  ;;  %v2089_v18 = vld [vmem:[%s3606_s1 + $0x68] sm:$0xff] }
 0x3f5   : > { %1024 = vmax.xlane.f32.xlu1 %v1023_v17 }
 0x3f8   : > { %719 = vmax.xlane.f32.xlu0 %v718_v43 }
 0x3fb   : > { %1021 = vmax.xlane.f32.xlu2 %v1020_v46 }
 0x3fd   : > { %788 = vadd.xlane.f32.xlu1 %v787_v53 }
 0x400   : > { %1018 = vmax.xlane.f32.xlu0 %v1017_v56 }
 0x405   : > { %1030 = vmax.xlane.f32.xlu1 %v1029_v31 }
 0x408   : > { %1027 = vmax.xlane.f32.xlu0 %v1026_v32  ;;  %v2091_v32 = vld [vmem:[%s3606_s1 + $0x78] sm:$0xff] }
 0x41d   : > { %v780_v25 = vpop.xlane.xlu1 %779 }
 0x41e   : > { %2345 = vrcp.f32 %v780_v25 }
 0x424   : > { %v2346_v34 = vpop.eup %2345 }
 0x425   : > { %v783_v41 = vpop.xlane.xlu2 %782  ;;  %v802_v39 = vmul.f32 %v2346_v34, %v3025_v51 }
 0x426   : > { %2347 = vrcp.f32 %v783_v41 }
 0x427   : > { %2080 = vmatmul.msk.f32.vlgmr.msra.gmra.mxu2 %vm717_vm12, %v802_v39 }
 0x42c   : > { %v2348_v42 = vpop.eup %2347 }
 0x42d   : > { %v786_v40 = vpop.xlane.xlu0 %785  ;;  %v803_v45 = vmul.f32 %v2348_v42, %v3030_v59  ;;  %v1591_v55 = vpop.permute.xlu2 %1590 }
 0x42e   : > { %2349 = vrcp.f32 %v786_v40 }
 0x42f   : > { %2081 = vmatmul.msk.f32.gmra.mxu2 %vm717_vm12, %v803_v45  ;;  %v2149_v45 = vld [vmem:[%s3606_s1 + $0xc8] sm:$0xff] }
 0x434   : > { %v2350_v47 = vpop.eup %2349 }
 0x435   : > { %v804_v54 = vmul.f32 %v2350_v47, %v3034_v63  ;;  %v3111_v51 = vpop.permute.xlu1 %1258 }
 0x437   : > { %2082 = vmatmul.msk.f32.gmra.mxu2 %vm717_vm12, %v804_v54 }
 0x440   : > { %v1589_v52 = vpop.permute.xlu0 %1588 }
 0x441   : > { %2170 = vmatmul.msk.f32.gmra.mxu3 %vm635_vm11, %v1589_v52 }
 0x449   : > { %2171 = vmatmul.msk.f32.gmra.mxu3 %vm635_vm11, %v1591_v55 }
 0x460   : > { %v723_v58 = vpop.xlane.xlu1 %722 }
 0x461   : > { %v743_v61 = vsub.f32 %v3050_v4, %v723_v58 }
 0x463   : > { %v752_v59 = vmul.f32 1.442695, %v743_v61 }
 0x465   : > { %2351 = vpow2.f32 %v752_v59 }
 0x466   : > { %v726_v62 = vpop.xlane.xlu2 %725 }
 0x467   : > { %v744_v28 = vsub.f32 %v700_v12, %v726_v62  ;;  %v1008_v12 = vpop.f32.mrf.mxu3 }
 0x468   : > { %v1025_v36 = vpop.xlane.xlu1 %1024  ;;  %v3131_v29 = vadd.f32 %v2089_v18, %v1008_v12 }
 0x469   : > { %v754_v0 = vmul.f32 1.442695, %v744_v28  ;;  %v1043_v20 = vsub.f32 %v3064_v15, %v1025_v36 }
 0x46a   : > { %v1032_v43 = vsel %vm717_vm12, %v3131_v29, -inf }
 0x46b   : > { %v3114_v63 = vpop.eup %2351  ;;  %2353 = vpow2.f32 %v754_v0  ;;  %v720_v3 = vpop.xlane.xlu0 %719  ;;  %v1053_v25 = vmul.f32 1.442695, %v1043_v20 }
 0x46c   : > { %v742_v5 = vsub.f32 %v694_v23, %v720_v3  ;;  %v769_v6 = vsel %vm717_vm12, %v3114_v63, 0.0 }
 0x46d   : > { %770 = vadd.xlane.f32.xlu0 %v769_v6 }
 0x46e   : > { %v750_v49 = vmul.f32 1.442695, %v742_v5  ;;  %v1022_v15 = vpop.xlane.xlu2 %1021 }
 0x46f   : > { %v1011_v46 = vpop.f32.mrf.mxu3  ;;  %v1042_v42 = vsub.f32 %v3073_v35, %v1022_v15 }
 0x470   : > { %2355 = vpow2.f32 %v750_v49  ;;  %v789_v10 = vpop.xlane.xlu1 %788  ;;  %v3142_v53 = vadd.f32 %v2090_v44, %v1011_v46  ;;  %v2153_v44 = vld [vmem:[%s3606_s1 + $0xe8] sm:$0xff] }
 0x471   : > { %v3118_v24 = vpop.eup %2353  ;;  %2357 = vrcp.f32 %v789_v10  ;;  %v1051_v54 = vmul.f32 1.442695, %v1042_v42 }
 0x472   : > { %v772_v4 = vsel %vm717_vm12, %v3118_v24, 0.0 }
 0x473   : > { %773 = vadd.xlane.f32.xlu1 %v772_v4  ;;  %v1019_v33 = vpop.xlane.xlu0 %1018 }
 0x474   : > { %v1041_v17 = vsub.f32 %v3083_v48, %v1019_v33  ;;  %v1035_v48 = vsel %vm717_vm12, %v3142_v53, -inf  ;;  %v2152_v33 = vld [vmem:[%s3606_s1 + $0xe0] sm:$0xff] }
 0x476   : > { %v3122_v11 = vpop.eup %2355 }
 0x477   : > { %v2358_v13 = vpop.eup %2357  ;;  %v766_v14 = vsel %vm717_vm12, %v3122_v11, 0.0 }
 0x478   : > { %767 = vadd.xlane.f32.xlu2 %v766_v14  ;;  %v805_v23 = vmul.f32 %v2358_v13, %v3079_v38  ;;  %v1049_v38 = vmul.f32 1.442695, %v1041_v17  ;;  %v1031_v35 = vpop.xlane.xlu1 %1030  ;;  %v2151_v13 = vld [vmem:[%s3606_s1 + $0xd8] sm:$0xff] }
 0x479   : > { %v1045_v58 = vsub.f32 %v3095_v21, %v1031_v35 }
 0x47a   : > { %2083 = vmatmul.msk.f32.gmra.mxu2 %vm717_vm12, %v805_v23  ;;  %2359 = vpow2.f32 %v1049_v38 }
 0x47b   : > { %2361 = vpow2.f32 %v1053_v25  ;;  %v1028_v41 = vpop.xlane.xlu0 %1027  ;;  %v1057_v36 = vmul.f32 1.442695, %v1045_v58 }
 0x47c   : > { %v1044_v40 = vsub.f32 %v3097_v9, %v1028_v41  ;;  %2363 = vpow2.f32 %v1051_v54 }
 0x47e   : > { %v1055_v52 = vmul.f32 1.442695, %v1044_v40 }
 0x480   : > { %1033 = vmax.xlane.f32.xlu2 %v1032_v43  ;;  %v3149_v27 = vpop.eup %2359  ;;  %2365 = vpow2.f32 %v1055_v52 }
 0x481   : > { %2256 = vrot.lane.b32.xlu0 %v2814_v22, %s2482_s23  ;;  %v1065_v30 = vsel %vm717_vm12, %v3149_v27, 0.0  ;;  %v3177_v39 = vpop.eup %2361  ;;  %2367 = vpow2.f32 %v1057_v36 }
 0x482   : > { %2132 = vmatmul.msk.f32.vlgmr.msrb.gmra.mxu2 %vm635_vm11, %v2923_v57  ;;  %v606_v57 = vld [vmem:[%s3606_s1 + $0x18] sm:$0xff]  ;;  %v3194_v61 = vpop.eup %2363 }
 0x483   : > { %v3161_v56 = vadd.f32 %v2954_v7, %v606_v57  ;;  %v1068_v0 = vsel %vm717_vm12, %v3194_v61, 0.0 }
 0x485   : > { %v727_v31 = vsel %vm717_vm12, %v3161_v56, -inf }
 0x486   : > { %v3202_v28 = vpop.eup %2365 }
 0x487   : > { %v1074_v3 = vsel %vm717_vm12, %v3202_v28, 0.0  ;;  %v3220_v4 = vpop.eup %2367 }
 0x488   : > { %1036 = vmax.xlane.f32.xlu2 %v1035_v48 }
 0x489   : > { %2266 = vrot.lane.b32.xlu0 %v2804_v19, %s2482_s23 }
 0x48a   : > { %2133 = vmatmul.msk.f32.gmra.mxu2 %vm635_vm11, %v2929_v60  ;;  %v1014_v60 = vpop.f32.mrf.mxu3 }
 0x48b   : > { %v3171_v34 = vadd.f32 %v2091_v32, %v1014_v60 }
 0x48c   : > { %2261 = vrot.lane.b32.xlu1 %v2734_v2, %s2482_s23 }
 0x48d   : > { %v1038_v7 = vsel %vm717_vm12, %v3171_v34, -inf }
 0x490   : > { %1066 = vadd.xlane.f32.xlu2 %v1065_v30 }
 0x491   : > { %2271 = vrot.lane.b32.xlu0 %v2754_v8, %s2482_s23 }
 0x492   : > { %2134 = vmatmul.msk.f32.gmra.mxu2 %vm635_vm11, %v2931_v50  ;;  %v1657_v50 = vpop.f32.mrf.mxu3 }
 0x498   : > { %728 = vmax.xlane.f32.xlu2 %v727_v31 }
 0x49a   : > { %2135 = vmatmul.msk.f32.gmra.mxu2 %vm635_vm11, %v2950_v16  ;;  %v1071_v16 = vsel %vm717_vm12, %v3177_v39, 0.0  ;;  %v1660_v47 = vpop.f32.mrf.mxu3 }
 0x4a0   : > { %1039 = vmax.xlane.f32.xlu2 %v1038_v7 }
 0x4a2   : > { %2136 = vmatmul.msk.f32.gmra.mxu2 %vm635_vm11, %v2921_v26  ;;  %v3188_v26 = vadd.f32 %v2149_v45, %v1660_v47  ;;  %v1663_v59 = vpop.f32.mrf.mxu3 }
 0x4a4   : > { %v1684_v9 = vsel %vm717_vm12, %v3188_v26, -inf }
 0x4a8   : > { %1072 = vadd.xlane.f32.xlu2 %v1071_v16 }
 0x4aa   : > { %v883_v55 = vpop.f32.mrf.mxu2  ;;  %2137 = vmatmul.msk.f32.gmra.mxu2 %vm635_vm11, %v3044_v1  ;;  %v2148_v1 = vld [vmem:[%s3606_s1 + $0xc0] sm:$0xff]  ;;  %v1666_v10 = vpop.f32.mrf.mxu3 }
 0x4ab   : > { %899 = vst.msk [vmem:[#allocation2 + $0x20] sm:$0xff] %vm635_vm11, %v883_v55  ;;  %v3206_v21 = vadd.f32 %v2148_v1, %v1657_v50  ;;  %v3229_v14 = vadd.f32 %v2151_v13, %v1666_v10 }
 0x4ad   : > { %v1681_v6 = vsel %vm717_vm12, %v3206_v21, -inf  ;;  %v1690_v23 = vsel %vm717_vm12, %v3229_v14, -inf }
 0x4b0   : > { %1685 = vmax.xlane.f32.xlu2 %v1684_v9 }
 0x4b2   : > { %v886_v62 = vpop.f32.mrf.mxu2  ;;  %2138 = vmatmul.msk.f32.gmra.mxu2 %vm635_vm11, %v3022_v37  ;;  %v2150_v37 = vld [vmem:[%s3606_s1 + $0xd0] sm:$0xff]  ;;  %v1669_v18 = vpop.f32.mrf.mxu3 }
 0x4b3   : > { %900 = vst.msk [vmem:[#allocation2 + $0x28] sm:$0xff] %vm635_vm11, %v886_v62  ;;  %v3217_v49 = vadd.f32 %v2150_v37, %v1663_v59  ;;  %v3236_v17 = vadd.f32 %v2152_v33, %v1669_v18 }
 0x4b5   : > { %v1687_v12 = vsel %vm717_vm12, %v3217_v49, -inf  ;;  %v1693_v43 = vsel %vm717_vm12, %v3236_v17, -inf }
 0x4b6   : > { %1069 = vadd.xlane.f32.xlu1 %v1068_v0 }
 0x4b8   : > { %1075 = vadd.xlane.f32.xlu2 %v1074_v3 }
 0x4ba   : > { %v889_v5 = vpop.f32.mrf.mxu2  ;;  %2139 = vmatmul.msk.f32.gmra.mxu2 %vm635_vm11, %v3111_v51  ;;  %v1077_v51 = vsel %vm717_vm12, %v3220_v4, 0.0  ;;  %v1672_v46 = vpop.f32.mrf.mxu3 }
 0x4bb   : > { %901 = vst.msk [vmem:[#allocation2 + $0x30] sm:$0xff] %vm635_vm11, %v889_v5  ;;  %1682 = vmax.xlane.f32.xlu0 %v1681_v6  ;;  %v3245_v38 = vadd.f32 %v2153_v44, %v1672_v46 }
 0x4bd   : > { %v1696_v48 = vsel %vm717_vm12, %v3245_v38, -inf }
 0x4c0   : > { %1688 = vmax.xlane.f32.xlu2 %v1687_v12 }
 0x4c3   : > { %1078 = vadd.xlane.f32.xlu0 %v1077_v51 }
 0x4c4   : > { %v3251_v60 = vpop.f32.mrf.mxu3 }
 0x4c8   : > { %1691 = vmax.xlane.f32.xlu2 %v1690_v23 }
 0x4cf   : > { %2281 = vrot.lane.b32.xlu1 %v2814_v22, %s2483_s19 }
 0x4d0   : > { %1694 = vmax.xlane.f32.xlu2 %v1693_v43 }
 0x4d7   : > { %2291 = vrot.lane.b32.xlu1 %v2734_v2, %s2483_s19 }
 0x4d8   : > { %1697 = vmax.xlane.f32.xlu2 %v1696_v48 }
 0x4e0   : > { %v771_v30 = vpop.xlane.xlu0 %770 }
 0x4e6   : > { %v774_v15 = vpop.xlane.xlu1 %773 }
 0x4eb   : > { %v768_v57 = vpop.xlane.xlu2 %767 }
 0x4ec   : > { %2369 = vrcp.f32 %v768_v57 }
 0x4ed   : > { %2371 = vrcp.f32 %v771_v30 }
 0x4f0   : > { %2276 = vrot.lane.b32.xlu2 %v2814_v22, %s2484_s22  ;;  %v2155_v22 = vld [vmem:[%s3606_s1 + $0xf8] sm:$0xff] }
 0x4f2   : > { %v2370_v20 = vpop.eup %2369 }
 0x4f3   : > { %v2257_v31 = vpop.permute.xlu0 %2256  ;;  %v1034_v32 = vpop.xlane.xlu2 %1033  ;;  %v798_v25 = vmul.f32 %v2370_v20, %v3122_v11 }
 0x4f4   : > { %v2258_v50 = vunpack.i.l.bf16 %v2257_v31  ;;  %v1046_v7 = vsub.f32 %v3131_v29, %v1034_v32  ;;  %v2259_v41 = vunpack.i.h.bf16 %v2257_v31  ;;  %v2372_v40 = vpop.eup %2371  ;;  %v1678_v11 = vpop.f32.mrf.mxu3 }
 0x4f5   : > { %2076 = vmatmul.msk.f32.vlgmr.msrb.gmra.mxu0 %vm717_vm12, %v798_v25  ;;  %v799_v45 = vmul.f32 %v2372_v40, %v3114_v63  ;;  %v3264_v47 = vadd.f32 %v2155_v22, %v1678_v11 }
 0x4f6   : > { %v1059_v42 = vmul.f32 1.442695, %v1046_v7  ;;  %1161 = vmatpush.msra.mxu0 %v2258_v50 }
 0x4f7   : > { %v1702_v63 = vsel %vm717_vm12, %v3264_v47, -inf }
 0x4f8   : > { %2373 = vpow2.f32 %v1059_v42  ;;  %2301 = vrot.lane.b32.xlu2 %v2804_v19, %s2483_s19  ;;  %1162 = vmatpush.msra.mxu0 %v2259_v41 }
 0x4f9   : > { %2375 = vrcp.f32 %v774_v15 }
 0x4fb   : > { %v2267_v16 = vpop.permute.xlu0 %2266  ;;  %v1037_v29 = vpop.xlane.xlu2 %1036 }
 0x4fc   : > { %v1047_v54 = vsub.f32 %v3142_v53, %v1037_v29  ;;  %v2268_v0 = vunpack.i.l.bf16 %v2267_v16  ;;  %v2269_v5 = vunpack.i.h.bf16 %v2267_v16 }
 0x4fd   : > { %2077 = vmatmul.msk.f32.gmra.mxu0 %vm717_vm12, %v799_v45  ;;  %v892_v52 = vpop.f32.mrf.mxu2 }
 0x4fe   : > { %v3268_v55 = vpop.eup %2373  ;;  %v1061_v35 = vmul.f32 1.442695, %v1047_v54  ;;  %902 = vst.msk [vmem:[#allocation2 + $0x38] sm:$0xff] %vm635_vm11, %v892_v52  ;;  %v2262_v9 = vpop.permute.xlu1 %2261 }
 0x4ff   : > { %v2263_v58 = vunpack.i.l.bf16 %v2262_v9  ;;  %v1080_v59 = vsel %vm717_vm12, %v3268_v55, 0.0  ;;  %v2376_v62 = vpop.eup %2375  ;;  %v2264_v53 = vunpack.i.h.bf16 %v2262_v9 }
 0x500   : > { %2377 = vpow2.f32 %v1061_v35  ;;  %1081 = vadd.xlane.f32.xlu0 %v1080_v59  ;;  %v800_v36 = vmul.f32 %v2376_v62, %v3118_v24 }
 0x501   : > { %1703 = vmax.xlane.f32.xlu1 %v1702_v63  ;;  %1163 = vmatpush.msra.mxu0 %v2263_v58 }
 0x503   : > { %v1067_v1 = vpop.xlane.xlu2 %1066  ;;  %1164 = vmatpush.msra.mxu0 %v2264_v53  ;;  %v2272_v3 = vpop.permute.xlu0 %2271 }
 0x504   : > { %2379 = vrcp.f32 %v1067_v1  ;;  %v2273_v10 = vunpack.i.l.bf16 %v2272_v3  ;;  %v2274_v13 = vunpack.i.h.bf16 %v2272_v3 }
 0x505   : > { %2078 = vmatmul.msk.f32.gmra.mxu0 %vm717_vm12, %v800_v36  ;;  %v1325_v48 = vpop.f32.mrf.mxu2 }
 0x506   : > { %v3277_v37 = vpop.eup %2377  ;;  %1165 = vmatpush.msra.mxu0 %v2268_v0 }
 0x507   : > { %v1083_v6 = vsel %vm717_vm12, %v3277_v37, 0.0 }
 0x508   : > { %1166 = vmatpush.msra.mxu0 %v2269_v5  ;;  %1084 = vadd.xlane.f32.xlu0 %v1083_v6  ;;  %v2119_v5 = vld [vmem:[%s3606_s1 + $0x98] sm:$0xff] }
 0x50a   : > { %v2380_v12 = vpop.eup %2379  ;;  %1167 = vmatpush.msra.mxu0 %v2273_v10 }
 0x50b   : > { %v1097_v24 = vmul.f32 %v2380_v12, %v3149_v27  ;;  %v729_v51 = vpop.xlane.xlu2 %728  ;;  %v2154_v27 = vld [vmem:[%s3606_s1 + $0xf0] sm:$0xff] }
 0x50c   : > { %v745_v18 = vsub.f32 %v3161_v56, %v729_v51  ;;  %1168 = vmatpush.msra.mxu0 %v2274_v13  ;;  %v2116_v56 = vld [vmem:[%s3606_s1 + $0x80] sm:$0xff]  ;;  %v3296_v57 = vadd.f32 %v2154_v27, %v3251_v60  ;;  %v2117_v60 = vld [vmem:[%s3606_s1 + $0x88] sm:$0xff] }
 0x50d   : > { %2108 = vmatmul.msk.f32.vlgmr.msra.gmra.mxu0 %vm717_vm12, %v1097_v24  ;;  %v3298_v20 = vadd.f32 %v2116_v56, %v1325_v48  ;;  %v1328_v7 = vpop.f32.mrf.mxu2 }
 0x50e   : > { %v756_v23 = vmul.f32 1.442695, %v745_v18  ;;  %v1699_v32 = vsel %vm717_vm12, %v3296_v57, -inf  ;;  %v3313_v41 = vadd.f32 %v2117_v60, %v1328_v7 }
 0x50f   : > { %v1349_v50 = vsel %vm717_vm12, %v3298_v20, -inf }
 0x510   : > { %2381 = vpow2.f32 %v756_v23  ;;  %v1352_v42 = vsel %vm717_vm12, %v3313_v41, -inf  ;;  %v2120_v23 = vld [vmem:[%s3606_s1 + $0xa0] sm:$0xff] }
 0x513   : > { %v1040_v33 = vpop.xlane.xlu2 %1039 }
 0x514   : > { %v1048_v43 = vsub.f32 %v3171_v34, %v1040_v33 }
 0x515   : > { %v1331_v35 = vpop.f32.mrf.mxu2 }
 0x516   : > { %v3285_v44 = vpop.eup %2381  ;;  %v1063_v46 = vmul.f32 1.442695, %v1048_v43 }
 0x517   : > { %v775_v30 = vsel %vm717_vm12, %v3285_v44, 0.0 }
 0x518   : > { %2383 = vpow2.f32 %v1063_v46  ;;  %776 = vadd.xlane.f32.xlu0 %v775_v30  ;;  %v2121_v30 = vld [vmem:[%s3606_s1 + $0xa8] sm:$0xff] }
 0x51b   : > { %v1073_v34 = vpop.xlane.xlu2 %1072 }
 0x51e   : > { %v3300_v31 = vpop.eup %2383 }
 0x51f   : > { %v1086_v25 = vsel %vm717_vm12, %v3300_v31, 0.0 }
 0x520   : > { %1700 = vmax.xlane.f32.xlu0 %v1699_v32  ;;  %1087 = vadd.xlane.f32.xlu1 %v1086_v25 }
 0x521   : > { %1350 = vmax.xlane.f32.xlu2 %v1349_v50 }
 0x523   : > { %v3311_v15 = vpop.xlane.xlu2 %1685 }
 0x529   : > { %v1070_v40 = vpop.xlane.xlu1 %1069  ;;  %1353 = vmax.xlane.f32.xlu2 %v1352_v42  ;;  %v2122_v42 = vld [vmem:[%s3606_s1 + $0xb0] sm:$0xff] }
 0x52a   : > { %2385 = vrcp.f32 %v1070_v40 }
 0x52b   : > { %v1076_v22 = vpop.xlane.xlu2 %1075  ;;  %2387 = vrcp.f32 %v1073_v34 }
 0x52e   : > { %v1683_v11 = vpop.xlane.xlu0 %1682 }
 0x52f   : > { %v1705_v16 = vsub.f32 %v3206_v21, %v1683_v11  ;;  %v1706_v11 = vsub.f32 %v3188_v26, %v3311_v15 }
 0x530   : > { %v2386_v29 = vpop.eup %2385 }
 0x531   : > { %v1713_v45 = vmul.f32 1.442695, %v1705_v16  ;;  %v1098_v54 = vmul.f32 %v2386_v29, %v3194_v61  ;;  %v2388_v9 = vpop.eup %2387  ;;  %v2118_v61 = vld [vmem:[%s3606_s1 + $0x90] sm:$0xff]  ;;  %v2123_v29 = vld [vmem:[%s3606_s1 + $0xb8] sm:$0xff] }
 0x532   : > { %v1099_v21 = vmul.f32 %v2388_v9, %v3177_v39  ;;  %v3337_v53 = vadd.f32 %v2118_v61, %v1331_v35  ;;  %v1334_v39 = vpop.f32.mrf.mxu2 }
 0x533   : > { %2389 = vpow2.f32 %v1713_v45  ;;  %v3319_v52 = vpop.xlane.xlu2 %1688  ;;  %2109 = vmatmul.msk.f32.gmra.mxu0 %vm717_vm12, %v1098_v54  ;;  %v3348_v12 = vadd.f32 %v2119_v5, %v1334_v39  ;;  %v1715_v54 = vmul.f32 1.442695, %v1706_v11 }
 0x534   : > { %2286 = vrot.lane.b32.xlu0 %v2734_v2, %s2484_s22  ;;  %2391 = vrcp.f32 %v1076_v22  ;;  %v1355_v3 = vsel %vm717_vm12, %v3337_v53, -inf }
 0x535   : > { %v1358_v18 = vsel %vm717_vm12, %v3348_v12, -inf }
 0x536   : > { %v1079_v2 = vpop.xlane.xlu0 %1078 }
 0x537   : > { %2393 = vrcp.f32 %v1079_v2 }
 0x538   : > { %2395 = vpow2.f32 %v1715_v54 }
 0x539   : > { %v3324_v58 = vpop.eup %2389 }
 0x53a   : > { %v1729_v59 = vsel %vm717_vm12, %v3324_v58, 0.0  ;;  %v2392_v63 = vpop.eup %2391 }
 0x53b   : > { %1730 = vadd.xlane.f32.xlu1 %v1729_v59  ;;  %v3332_v62 = vpop.xlane.xlu2 %1691  ;;  %2110 = vmatmul.msk.f32.gmra.mxu0 %vm717_vm12, %v1099_v21  ;;  %v1100_v36 = vmul.f32 %v2392_v63, %v3202_v28  ;;  %v1337_v28 = vpop.f32.mrf.mxu2 }
 0x53c   : > { %2296 = vrot.lane.b32.xlu0 %v2804_v19, %s2484_s22  ;;  %v3359_v46 = vadd.f32 %v2120_v23, %v1337_v28 }
 0x53d   : > { %v2394_v10 = vpop.eup %2393 }
 0x53e   : > { %v1101_v24 = vmul.f32 %v2394_v10, %v3220_v4  ;;  %v1361_v4 = vsel %vm717_vm12, %v3359_v46, -inf  ;;  %v3386_v21 = vpop.eup %2395 }
 0x53f   : > { %v1732_v59 = vsel %vm717_vm12, %v3386_v21, 0.0 }
 0x541   : > { %v2282_v1 = vpop.permute.xlu1 %2281 }
 0x542   : > { %v2283_v0 = vunpack.i.l.bf16 %v2282_v1  ;;  %v2284_v19 = vunpack.i.h.bf16 %v2282_v1 }
 0x543   : > { %v3345_v6 = vpop.xlane.xlu2 %1694  ;;  %1356 = vmax.xlane.f32.xlu1 %v1355_v3  ;;  %2111 = vmatmul.msk.f32.gmra.mxu0 %vm717_vm12, %v1100_v36  ;;  %v1340_v48 = vpop.f32.mrf.mxu2 }
 0x544   : > { %1825 = vmatpush.msrb.mxu0 %v2283_v0  ;;  %v3366_v34 = vadd.f32 %v2121_v30, %v1340_v48 }
 0x546   : > { %1826 = vmatpush.msrb.mxu0 %v2284_v19  ;;  %v1364_v25 = vsel %vm717_vm12, %v3366_v34, -inf }
 0x549   : > { %v2292_v13 = vpop.permute.xlu1 %2291 }
 0x54a   : > { %v2293_v51 = vunpack.i.l.bf16 %v2292_v13  ;;  %v2294_v43 = vunpack.i.h.bf16 %v2292_v13 }
 0x54b   : > { %v3356_v33 = vpop.xlane.xlu2 %1697  ;;  %1359 = vmax.xlane.f32.xlu1 %v1358_v18  ;;  %2112 = vmatmul.msk.f32.gmra.mxu0 %vm717_vm12, %v1101_v24  ;;  %v1343_v60 = vpop.f32.mrf.mxu2 }
 0x54c   : > { %1827 = vmatpush.msrb.mxu0 %v2293_v51  ;;  %v3373_v22 = vadd.f32 %v2122_v42, %v1343_v60 }
 0x54e   : > { %1828 = vmatpush.msrb.mxu0 %v2294_v43  ;;  %v1367_v16 = vsel %vm717_vm12, %v3373_v22, -inf }
 0x553   : > { %v2277_v27 = vpop.permute.xlu2 %2276  ;;  %1362 = vmax.xlane.f32.xlu1 %v1361_v4  ;;  %v1346_v45 = vpop.f32.mrf.mxu2 }
 0x554   : > { %v2278_v56 = vunpack.i.l.bf16 %v2277_v27  ;;  %v2279_v32 = vunpack.i.h.bf16 %v2277_v27  ;;  %v3382_v35 = vadd.f32 %v2123_v29, %v1346_v45 }
 0x556   : > { %1493 = vmatpush.msra.mxu1 %v2278_v56  ;;  %v1370_v9 = vsel %vm717_vm12, %v3382_v35, -inf }
 0x558   : > { %1494 = vmatpush.msra.mxu1 %v2279_v32 }
 0x55b   : > { %v2302_v50 = vpop.permute.xlu2 %2301  ;;  %1365 = vmax.xlane.f32.xlu1 %v1364_v25 }
 0x55c   : > { %v2303_v7 = vunpack.i.l.bf16 %v2302_v50  ;;  %v2304_v40 = vunpack.i.h.bf16 %v2302_v50 }
 0x55e   : > { %1829 = vmatpush.msrb.mxu0 %v2303_v7  ;;  %v1709_v7 = vsub.f32 %v3236_v17, %v3345_v6 }
 0x560   : > { %1830 = vmatpush.msrb.mxu0 %v2304_v40  ;;  %v1721_v40 = vmul.f32 1.442695, %v1709_v7 }
 0x566   : > { %1368 = vmax.xlane.f32.xlu0 %v1367_v16 }
 0x56e   : > { %1371 = vmax.xlane.f32.xlu0 %v1370_v9 }
 0x572   : > { %v871_v26 = vpop.f32.mrf.mxu0 }
 0x573   : > { %895 = vst.msk [vmem:[#allocation2] sm:$0xff] %vm635_vm11, %v871_v26  ;;  %v1082_v15 = vpop.xlane.xlu0 %1081 }
 0x574   : > { %2397 = vrcp.f32 %v1082_v15  ;;  %2306 = vrot.lane.b32.xlu1 %v2754_v8, %s2484_s22  ;;  %v1704_v3 = vpop.xlane.xlu1 %1703  ;;  %s2486_s22 = smov 16  }
 0x575   : > { %v1712_v9 = vsub.f32 %v3264_v47, %v1704_v3 }
 0x576   : > { %1733 = vadd.xlane.f32.xlu0 %v1732_v59 }
 0x577   : > { %v1727_v15 = vmul.f32 1.442695, %v1712_v9 }
 0x57a   : > { %v2398_v61 = vpop.eup %2397  ;;  %v874_v2 = vpop.f32.mrf.mxu0 }
 0x57b   : > { %896 = vst.msk [vmem:[#allocation2 + $0x8] sm:$0xff] %vm635_vm11, %v874_v2  ;;  %v1085_v63 = vpop.xlane.xlu0 %1084  ;;  %v1102_v39 = vmul.f32 %v2398_v61, %v3268_v55 }
 0x57c   : > { %2399 = vrcp.f32 %v1085_v63 }
 0x57d   : > { %2113 = vmatmul.msk.f32.gmra.mxu0 %vm717_vm12, %v1102_v39 }
 0x582   : > { %v2400_v1 = vpop.eup %2399  ;;  %v877_v36 = vpop.f32.mrf.mxu0 }
 0x583   : > { %897 = vst.msk [vmem:[#allocation2 + $0x10] sm:$0xff] %vm635_vm11, %v877_v36  ;;  %v1103_v0 = vmul.f32 %v2400_v1, %v3277_v37 }
 0x585   : > { %2114 = vmatmul.msk.f32.gmra.mxu0 %vm717_vm12, %v1103_v0 }
 0x58b   : > { %v777_v5 = vpop.xlane.xlu0 %776 }
 0x58c   : > { %2401 = vrcp.f32 %v777_v5 }
 0x592   : > { %v2402_v19 = vpop.eup %2401 }
 0x593   : > { %v1088_v10 = vpop.xlane.xlu1 %1087  ;;  %v801_v28 = vmul.f32 %v2402_v19, %v3285_v44  ;;  %v3405_v43 = vpop.xlane.xlu0 %1700  ;;  %v1707_v44 = vsub.f32 %v3217_v49, %v3319_v52  ;;  %v1710_v19 = vsub.f32 %v3245_v38, %v3356_v33 }
 0x594   : > { %2403 = vrcp.f32 %v1088_v10  ;;  %v1351_v55 = vpop.xlane.xlu2 %1350 }
 0x595   : > { %v1373_v13 = vsub.f32 %v3298_v20, %v1351_v55  ;;  %2079 = vmatmul.msk.f32.vlgmr.msrb.gmra.mxu1 %vm717_vm12, %v801_v28  ;;  %v1717_v30 = vmul.f32 1.442695, %v1707_v44  ;;  %v1723_v55 = vmul.f32 1.442695, %v1710_v19 }
 0x597   : > { %v1381_v24 = vmul.f32 1.442695, %v1373_v13 }
 0x599   : > { %2405 = vpow2.f32 %v1381_v24 }
 0x59a   : > { %v2404_v51 = vpop.eup %2403 }
 0x59b   : > { %v1104_v37 = vmul.f32 %v2404_v51, %v3300_v31  ;;  %v1711_v51 = vsub.f32 %v3296_v57, %v3405_v43 }
 0x59c   : > { %v1354_v18 = vpop.xlane.xlu2 %1353 }
 0x59d   : > { %v1374_v23 = vsub.f32 %v3313_v41, %v1354_v18  ;;  %2115 = vmatmul.msk.f32.gmra.mxu0 %vm717_vm12, %v1104_v37  ;;  %v1708_v41 = vsub.f32 %v3229_v14, %v3332_v62  ;;  %v1725_v18 = vmul.f32 1.442695, %v1711_v51 }
 0x59f   : > { %v3407_v48 = vpop.eup %2405  ;;  %v1383_v20 = vmul.f32 1.442695, %v1374_v23  ;;  %v1719_v49 = vmul.f32 1.442695, %v1708_v41 }
 0x5a0   : > { %v1397_v4 = vsel %vm717_vm12, %v3407_v48, 0.0 }
 0x5a1   : > { %2407 = vpow2.f32 %v1383_v20  ;;  %1398 = vadd.xlane.f32.xlu2 %v1397_v4 }
 0x5a2   : > { %2409 = vpow2.f32 %v1717_v30 }
 0x5a3   : > { %2411 = vpow2.f32 %v1719_v49 }
 0x5a4   : > { %2413 = vpow2.f32 %v1721_v40 }
 0x5a6   : > { %v2287_v31 = vpop.permute.xlu0 %2286 }
 0x5a7   : > { %v3413_v27 = vpop.eup %2407  ;;  %v2288_v56 = vunpack.i.l.bf16 %v2287_v31  ;;  %v2289_v25 = vunpack.i.h.bf16 %v2287_v31 }
 0x5a8   : > { %v1400_v32 = vsel %vm717_vm12, %v3413_v27, 0.0  ;;  %v3419_v52 = vpop.eup %2409 }
 0x5a9   : > { %1401 = vadd.xlane.f32.xlu0 %v1400_v32  ;;  %1495 = vmatpush.msra.mxu1 %v2288_v56  ;;  %v1735_v14 = vsel %vm717_vm12, %v3419_v52, 0.0  ;;  %v3427_v11 = vpop.eup %2411  ;;  %v1170_v32 = vpop.f32.mrf.mxu0 }
 0x5aa   : > { %v1738_v29 = vsel %vm717_vm12, %v3427_v11, 0.0  ;;  %v3433_v17 = vpop.eup %2413 }
 0x5ab   : > { %1496 = vmatpush.msra.mxu1 %v2289_v25  ;;  %v1741_v54 = vsel %vm717_vm12, %v3433_v17, 0.0 }
 0x5ae   : > { %v2297_v50 = vpop.permute.xlu0 %2296  ;;  %v3421_v60 = vpop.xlane.xlu1 %1730 }
 0x5af   : > { %v2298_v42 = vunpack.i.l.bf16 %v2297_v50  ;;  %v2299_v62 = vunpack.i.h.bf16 %v2297_v50 }
 0x5b1   : > { %1736 = vadd.xlane.f32.xlu0 %v1735_v14  ;;  %1497 = vmatpush.msra.mxu1 %v2298_v42  ;;  %v1173_v25 = vpop.f32.mrf.mxu0 }
 0x5b3   : > { %1498 = vmatpush.msra.mxu1 %v2299_v62 }
 0x5b6   : > { %v1357_v16 = vpop.xlane.xlu1 %1356 }
 0x5b7   : > { %v1375_v1 = vsub.f32 %v3337_v53, %v1357_v16 }
 0x5b9   : > { %2311 = vrot.lane.b32.xlu2 %v2754_v8, %s2483_s19  ;;  %1739 = vadd.xlane.f32.xlu0 %v1738_v29  ;;  %v1385_v5 = vmul.f32 1.442695, %v1375_v1  ;;  %s2485_s19 = smov 8  }
 0x5be   : > { %v1360_v6 = vpop.xlane.xlu1 %1359 }
 0x5bf   : > { %v1376_v45 = vsub.f32 %v3348_v12, %v1360_v6 }
 0x5c1   : > { %v1387_v26 = vmul.f32 1.442695, %v1376_v45  ;;  %1742 = vadd.xlane.f32.xlu0 %v1741_v54 }
 0x5c3   : > { %2415 = vpow2.f32 %v1387_v26 }
 0x5c4   : > { %2417 = vpow2.f32 %v1727_v15 }
 0x5c6   : > { %v1363_v59 = vpop.xlane.xlu1 %1362 }
 0x5c7   : > { %v1377_v61 = vsub.f32 %v3359_v46, %v1363_v59 }
 0x5c9   : > { %v3440_v2 = vpop.eup %2415  ;;  %v1389_v8 = vmul.f32 1.442695, %v1377_v61 }
 0x5ca   : > { %v1406_v63 = vsel %vm717_vm12, %v3440_v2, 0.0  ;;  %v3444_v39 = vpop.eup %2417 }
 0x5cb   : > { %2419 = vpow2.f32 %v1389_v8  ;;  %1407 = vadd.xlane.f32.xlu1 %v1406_v63  ;;  %v1750_v46 = vsel %vm717_vm12, %v3444_v39, 0.0 }
 0x5ce   : > { %v1366_v12 = vpop.xlane.xlu1 %1365 }
 0x5cf   : > { %v1378_v47 = vsub.f32 %v3366_v34, %v1366_v12 }
 0x5d1   : > { %v3448_v36 = vpop.eup %2419  ;;  %v1391_v0 = vmul.f32 1.442695, %v1378_v47 }
 0x5d2   : > { %v1409_v3 = vsel %vm717_vm12, %v3448_v36, 0.0 }
 0x5d3   : > { %2421 = vpow2.f32 %v1391_v0  ;;  %1751 = vadd.xlane.f32.xlu1 %v1750_v46  ;;  %1410 = vadd.xlane.f32.xlu0 %v1409_v3 }
 0x5d4   : > { %2423 = vpow2.f32 %v1385_v5 }
 0x5d9   : > { %v3456_v34 = vpop.eup %2421  ;;  %v1369_v53 = vpop.xlane.xlu0 %1368 }
 0x5da   : > { %v1379_v10 = vsub.f32 %v3373_v22, %v1369_v53  ;;  %v1412_v28 = vsel %vm717_vm12, %v3456_v34, 0.0  ;;  %v3461_v24 = vpop.eup %2423 }
 0x5db   : > { %1413 = vadd.xlane.f32.xlu0 %v1412_v28  ;;  %v1403_v33 = vsel %vm717_vm12, %v3461_v24, 0.0  ;;  %v1176_v28 = vpop.f32.mrf.mxu0 }
 0x5dc   : > { %v1393_v13 = vmul.f32 1.442695, %v1379_v10 }
 0x5de   : > { %2425 = vpow2.f32 %v1393_v13 }
 0x5df   : > { %2427 = vpow2.f32 %v1723_v55 }
 0x5e1   : > { %v1372_v38 = vpop.xlane.xlu0 %1371 }
 0x5e2   : > { %v1380_v37 = vsub.f32 %v3382_v35, %v1372_v38  ;;  %1404 = vadd.xlane.f32.xlu2 %v1403_v33 }
 0x5e4   : > { %v3468_v22 = vpop.eup %2425  ;;  %v1395_v23 = vmul.f32 1.442695, %v1380_v37 }
 0x5e5   : > { %v1415_v44 = vsel %vm717_vm12, %v3468_v22, 0.0  ;;  %v3472_v20 = vpop.eup %2427 }
 0x5e6   : > { %2429 = vpow2.f32 %v1395_v23  ;;  %v2307_v4 = vpop.permute.xlu1 %2306  ;;  %1416 = vadd.xlane.f32.xlu0 %v1415_v44  ;;  %v1744_v35 = vsel %vm717_vm12, %v3472_v20, 0.0 }
 0x5e7   : > { %v2308_v57 = vunpack.i.l.bf16 %v2307_v4  ;;  %2431 = vpow2.f32 %v1725_v18  ;;  %v2309_v43 = vunpack.i.h.bf16 %v2307_v4  ;;  %v1179_v18 = vpop.f32.mrf.mxu0 }
 0x5e9   : > { %1499 = vmatpush.msra.mxu1 %v2308_v57  ;;  %v1734_v50 = vpop.xlane.xlu0 %1733 }
 0x5ea   : > { %1745 = vadd.xlane.f32.xlu2 %v1744_v35 }
 0x5eb   : > { %1500 = vmatpush.msra.mxu1 %v2309_v43 }
 0x5ec   : > { %v3476_v30 = vpop.eup %2429 }
 0x5ed   : > { %v1418_v31 = vsel %vm717_vm12, %v3476_v30, 0.0  ;;  %v3480_v41 = vpop.eup %2431 }
 0x5ee   : > { %1419 = vadd.xlane.f32.xlu0 %v1418_v31  ;;  %v1747_v56 = vsel %vm717_vm12, %v3480_v41, 0.0 }
 0x5ef   : > { %v1182_v57 = vpop.f32.mrf.mxu0 }
 0x5f2   : > { %1748 = vadd.xlane.f32.xlu2 %v1747_v56 }
 0x5fa   : > { %v1185_v31 = vpop.f32.mrf.mxu0 }
 0x60a   : > { %1202 = vrot.lane.b32.xlu2 %v1170_v32, %s2485_s19 }
 0x612   : > { %v880_v49 = vpop.f32.mrf.mxu1  ;;  %1204 = vrot.lane.b32.xlu2 %v1173_v25, %s2485_s19 }
 0x613   : > { %898 = vst.msk [vmem:[#allocation2 + $0x18] sm:$0xff] %vm635_vm11, %v880_v49 }
 0x614   : > { %v1399_v7 = vpop.xlane.xlu2 %1398 }
 0x615   : > { %2433 = vrcp.f32 %v1399_v7 }
 0x616   : > { %2435 = vrcp.f32 %v3421_v60 }
 0x61b   : > { %v2434_v42 = vpop.eup %2433 }
 0x61c   : > { %v1429_v14 = vmul.f32 %v2434_v42, %v3407_v48  ;;  %v1402_v62 = vpop.xlane.xlu0 %1401  ;;  %v2312_v40 = vpop.permute.xlu2 %2311 }
 0x61d   : > { %v2436_v16 = vpop.eup %2435  ;;  %2437 = vrcp.f32 %v1402_v62  ;;  %v2313_v29 = vunpack.i.l.bf16 %v2312_v40  ;;  %v2314_v6 = vunpack.i.h.bf16 %v2312_v40  ;;  %v1910_v62 = vld [vmem:[%s3611_s6 + $0x18] sm:$0xff] }
 0x61e   : > { %2140 = vmatmul.msk.f32.vlgmr.msra.gmra.mxu1 %vm717_vm12, %v1429_v14  ;;  %2439 = vrcp.f32 %v1734_v50  ;;  %v1761_v45 = vmul.f32 %v2436_v16, %v3324_v58  ;;  %1951 = vmatpush.msra.mxu2 %v1910_v62 }
 0x61f   : > { %1831 = vmatpush.msrb.mxu0 %v2313_v29  ;;  %v1909_v29 = vld [vmem:[%s3611_s6 + $0x10] sm:$0xff] }
 0x620   : > { %1952 = vmatpush.msra.mxu2 %v1909_v29 }
 0x621   : > { %1832 = vmatpush.msrb.mxu0 %v2314_v6 }
 0x622   : > { %2172 = vmatmul.msk.f32.vlgmr.msrb.gmra.mxu0 %vm717_vm12, %v1761_v45 }
 0x623   : > { %v2438_v54 = vpop.eup %2437 }
 0x624   : > { %v1737_v60 = vpop.xlane.xlu0 %1736  ;;  %v1430_v9 = vmul.f32 %v2438_v54, %v3413_v27  ;;  %v2440_v48 = vpop.eup %2439  ;;  %v1908_v54 = vld [vmem:[%s3611_s6 + $0x8] sm:$0xff] }
 0x625   : > { %2441 = vrcp.f32 %v1737_v60  ;;  %v1762_v26 = vmul.f32 %v2440_v48, %v3386_v21  ;;  %v1907_v60 = vld [vmem:[%s3611_s6] sm:$0xff]  ;;  %1953 = vmatpush.msra.mxu2 %v1908_v54 }
 0x626   : > { %2141 = vmatmul.msk.f32.gmra.mxu1 %vm717_vm12, %v1430_v9 }
 0x627   : > { %1954 = vmatpush.msra.mxu2 %v1907_v60 }
 0x62a   : > { %2173 = vmatmul.msk.f32.gmra.mxu0 %vm717_vm12, %v1762_v26 }
 0x62b   : > { %v2442_v59 = vpop.eup %2441 }
 0x62c   : > { %v1740_v15 = vpop.xlane.xlu0 %1739  ;;  %v1763_v58 = vmul.f32 %v2442_v59, %v3419_v52 }
 0x62d   : > { %2443 = vrcp.f32 %v1740_v15 }
 0x632   : > { %2174 = vmatmul.msk.f32.gmra.mxu0 %vm717_vm12, %v1763_v58 }
 0x633   : > { %v2444_v8 = vpop.eup %2443 }
 0x634   : > { %v1743_v61 = vpop.xlane.xlu0 %1742  ;;  %v1764_v27 = vmul.f32 %v2444_v8, %v3427_v11 }
 0x635   : > { %2445 = vrcp.f32 %v1743_v61 }
 0x63a   : > { %2175 = vmatmul.msk.f32.gmra.mxu0 %vm717_vm12, %v1764_v27 }
 0x63b   : > { %v2446_v63 = vpop.eup %2445 }
 0x63c   : > { %v1765_v12 = vmul.f32 %v2446_v63, %v3433_v17 }
 0x63e   : > { %v1408_v47 = vpop.xlane.xlu1 %1407 }
 0x642   : > { %2176 = vmatmul.msk.f32.gmra.mxu0 %vm717_vm12, %v1765_v12 }
 0x646   : > { %v1411_v52 = vpop.xlane.xlu0 %1410  ;;  %v1752_v10 = vpop.xlane.xlu1 %1751 }
 0x64e   : > { %v1414_v53 = vpop.xlane.xlu0 %1413 }
 0x655   : > { %v1405_v21 = vpop.xlane.xlu2 %1404 }
 0x656   : > { %2447 = vrcp.f32 %v1405_v21 }
 0x657   : > { %2449 = vrcp.f32 %v1408_v47 }
 0x659   : > { %v1417_v38 = vpop.xlane.xlu0 %1416 }
 0x65c   : > { %v2448_v1 = vpop.eup %2447 }
 0x65d   : > { %v1746_v0 = vpop.xlane.xlu2 %1745  ;;  %v1431_v46 = vmul.f32 %v2448_v1, %v3461_v24  ;;  %v2450_v11 = vpop.eup %2449 }
 0x65e   : > { %2451 = vrcp.f32 %v1746_v0  ;;  %v1432_v17 = vmul.f32 %v2450_v11, %v3440_v2 }
 0x65f   : > { %2142 = vmatmul.msk.f32.gmra.mxu1 %vm717_vm12, %v1431_v46  ;;  %2453 = vrcp.f32 %v1411_v52 }
 0x664   : > { %v2452_v3 = vpop.eup %2451 }
 0x665   : > { %v1749_v5 = vpop.xlane.xlu2 %1748  ;;  %v1766_v19 = vmul.f32 %v2452_v3, %v3472_v20  ;;  %v2454_v55 = vpop.eup %2453 }
 0x666   : > { %2455 = vrcp.f32 %v1749_v5  ;;  %v1433_v51 = vmul.f32 %v2454_v55, %v3448_v36  ;;  %v1420_v36 = vpop.xlane.xlu0 %1419 }
 0x667   : > { %2143 = vmatmul.msk.f32.gmra.mxu1 %vm717_vm12, %v1432_v17  ;;  %2177 = vmatmul.msk.f32.gmra.mxu0 %vm717_vm12, %v1766_v19  ;;  %2457 = vrcp.f32 %v1752_v10 }
 0x668   : > { %2459 = vrcp.f32 %v1414_v53 }
 0x669   : > { %2461 = vrcp.f32 %v1417_v38 }
 0x66a   : > { %2463 = vrcp.f32 %v1420_v36 }
 0x66c   : > { %v2456_v13 = vpop.eup %2455 }
 0x66d   : > { %v1203_v24 = vpop.permute.xlu2 %1202  ;;  %v1767_v2 = vmul.f32 %v2456_v13, %v3480_v41  ;;  %v2458_v33 = vpop.eup %2457 }
 0x66e   : > { %1227 = vst.msk [vmem:[#allocation2] sm:$0xff] %vm1226_vm13, %v1203_v24  ;;  %v2460_v37 = vpop.eup %2459  ;;  %v1768_v20 = vmul.f32 %v2458_v33, %v3444_v39  ;;  %v1188_v39 = vpop.f32.mrf.mxu0 }
 0x66f   : > { %2144 = vmatmul.msk.f32.gmra.mxu1 %vm717_vm12, %v1433_v51  ;;  %2178 = vmatmul.msk.f32.gmra.mxu0 %vm717_vm12, %v1767_v2  ;;  %v1434_v44 = vmul.f32 %v2460_v37, %v3456_v34  ;;  %v2462_v4 = vpop.eup %2461  ;;  %v2318_v37 = vld [vmem:[%s3612_s7] ss:$0 sm:$0xff] }
 0x670   : > { %v1435_v43 = vmul.f32 %v2462_v4, %v3468_v22  ;;  %v2464_v35 = vpop.eup %2463 }
 0x671   : > { %v1436_v34 = vmul.f32 %v2464_v35, %v3476_v30 }
 0x675   : > { %v1205_v23 = vpop.permute.xlu2 %1204 }
 0x676   : > { %1228 = vst.msk [vmem:[#allocation2 + $0x8] sm:$0xff] %vm1226_vm13, %v1205_v23  ;;  %v1191_v41 = vpop.f32.mrf.mxu0 }
 0x677   : > { %2145 = vmatmul.msk.f32.gmra.mxu1 %vm717_vm12, %v1434_v44  ;;  %2179 = vmatmul.msk.f32.gmra.mxu0 %vm717_vm12, %v1768_v20 }
 0x67f   : > { %2146 = vmatmul.msk.f32.gmra.mxu1 %vm717_vm12, %v1435_v43 }
 0x687   : > { %2147 = vmatmul.msk.f32.gmra.mxu1 %vm717_vm12, %v1436_v34 }
 0x69b   : > { %v1502_v56 = vpop.f32.mrf.mxu1 }
 0x69c   : > { %1534 = vrot.lane.b32.xlu0 %v1502_v56, %s2486_s22 }
 0x69f   : > { %v1834_v32 = vpop.f32.mrf.mxu0 }
 0x6a0   : > { %1866 = vrot.lane.b32.xlu1 %v1834_v32, %s2487_s26 }
 0x6a3   : > { %v1505_v25 = vpop.f32.mrf.mxu1 }
 0x6a4   : > { %1536 = vrot.lane.b32.xlu0 %v1505_v25, %s2486_s22 }
 0x6a7   : > { %v1837_v22 = vpop.f32.mrf.mxu0 }
 0x6a8   : > { %1206 = vrot.lane.b32.xlu1 %v1176_v28, %s2485_s19  ;;  %1868 = vrot.lane.b32.xlu2 %v1837_v22, %s2487_s26 }
 0x6af   : > { %v1840_v30 = vpop.f32.mrf.mxu0 }
 0x6b0   : > { %1208 = vrot.lane.b32.xlu1 %v1179_v18, %s2485_s19  ;;  %1870 = vrot.lane.b32.xlu2 %v1840_v30, %s2487_s26 }
 0x6b7   : > { %v1843_v49 = vpop.f32.mrf.mxu0 }
 0x6b8   : > { %1210 = vrot.lane.b32.xlu1 %v1182_v57, %s2485_s19  ;;  %1872 = vrot.lane.b32.xlu2 %v1843_v49, %s2487_s26 }
 0x6bf   : > { %v1846_v50 = vpop.f32.mrf.mxu0 }
 0x6c0   : > { %1212 = vrot.lane.b32.xlu1 %v1185_v31, %s2485_s19  ;;  %1874 = vrot.lane.b32.xlu2 %v1846_v50, %s2487_s26 }
 0x6c8   : > { %1214 = vrot.lane.b32.xlu1 %v1188_v39, %s2485_s19 }
 0x6d0   : > { %1216 = vrot.lane.b32.xlu1 %v1191_v41, %s2485_s19 }
 0x6dc   : > { %v1508_v7 = vpop.f32.mrf.mxu1 }
 0x6dd   : > { %1538 = vrot.lane.b32.xlu0 %v1508_v7, %s2486_s22 }
 0x6e4   : > { %v1511_v42 = vpop.f32.mrf.mxu1  ;;  %v1849_v14 = vpop.f32.mrf.mxu0 }
 0x6e5   : > { %1540 = vrot.lane.b32.xlu0 %v1511_v42, %s2486_s22  ;;  %1876 = vrot.lane.b32.xlu2 %v1849_v14, %s2487_s26 }
 0x6ec   : > { %v1514_v40 = vpop.f32.mrf.mxu1  ;;  %v1852_v16 = vpop.f32.mrf.mxu0 }
 0x6ed   : > { %1542 = vrot.lane.b32.xlu0 %v1514_v40, %s2486_s22  ;;  %1878 = vrot.lane.b32.xlu2 %v1852_v16, %s2487_s26 }
 0x6f4   : > { %v1517_v6 = vpop.f32.mrf.mxu1  ;;  %v1855_v45 = vpop.f32.mrf.mxu0 }
 0x6f5   : > { %1544 = vrot.lane.b32.xlu0 %v1517_v6, %s2486_s22  ;;  %1880 = vrot.lane.b32.xlu2 %v1855_v45, %s2487_s26 }
 0x6fc   : > { %v1520_v9 = vpop.f32.mrf.mxu1 }
 0x6fd   : > { %1546 = vrot.lane.b32.xlu0 %v1520_v9, %s2486_s22 }
 0x702   : > { %v1869_v58 = vpop.permute.xlu2 %1868 }
 0x704   : > { %v1523_v48 = vpop.f32.mrf.mxu1 }
 0x705   : > { %1548 = vrot.lane.b32.xlu0 %v1523_v48, %s2486_s22 }
 0x70a   : > { %v1871_v52 = vpop.permute.xlu2 %1870 }
 0x70e   : > { %v1535_v26 = vpop.permute.xlu0 %1534 }
 0x70f   : > { %1559 = vst.msk [vmem:[#allocation2] sm:$0xff] %vm1558_vm14, %v1535_v26 }
 0x712   : > { %v1867_v15 = vpop.permute.xlu1 %1866  ;;  %v1873_v46 = vpop.permute.xlu2 %1872 }
 0x713   : > { %1891 = vst.msk [vmem:[#allocation2] sm:$0xff] %vm1890_vm15, %v1867_v15 }
 0x716   : > { %v1537_v59 = vpop.permute.xlu0 %1536 }
 0x717   : > { %1560 = vst.msk [vmem:[#allocation2 + $0x8] sm:$0xff] %vm1558_vm14, %v1537_v59 }
 0x718   : > { %1892 = vst.msk [vmem:[#allocation2 + $0x8] sm:$0xff] %vm1890_vm15, %v1869_v58 }
 0x71a   : > { %v1207_v61 = vpop.permute.xlu1 %1206  ;;  %v1899_v8 = vld [vmem:[#allocation2] sm:$0xff]  ;;  %v1875_v5 = vpop.permute.xlu2 %1874 }
 0x71b   : > { %1229 = vst.msk [vmem:[#allocation2 + $0x10] sm:$0xff] %vm1226_vm13, %v1207_v61  ;;  %2180 = vmatmul.msk.f32.vlgmr.msra.gmra.mxu2 %vm314_vm0, %v1899_v8 }
 0x71f   : > { %v1900_v63 = vld [vmem:[#allocation2 + $0x8] sm:$0xff] }
 0x722   : > { %v1209_v27 = vpop.permute.xlu1 %1208 }
 0x723   : > { %1230 = vst.msk [vmem:[#allocation2 + $0x18] sm:$0xff] %vm1226_vm13, %v1209_v27  ;;  %2181 = vmatmul.msk.f32.gmra.mxu2 %vm314_vm0, %v1900_v63 }
 0x72a   : > { %v1211_v12 = vpop.permute.xlu1 %1210 }
 0x72b   : > { %1231 = vst.msk [vmem:[#allocation2 + $0x20] sm:$0xff] %vm1226_vm13, %v1211_v12 }
 0x732   : > { %v1213_v21 = vpop.permute.xlu1 %1212 }
 0x733   : > { %1232 = vst.msk [vmem:[#allocation2 + $0x28] sm:$0xff] %vm1226_vm13, %v1213_v21 }
 0x73a   : > { %v1215_v47 = vpop.permute.xlu1 %1214 }
 0x73b   : > { %1233 = vst.msk [vmem:[#allocation2 + $0x30] sm:$0xff] %vm1226_vm13, %v1215_v47 }
 0x73f   : > { %v1877_v53 = vpop.permute.xlu2 %1876 }
 0x742   : > { %v1217_v1 = vpop.permute.xlu1 %1216 }
 0x743   : > { %1234 = vst.msk [vmem:[#allocation2 + $0x38] sm:$0xff] %vm1226_vm13, %v1217_v1 }
 0x747   : > { %v1879_v55 = vpop.permute.xlu2 %1878 }
 0x74f   : > { %v1539_v0 = vpop.permute.xlu0 %1538  ;;  %v1881_v2 = vpop.permute.xlu2 %1880 }
 0x750   : > { %1561 = vst.msk [vmem:[#allocation2 + $0x10] sm:$0xff] %vm1558_vm14, %v1539_v0 }
 0x751   : > { %1893 = vst.msk [vmem:[#allocation2 + $0x10] sm:$0xff] %vm1890_vm15, %v1871_v52 }
 0x757   : > { %v1541_v11 = vpop.permute.xlu0 %1540 }
 0x758   : > { %1562 = vst.msk [vmem:[#allocation2 + $0x18] sm:$0xff] %vm1558_vm14, %v1541_v11  ;;  %v1901_v3 = vld [vmem:[#allocation2 + $0x10] sm:$0xff] }
 0x759   : > { %1894 = vst.msk [vmem:[#allocation2 + $0x18] sm:$0xff] %vm1890_vm15, %v1873_v46  ;;  %2182 = vmatmul.msk.f32.gmra.mxu2 %vm314_vm0, %v1901_v3 }
 0x75f   : > { %v1543_v17 = vpop.permute.xlu0 %1542 }
 0x760   : > { %1563 = vst.msk [vmem:[#allocation2 + $0x20] sm:$0xff] %vm1558_vm14, %v1543_v17  ;;  %v1902_v19 = vld [vmem:[#allocation2 + $0x18] sm:$0xff] }
 0x761   : > { %1895 = vst.msk [vmem:[#allocation2 + $0x20] sm:$0xff] %vm1890_vm15, %v1875_v5  ;;  %2183 = vmatmul.msk.f32.gmra.mxu2 %vm314_vm0, %v1902_v19 }
 0x767   : > { %v1545_v10 = vpop.permute.xlu0 %1544 }
 0x768   : > { %1564 = vst.msk [vmem:[#allocation2 + $0x28] sm:$0xff] %vm1558_vm14, %v1545_v10  ;;  %v1903_v28 = vld [vmem:[#allocation2 + $0x20] sm:$0xff] }
 0x769   : > { %1896 = vst.msk [vmem:[#allocation2 + $0x28] sm:$0xff] %vm1890_vm15, %v1877_v53  ;;  %2184 = vmatmul.msk.f32.gmra.mxu2 %vm314_vm0, %v1903_v28 }
 0x76f   : > { %v1547_v13 = vpop.permute.xlu0 %1546 }
 0x770   : > { %1565 = vst.msk [vmem:[#allocation2 + $0x30] sm:$0xff] %vm1558_vm14, %v1547_v13  ;;  %v1904_v24 = vld [vmem:[#allocation2 + $0x28] sm:$0xff] }
 0x771   : > { %1897 = vst.msk [vmem:[#allocation2 + $0x30] sm:$0xff] %vm1890_vm15, %v1879_v55  ;;  %2185 = vmatmul.msk.f32.gmra.mxu2 %vm314_vm0, %v1904_v24 }
 0x777   : > { %v1549_v51 = vpop.permute.xlu0 %1548 }
 0x778   : > { %1566 = vst.msk [vmem:[#allocation2 + $0x38] sm:$0xff] %vm1558_vm14, %v1549_v51  ;;  %v1905_v38 = vld [vmem:[#allocation2 + $0x30] sm:$0xff] }
 0x779   : > { %1898 = vst.msk [vmem:[#allocation2 + $0x38] sm:$0xff] %vm1890_vm15, %v1881_v2  ;;  %2186 = vmatmul.msk.f32.gmra.mxu2 %vm314_vm0, %v1905_v38 }
 0x780   : > { %v1906_v33 = vld [vmem:[#allocation2 + $0x38] sm:$0xff] }
 0x781   : > { %2187 = vmatmul.msk.f32.gmra.mxu2 %vm314_vm0, %v1906_v33 }
 0x79e   : > { %v1956_v18 = vpop.f32.mrf.mxu2 }
 0x79f   : > { %v1957_v23 = vadd.f32 %v2318_v37, %v1956_v18 }
 0x7a1   : > { %1980 = vst.msk [vmem:[%s305_s21] sm:$0xff] %vm314_vm0, %v1957_v23 }
 0x7a6   : > { %v1959_v44 = vpop.f32.mrf.mxu2 }
 0x7a7   : > { %v1960_v20 = vadd.f32 %v2318_v37, %v1959_v44 }
 0x7a9   : > { %1981 = vst.msk [vmem:[%s305_s21 + $0x8] sm:$0xff] %vm314_vm0, %v1960_v20 }
 0x7dc   : > { %v1962_v36 = vpop.f32.mrf.mxu2 }
 0x7dd   : > { %v1963_v4 = vadd.f32 %v2318_v37, %v1962_v36 }
 0x7df   : > { %1982 = vst.msk [vmem:[%s305_s21 + $0x10] sm:$0xff] %vm314_vm0, %v1963_v4 }
 0x7e4   : > { %v1965_v57 = vpop.f32.mrf.mxu2 }
 0x7e5   : > { %v1966_v43 = vadd.f32 %v2318_v37, %v1965_v57 }
 0x7e7   : > { %1983 = vst.msk [vmem:[%s305_s21 + $0x18] sm:$0xff] %vm314_vm0, %v1966_v43 }
 0x7ec   : > { %v1968_v35 = vpop.f32.mrf.mxu2 }
 0x7ed   : > { %v1969_v31 = vadd.f32 %v2318_v37, %v1968_v35 }
 0x7ef   : > { %1984 = vst.msk [vmem:[%s305_s21 + $0x20] sm:$0xff] %vm314_vm0, %v1969_v31 }
 0x7f4   : > { %v1971_v34 = vpop.f32.mrf.mxu2 }
 0x7f5   : > { %v1972_v39 = vadd.f32 %v2318_v37, %v1971_v34 }
 0x7f7   : > { %1985 = vst.msk [vmem:[%s305_s21 + $0x28] sm:$0xff] %vm314_vm0, %v1972_v39 }
 0x7fc   : > { %v1974_v41 = vpop.f32.mrf.mxu2 }
 0x7fd   : > { %v1975_v56 = vadd.f32 %v2318_v37, %v1974_v41 }
 0x7ff   : > { %1986 = vst.msk [vmem:[%s305_s21 + $0x30] sm:$0xff] %vm314_vm0, %v1975_v56 }
 0x804   : > { %v1977_v32 = vpop.f32.mrf.mxu2 }
 0x805   : > { %v1978_v25 = vadd.f32 %v2318_v37, %v1977_v32 }
 0x807   : > { %1987 = vst.msk [vmem:[%s305_s21 + $0x38] sm:$0xff] %vm314_vm0, %v1978_v25 }
 0x808 PF: > { %s18_s27 = sadd.s32 1, %s2471_s27  }
 0x809   : > { %p15_p4 = scmp.ge.s32.totalorder %s18_s27, 4  }
 0x80b   :  { %17 = sbr.rel (!%p15_p4) target bundleno = 1 (0x1), region = 85 }

</bundles_post_ra>
